<compile_context>
chip_gen: v6e
topology: v6e:2x2x1
jax: 0.10.0
libtpu: 0.0.40
codegen_flags: <defaults>
</compile_context>

<pallas_src>
import functools

import jax
import jax.numpy as jnp
from jax import lax
from jax.experimental import pallas as pl
from jax.experimental.pallas import tpu as pltpu

LANE = 128
MIB = 1024 * 1024


def _ceil_to(x, m):
    return ((x + m - 1) // m) * m


def _vmem_limit(buf_bytes):
    # >= live buffers + 2 MiB headroom, ideally 2x, capped at 56 MiB (v7x 64 MiB/TC).
    want = max(2 * buf_bytes, 16 * MIB)
    return int(max(min(want, 56 * MIB), buf_bytes + 2 * MIB))


# --------------------------------------------------------------------------
# Kernel 1: one SAGEConv layer (mean aggregation tiled over the node axis,
#           aggregated-h operand VMEM-resident and sliced per k-block)
# --------------------------------------------------------------------------
def sage_layer_kernel(a_ref, h_all_ref, h_self_ref, wl_ref, wr_ref, b_ref,
                      out_ref, acc_ref):
    k = pl.program_id(1)
    tile_k = a_ref.shape[1]

    @pl.when(k == 0)
    def _():
        acc_ref[...] = jnp.zeros_like(acc_ref)

    # mean-aggregation accumulation: acc += A[i-block, k-block] @ h[k-block]
    # h_all is VMEM-resident (constant index_map -> single DMA); slice here.
    row0 = pl.multiple_of(k * tile_k, tile_k)
    acc_ref[...] += jnp.dot(a_ref[...], h_all_ref[pl.ds(row0, tile_k), :],
                            preferred_element_type=jnp.float32)

    @pl.when(k == pl.num_programs(1) - 1)
    def _():
        agg = acc_ref[...].astype(jnp.bfloat16)
        z = (jnp.dot(agg, wl_ref[...], preferred_element_type=jnp.float32)
             + jnp.dot(h_self_ref[...], wr_ref[...],
                       preferred_element_type=jnp.float32)
             + b_ref[...])
        # F.normalize(z, p=2, dim=-1): z / max(||z||, 1e-12), via rsqrt (EUP)
        sumsq = jnp.sum(z * z, axis=-1, keepdims=True)
        z = z * lax.rsqrt(jnp.maximum(sumsq, 1e-24))
        # ReLU; dropout is identity at inference
        out_ref[...] = jnp.maximum(z, 0.0).astype(out_ref.dtype)


def _sage_layer(h, a, wl, wr, b, *, tile_n):
    n_pad, f_pad = h.shape
    h_pad = wl.shape[1]
    grid = (n_pad // tile_n, n_pad // tile_n)
    flops = 2 * n_pad * n_pad * f_pad + 2 * 2 * n_pad * f_pad * h_pad
    bytes_accessed = (a.size * 2 + 2 * h.size * 2 + (wl.size + wr.size) * 2
                      + b.size * 4 + n_pad * h_pad * 2)
    buf_bytes = (2 * tile_n * tile_n * 2          # A tiles (double-buffered, bf16)
                 + 2 * n_pad * f_pad * 2          # resident h (2 bufs allocated)
                 + 2 * tile_n * f_pad * 2         # h_self tiles
                 + 2 * (wl.size + wr.size) * 2    # weights
                 + 2 * b.size * 4                 # bias
                 + 2 * tile_n * h_pad * 2         # output tiles
                 + tile_n * f_pad * 4)            # f32 accumulator scratch
    return pl.pallas_call(
        sage_layer_kernel,
        out_shape=jax.ShapeDtypeStruct((n_pad, h_pad), jnp.bfloat16),
        grid_spec=pltpu.PrefetchScalarGridSpec(
            num_scalar_prefetch=0,
            grid=grid,
            in_specs=[
                pl.BlockSpec((tile_n, tile_n), lambda i, k: (i, k)),   # A tile
                pl.BlockSpec((n_pad, f_pad), lambda i, k: (0, 0)),     # h (resident)
                pl.BlockSpec((tile_n, f_pad), lambda i, k: (i, 0)),    # h rows (self)
                pl.BlockSpec((f_pad, h_pad), lambda i, k: (0, 0)),     # W_l
                pl.BlockSpec((f_pad, h_pad), lambda i, k: (0, 0)),     # W_r
                pl.BlockSpec((1, h_pad), lambda i, k: (0, 0)),         # bias
            ],
            out_specs=pl.BlockSpec((tile_n, h_pad), lambda i, k: (i, 0)),
            scratch_shapes=[pltpu.VMEM((tile_n, f_pad), jnp.float32)],
        ),
        compiler_params=pltpu.CompilerParams(
            dimension_semantics=("parallel", "arbitrary"),
            vmem_limit_bytes=_vmem_limit(buf_bytes)),
        cost_estimate=pl.CostEstimate(flops=int(flops),
                                      transcendentals=int(n_pad),
                                      bytes_accessed=int(bytes_accessed)),
    )(a, h, h, wl, wr, b)


# --------------------------------------------------------------------------
# Kernel 2: edge MLP -- pure MXU streaming over lane-dense hs/hd tiles
#           (endpoint gather is done by XLA in the wrapper)
# --------------------------------------------------------------------------
def edge_mlp_kernel(hs_ref, hd_ref, w1s_ref, w1d_ref, b1_ref, w2_ref, b2_ref,
                    out_ref):
    # Linear(2H, H) split into src/dst halves, ReLU, Linear(H, out)
    m = (jnp.dot(hs_ref[...], w1s_ref[...], preferred_element_type=jnp.float32)
         + jnp.dot(hd_ref[...], w1d_ref[...], preferred_element_type=jnp.float32)
         + b1_ref[...])
    m = jnp.maximum(m, 0.0).astype(jnp.bfloat16)
    out_ref[...] = (jnp.dot(m, w2_ref[...], preferred_element_type=jnp.float32)
                    + b2_ref[...]).astype(out_ref.dtype)


def _edge_mlp(hs, hd, w1s, w1d, b1, w2, b2, *, tile_e):
    e_pad, h_pad = hs.shape
    o_pad = w2.shape[1]
    grid = (e_pad // tile_e,)
    flops = 2 * e_pad * h_pad * (2 * h_pad + o_pad)
    bytes_accessed = (2 * e_pad * h_pad * 2
                      + (w1s.size + w1d.size + w2.size) * 2
                      + (b1.size + b2.size) * 4 + e_pad * o_pad * 2)
    buf_bytes = (2 * 2 * tile_e * h_pad * 2                  # hs, hd tiles
                 + 2 * (w1s.size + w1d.size + w2.size) * 2   # weights
                 + 2 * (b1.size + b2.size) * 4               # biases
                 + 2 * tile_e * o_pad * 2)                   # out tiles
    return pl.pallas_call(
        edge_mlp_kernel,
        out_shape=jax.ShapeDtypeStruct((e_pad, o_pad), jnp.bfloat16),
        grid_spec=pltpu.PrefetchScalarGridSpec(
            num_scalar_prefetch=0,
            grid=grid,
            in_specs=[
                pl.BlockSpec((tile_e, h_pad), lambda e: (e, 0)),   # h2[src] tile
                pl.BlockSpec((tile_e, h_pad), lambda e: (e, 0)),   # h2[dst] tile
                pl.BlockSpec((h_pad, h_pad), lambda e: (0, 0)),    # W1_src
                pl.BlockSpec((h_pad, h_pad), lambda e: (0, 0)),    # W1_dst
                pl.BlockSpec((1, h_pad), lambda e: (0, 0)),        # b1
                pl.BlockSpec((h_pad, o_pad), lambda e: (0, 0)),    # W2
                pl.BlockSpec((1, o_pad), lambda e: (0, 0)),        # b2
            ],
            out_specs=pl.BlockSpec((tile_e, o_pad), lambda e: (e, 0)),
        ),
        compiler_params=pltpu.CompilerParams(
            dimension_semantics=("parallel",),
            vmem_limit_bytes=_vmem_limit(buf_bytes)),
        cost_estimate=pl.CostEstimate(flops=int(flops),
                                      transcendentals=0,
                                      bytes_accessed=int(bytes_accessed)),
    )(hs, hd, w1s, w1d, b1, w2, b2)


# --------------------------------------------------------------------------
# Wrapper (plain-JAX glue: embedding lookup, padding, adjacency build, gather)
# --------------------------------------------------------------------------
@functools.partial(jax.jit, static_argnames=("tile_n", "tile_e"))
def edge_classifier_gnn(x, edge_index, params, *, tile_n=512, tile_e=256):
    """x: (N, 2+max_args) float32, edge_index: (2, E) int32 -> (E, out_dim) f32."""
    N = x.shape[0]
    E = edge_index.shape[1]

    # ---- embedding lookup + feature concat ----
    sign_and_args = jnp.concatenate([x[:, :1], x[:, 2:]], axis=1)
    pid = x[:, 1].astype(jnp.int32)
    h0 = jnp.concatenate([sign_and_args, params["pred_embed"][pid]],
                         axis=1).astype(jnp.float32)

    f_in = h0.shape[1]
    hidden = params["w1l"].shape[1]
    out_dim = params["we2"].shape[1]

    f_pad = _ceil_to(f_in, LANE)
    h_pad = _ceil_to(hidden, LANE)
    o_pad = _ceil_to(out_dim, LANE)
    n_pad = _ceil_to(N, tile_n)
    e_pad = _ceil_to(E, tile_e)

    # padded bf16 node features (lane-dense)
    h0p = jnp.zeros((n_pad, f_pad), jnp.bfloat16).at[:N, :f_in].set(
        h0.astype(jnp.bfloat16))

    # row-normalized adjacency (bf16): A[d, s] = 1/deg_in(d) per edge s->d
    # TODO(synk): O(N^2) densification; replace with CSR/segment-sum kernel.
    src, dst = edge_index[0].astype(jnp.int32), edge_index[1].astype(jnp.int32)
    deg = jnp.zeros((n_pad,), jnp.float32).at[dst].add(1.0)
    A = jnp.zeros((n_pad, n_pad), jnp.float32).at[dst, src].add(1.0)
    A = (A / jnp.maximum(deg, 1.0)[:, None]).astype(jnp.bfloat16)

    # padded bf16 weights / f32 biases
    def padw(w, r, c):
        return jnp.zeros((r, c), jnp.bfloat16).at[:w.shape[0], :w.shape[1]].set(
            w.astype(jnp.bfloat16))

    def padb(b, c):
        return jnp.zeros((1, c), jnp.float32).at[:, :b.shape[1]].set(
            b.astype(jnp.float32))

    w1l = padw(params["w1l"], f_pad, h_pad)
    w1r = padw(params["w1r"], f_pad, h_pad)
    b1 = padb(params["b1"], h_pad)
    w2l = padw(params["w2l"], h_pad, h_pad)
    w2r = padw(params["w2r"], h_pad, h_pad)
    b2 = padb(params["b2"], h_pad)
    we1s = padw(params["we1_src"], h_pad, h_pad)
    we1d = padw(params["we1_dst"], h_pad, h_pad)
    be1 = padb(params["be1"], h_pad)
    we2 = padw(params["we2"], h_pad, o_pad)
    be2 = padb(params["be2"], o_pad)

    # two SAGE layers (tiled reduction, bf16 in/out, f32 accumulate)
    h1 = _sage_layer(h0p, A, w1l, w1r, b1, tile_n=tile_n)
    h2 = _sage_layer(h1, A, w2l, w2r, b2, tile_n=tile_n)

    # edge-endpoint gather in the wrapper (XLA gather), padded to e_pad
    src_p = jnp.zeros((e_pad,), jnp.int32).at[:E].set(src)
    dst_p = jnp.zeros((e_pad,), jnp.int32).at[:E].set(dst)
    hs = jnp.take(h2, src_p, axis=0)
    hd = jnp.take(h2, dst_p, axis=0)

    out = _edge_mlp(hs, hd, we1s, we1d, be1, we2, be2, tile_e=tile_e)
    return out[:E, :out_dim].astype(jnp.float32)


# --------------------------------------------------------------------------
# Pure-JAX reference (f32, scatter-based aggregation) for validation
# --------------------------------------------------------------------------
def ref_forward(x, edge_index, params):
    N = x.shape[0]
    sign_and_args = jnp.concatenate([x[:, :1], x[:, 2:]], axis=1)
    pid = x[:, 1].astype(jnp.int32)
    h0 = jnp.concatenate([sign_and_args, params["pred_embed"][pid]], axis=1)
    src, dst = edge_index[0], edge_index[1]

    def sage(h, wl, wr, b):
        summed = jnp.zeros_like(h).at[dst].add(h[src])
        deg = jnp.zeros((N,), jnp.float32).at[dst].add(1.0)
        agg = summed / jnp.maximum(deg, 1.0)[:, None]
        z = agg @ wl + h @ wr + b
        z = z / jnp.maximum(jnp.linalg.norm(z, axis=-1, keepdims=True), 1e-12)
        return jnp.maximum(z, 0.0)

    h1 = sage(h0, params["w1l"], params["w1r"], params["b1"])
    h2 = sage(h1, params["w2l"], params["w2r"], params["b2"])
    m = jnp.maximum(h2[src] @ params["we1_src"] + h2[dst] @ params["we1_dst"]
                    + params["be1"], 0.0)
    return m @ params["we2"] + params["be2"]


if __name__ == "__main__":
    key = jax.random.PRNGKey(0)
    num_predicates, max_args = 10, 3
    d_pred, hidden, out_dim = 16, 32, 2
    N, E = 16, 24
    in_dim = 1 + max_args + d_pred  # numeric_dim + d_pred = 20

    keys = jax.random.split(key, 16)

    def nrm(k, shape, scale=0.1):
        return (scale * jax.random.normal(k, shape)).astype(jnp.float32)

    params = dict(
        pred_embed=nrm(keys[0], (num_predicates + 1, d_pred), 1.0),
        w1l=nrm(keys[1], (in_dim, hidden)),
        w1r=nrm(keys[2], (in_dim, hidden)),
        b1=nrm(keys[3], (1, hidden)),
        w2l=nrm(keys[4], (hidden, hidden)),
        w2r=nrm(keys[5], (hidden, hidden)),
        b2=nrm(keys[6], (1, hidden)),
        we1_src=nrm(keys[7], (hidden, hidden)),
        we1_dst=nrm(keys[8], (hidden, hidden)),
        be1=nrm(keys[9], (1, hidden)),
        we2=nrm(keys[10], (hidden, out_dim)),
        be2=nrm(keys[11], (1, out_dim)),
    )

    # node features: [sign bit, predicate_id, arg_type_0..k-1]
    sign = jax.random.bernoulli(keys[12], 0.5, (N, 1)).astype(jnp.float32)
    pid = jax.random.randint(keys[13], (N, 1), 0, num_predicates + 1).astype(jnp.float32)
    arg_t = jax.random.randint(keys[14], (N, max_args), -1, 3).astype(jnp.float32)
    x = jnp.concatenate([sign, pid, arg_t], axis=1)
    edge_index = jax.random.randint(keys[15], (2, E), 0, N, dtype=jnp.int32)

    out = edge_classifier_gnn(x, edge_index, params)
    out = jax.block_until_ready(out)
    assert out.shape == (E, out_dim)

    # bf16 MXU operands / activations with f32 accumulation -> loosened tolerance
    ref = ref_forward(x, edge_index, params)
    assert jnp.allclose(out, ref, atol=5e-2, rtol=5e-2), "mismatch vs pure-JAX reference"

    print("KERNEL_OK")
</pallas_src>

<mosaic_0001>
module attributes {stable_mosaic.version = 11 : i64} {
  func.func private @main(%arg0: i32) attributes {dimension_semantics = [#tpu.dimension_semantics<core_parallel>], iteration_bounds = array<i64: 2>, tpu.core_type = #tpu.core_type<sc_scalar_subcore>, window_params = []} {
    return
  }
}

module attributes {stable_mosaic.version = 11 : i64} {
  func.func private @main(%arg0: i32) attributes {dimension_semantics = [#tpu.dimension_semantics<core_parallel>], iteration_bounds = array<i64: 2>, tpu.core_type = #tpu.core_type<sc_scalar_subcore>, window_params = []} {
    return
  }
}

module attributes {stable_mosaic.version = 11 : i64} {
  func.func @sage_layer_kernel(%arg0: i32, %arg1: i32, %arg2: memref<512x512xbf16, #tpu.memory_space<vmem>>, %arg3: memref<512x128xbf16, #tpu.memory_space<vmem>>, %arg4: memref<512x128xbf16, #tpu.memory_space<vmem>>, %arg5: memref<128x128xbf16, #tpu.memory_space<vmem>>, %arg6: memref<128x128xbf16, #tpu.memory_space<vmem>>, %arg7: memref<1x128xf32, #tpu.memory_space<vmem>>, %arg8: memref<512x128xbf16, #tpu.memory_space<vmem>>, %arg9: memref<512x128xf32, #tpu.memory_space<vmem>>) attributes {dimension_semantics = [#tpu.dimension_semantics<parallel>, #tpu.dimension_semantics<arbitrary>], iteration_bounds = array<i64: 1, 1>, scalar_prefetch = 0 : i64, scratch_operands = 1 : i64, tpu.core_type = #tpu.core_type<tc>, window_params = [{transform_indices = @transform_0, window_bounds = array<i64: 512, 512>}, {pipeline_mode = #tpu.pipeline_mode<synchronous>, transform_indices = @transform_1, window_bounds = array<i64: 512, 128>}, {transform_indices = @transform_2, window_bounds = array<i64: 512, 128>}, {pipeline_mode = #tpu.pipeline_mode<synchronous>, transform_indices = @transform_3, window_bounds = array<i64: 128, 128>}, {pipeline_mode = #tpu.pipeline_mode<synchronous>, transform_indices = @transform_4, window_bounds = array<i64: 128, 128>}, {pipeline_mode = #tpu.pipeline_mode<synchronous>, transform_indices = @transform_5, window_bounds = array<i64: 1, 128>}, {transform_indices = @transform_6, window_bounds = array<i64: 512, 128>}]} {
    %c0_i32 = arith.constant 0 : i32
    %0 = arith.cmpi eq, %arg1, %c0_i32 : i32
    %1 = arith.extui %0 : i1 to i32
    %c0_i32_0 = arith.constant 0 : i32
    %2 = arith.cmpi ne, %1, %c0_i32_0 : i32
    scf.if %2 {
      %cst_9 = arith.constant 0.000000e+00 : f32
      %15 = vector.broadcast %cst_9 : f32 to vector<512x128xf32>
      %c0_10 = arith.constant 0 : index
      %c0_11 = arith.constant 0 : index
      %16 = vector.load %arg9[%c0_10, %c0_11] : memref<512x128xf32, #tpu.memory_space<vmem>>, vector<512x128xf32>
      tpu.vector_store %arg9[%c0_10, %c0_11], %15 {strides = array<i32>} : memref<512x128xf32, #tpu.memory_space<vmem>>, vector<512x128xf32>,
    } else {
    }
    %c512_i32 = arith.constant 512 : i32
    %3 = arith.muli %arg1, %c512_i32 : i32
    %4 = tpu.assume_multiple %3, 512 : i32
    %c0 = arith.constant 0 : index
    %c0_1 = arith.constant 0 : index
    %5 = vector.load %arg9[%c0, %c0_1] : memref<512x128xf32, #tpu.memory_space<vmem>>, vector<512x128xf32>
    %c0_2 = arith.constant 0 : index
    %c0_3 = arith.constant 0 : index
    %6 = vector.load %arg2[%c0_2, %c0_3] : memref<512x512xbf16, #tpu.memory_space<vmem>>, vector<512x512xbf16>
    %7 = arith.index_cast %4 : i32 to index
    %c0_4 = arith.constant 0 : index
    %8 = vector.load %arg3[%7, %c0_4] : memref<512x128xbf16, #tpu.memory_space<vmem>>, vector<512x128xbf16>
    %cst = arith.constant dense<0.000000e+00> : vector<512x128xf32>
    %9 = tpu.matmul %6, %8, %cst {dimension_numbers = #tpu.dot_dimension_numbers<[1], [0], [0], [1], [0, 0, 1, 1], [], []>} : vector<512x512xbf16>, vector<512x128xbf16>, vector<512x128xf32> -> vector<512x128xf32>
    %10 = arith.addf %5, %9 : vector<512x128xf32>
    %c0_5 = arith.constant 0 : index
    %c0_6 = arith.constant 0 : index
    %11 = vector.load %arg9[%c0_5, %c0_6] : memref<512x128xf32, #tpu.memory_space<vmem>>, vector<512x128xf32>
    tpu.vector_store %arg9[%c0_5, %c0_6], %10 {strides = array<i32>} : memref<512x128xf32, #tpu.memory_space<vmem>>, vector<512x128xf32>,
    %c0_i32_7 = arith.constant 0 : i32
    %12 = arith.cmpi eq, %arg1, %c0_i32_7 : i32
    %13 = arith.extui %12 : i1 to i32
    %c0_i32_8 = arith.constant 0 : i32
    %14 = arith.cmpi ne, %13, %c0_i32_8 : i32
    scf.if %14 {
      %c0_9 = arith.constant 0 : index
      %c0_10 = arith.constant 0 : index
      %15 = vector.load %arg9[%c0_9, %c0_10] : memref<512x128xf32, #tpu.memory_space<vmem>>, vector<512x128xf32>
      %16 = arith.truncf %15 : vector<512x128xf32> to vector<512x128xbf16>
      %c0_11 = arith.constant 0 : index
      %c0_12 = arith.constant 0 : index
      %17 = vector.load %arg5[%c0_11, %c0_12] : memref<128x128xbf16, #tpu.memory_space<vmem>>, vector<128x128xbf16>
      %cst_13 = arith.constant dense<0.000000e+00> : vector<512x128xf32>
      %18 = tpu.matmul %16, %17, %cst_13 {dimension_numbers = #tpu.dot_dimension_numbers<[1], [0], [0], [1], [0, 0, 1, 1], [], []>} : vector<512x128xbf16>, vector<128x128xbf16>, vector<512x128xf32> -> vector<512x128xf32>
      %c0_14 = arith.constant 0 : index
      %c0_15 = arith.constant 0 : index
      %19 = vector.load %arg4[%c0_14, %c0_15] : memref<512x128xbf16, #tpu.memory_space<vmem>>, vector<512x128xbf16>
      %c0_16 = arith.constant 0 : index
      %c0_17 = arith.constant 0 : index
      %20 = vector.load %arg6[%c0_16, %c0_17] : memref<128x128xbf16, #tpu.memory_space<vmem>>, vector<128x128xbf16>
      %cst_18 = arith.constant dense<0.000000e+00> : vector<512x128xf32>
      %21 = tpu.matmul %19, %20, %cst_18 {dimension_numbers = #tpu.dot_dimension_numbers<[1], [0], [0], [1], [0, 0, 1, 1], [], []>} : vector<512x128xbf16>, vector<128x128xbf16>, vector<512x128xf32> -> vector<512x128xf32>
      %22 = arith.addf %18, %21 : vector<512x128xf32>
      %c0_19 = arith.constant 0 : index
      %c0_20 = arith.constant 0 : index
      %23 = vector.load %arg7[%c0_19, %c0_20] : memref<1x128xf32, #tpu.memory_space<vmem>>, vector<1x128xf32>
      %24 = vector.broadcast %23 : vector<1x128xf32> to vector<512x128xf32>
      %25 = arith.addf %22, %24 : vector<512x128xf32>
      %26 = arith.mulf %25, %25 : vector<512x128xf32>
      %cst_21 = arith.constant dense<0.000000e+00> : vector<512xf32>
      %27 = vector.multi_reduction <add>, %26, %cst_21 [1] : vector<512x128xf32> to vector<512xf32>
      %28 = vector.shape_cast %27 : vector<512xf32> to vector<512x1xf32>
      %cst_22 = arith.constant 1.000000e-24 : f32
      %29 = vector.broadcast %cst_22 : f32 to vector<512x1xf32>
      %30 = arith.maximumf %28, %29 : vector<512x1xf32>
      %31 = math.rsqrt %30 : vector<512x1xf32>
      %32 = vector.broadcast %31 : vector<512x1xf32> to vector<512x128xf32>
      %33 = arith.mulf %25, %32 : vector<512x128xf32>
      %cst_23 = arith.constant 0.000000e+00 : f32
      %34 = vector.broadcast %cst_23 : f32 to vector<512x128xf32>
      %35 = arith.maximumf %33, %34 : vector<512x128xf32>
      %36 = arith.truncf %35 : vector<512x128xf32> to vector<512x128xbf16>
      %c0_24 = arith.constant 0 : index
      %c0_25 = arith.constant 0 : index
      %37 = vector.load %arg8[%c0_24, %c0_25] : memref<512x128xbf16, #tpu.memory_space<vmem>>, vector<512x128xbf16>
      tpu.vector_store %arg8[%c0_24, %c0_25], %36 {strides = array<i32>} : memref<512x128xbf16, #tpu.memory_space<vmem>>, vector<512x128xbf16>,
    } else {
    }
    return
  }
  func.func @transform_0(%arg0: i32, %arg1: i32) -> (i32, i32) {
    %c0_i32 = arith.constant 0 : i32
    return %arg0, %arg1 : i32, i32
  }
  func.func @transform_1(%arg0: i32, %arg1: i32) -> (i32, i32) {
    %c0_i32 = arith.constant 0 : i32
    %c0_i32_0 = arith.constant 0 : i32
    %c0_i32_1 = arith.constant 0 : i32
    return %c0_i32, %c0_i32_0 : i32, i32
  }
  func.func @transform_2(%arg0: i32, %arg1: i32) -> (i32, i32) {
    %c0_i32 = arith.constant 0 : i32
    %c0_i32_0 = arith.constant 0 : i32
    return %arg0, %c0_i32 : i32, i32
  }
  func.func @transform_3(%arg0: i32, %arg1: i32) -> (i32, i32) {
    %c0_i32 = arith.constant 0 : i32
    %c0_i32_0 = arith.constant 0 : i32
    %c0_i32_1 = arith.constant 0 : i32
    return %c0_i32, %c0_i32_0 : i32, i32
  }
  func.func @transform_4(%arg0: i32, %arg1: i32) -> (i32, i32) {
    %c0_i32 = arith.constant 0 : i32
    %c0_i32_0 = arith.constant 0 : i32
    %c0_i32_1 = arith.constant 0 : i32
    return %c0_i32, %c0_i32_0 : i32, i32
  }
  func.func @transform_5(%arg0: i32, %arg1: i32) -> (i32, i32) {
    %c0_i32 = arith.constant 0 : i32
    %c0_i32_0 = arith.constant 0 : i32
    %c0_i32_1 = arith.constant 0 : i32
    return %c0_i32, %c0_i32_0 : i32, i32
  }
  func.func @transform_6(%arg0: i32, %arg1: i32) -> (i32, i32) {
    %c0_i32 = arith.constant 0 : i32
    %c0_i32_0 = arith.constant 0 : i32
    return %arg0, %c0_i32 : i32, i32
  }
}

module attributes {stable_mosaic.version = 11 : i64} {
  func.func @edge_mlp_kernel(%arg0: i32, %arg1: memref<256x128xbf16, #tpu.memory_space<vmem>>, %arg2: memref<256x128xbf16, #tpu.memory_space<vmem>>, %arg3: memref<128x128xbf16, #tpu.memory_space<vmem>>, %arg4: memref<128x128xbf16, #tpu.memory_space<vmem>>, %arg5: memref<1x128xf32, #tpu.memory_space<vmem>>, %arg6: memref<128x128xbf16, #tpu.memory_space<vmem>>, %arg7: memref<1x128xf32, #tpu.memory_space<vmem>>, %arg8: memref<256x128xbf16, #tpu.memory_space<vmem>>) attributes {dimension_semantics = [#tpu.dimension_semantics<parallel>], iteration_bounds = array<i64: 1>, scalar_prefetch = 0 : i64, scratch_operands = 0 : i64, tpu.core_type = #tpu.core_type<tc>, window_params = [{transform_indices = @transform_0, window_bounds = array<i64: 256, 128>}, {transform_indices = @transform_1, window_bounds = array<i64: 256, 128>}, {pipeline_mode = #tpu.pipeline_mode<synchronous>, transform_indices = @transform_2, window_bounds = array<i64: 128, 128>}, {pipeline_mode = #tpu.pipeline_mode<synchronous>, transform_indices = @transform_3, window_bounds = array<i64: 128, 128>}, {pipeline_mode = #tpu.pipeline_mode<synchronous>, transform_indices = @transform_4, window_bounds = array<i64: 1, 128>}, {pipeline_mode = #tpu.pipeline_mode<synchronous>, transform_indices = @transform_5, window_bounds = array<i64: 128, 128>}, {pipeline_mode = #tpu.pipeline_mode<synchronous>, transform_indices = @transform_6, window_bounds = array<i64: 1, 128>}, {transform_indices = @transform_7, window_bounds = array<i64: 256, 128>}]} {
    %c0 = arith.constant 0 : index
    %c0_0 = arith.constant 0 : index
    %0 = vector.load %arg1[%c0, %c0_0] : memref<256x128xbf16, #tpu.memory_space<vmem>>, vector<256x128xbf16>
    %c0_1 = arith.constant 0 : index
    %c0_2 = arith.constant 0 : index
    %1 = vector.load %arg3[%c0_1, %c0_2] : memref<128x128xbf16, #tpu.memory_space<vmem>>, vector<128x128xbf16>
    %cst = arith.constant dense<0.000000e+00> : vector<256x128xf32>
    %2 = tpu.matmul %0, %1, %cst {dimension_numbers = #tpu.dot_dimension_numbers<[1], [0], [0], [1], [0, 0, 1, 1], [], []>} : vector<256x128xbf16>, vector<128x128xbf16>, vector<256x128xf32> -> vector<256x128xf32>
    %c0_3 = arith.constant 0 : index
    %c0_4 = arith.constant 0 : index
    %3 = vector.load %arg2[%c0_3, %c0_4] : memref<256x128xbf16, #tpu.memory_space<vmem>>, vector<256x128xbf16>
    %c0_5 = arith.constant 0 : index
    %c0_6 = arith.constant 0 : index
    %4 = vector.load %arg4[%c0_5, %c0_6] : memref<128x128xbf16, #tpu.memory_space<vmem>>, vector<128x128xbf16>
    %cst_7 = arith.constant dense<0.000000e+00> : vector<256x128xf32>
    %5 = tpu.matmul %3, %4, %cst_7 {dimension_numbers = #tpu.dot_dimension_numbers<[1], [0], [0], [1], [0, 0, 1, 1], [], []>} : vector<256x128xbf16>, vector<128x128xbf16>, vector<256x128xf32> -> vector<256x128xf32>
    %6 = arith.addf %2, %5 : vector<256x128xf32>
    %c0_8 = arith.constant 0 : index
    %c0_9 = arith.constant 0 : index
    %7 = vector.load %arg5[%c0_8, %c0_9] : memref<1x128xf32, #tpu.memory_space<vmem>>, vector<1x128xf32>
    %8 = vector.broadcast %7 : vector<1x128xf32> to vector<256x128xf32>
    %9 = arith.addf %6, %8 : vector<256x128xf32>
    %cst_10 = arith.constant 0.000000e+00 : f32
    %10 = vector.broadcast %cst_10 : f32 to vector<256x128xf32>
    %11 = arith.maximumf %9, %10 : vector<256x128xf32>
    %12 = arith.truncf %11 : vector<256x128xf32> to vector<256x128xbf16>
    %c0_11 = arith.constant 0 : index
    %c0_12 = arith.constant 0 : index
    %13 = vector.load %arg6[%c0_11, %c0_12] : memref<128x128xbf16, #tpu.memory_space<vmem>>, vector<128x128xbf16>
    %cst_13 = arith.constant dense<0.000000e+00> : vector<256x128xf32>
    %14 = tpu.matmul %12, %13, %cst_13 {dimension_numbers = #tpu.dot_dimension_numbers<[1], [0], [0], [1], [0, 0, 1, 1], [], []>} : vector<256x128xbf16>, vector<128x128xbf16>, vector<256x128xf32> -> vector<256x128xf32>
    %c0_14 = arith.constant 0 : index
    %c0_15 = arith.constant 0 : index
    %15 = vector.load %arg7[%c0_14, %c0_15] : memref<1x128xf32, #tpu.memory_space<vmem>>, vector<1x128xf32>
    %16 = vector.broadcast %15 : vector<1x128xf32> to vector<256x128xf32>
    %17 = arith.addf %14, %16 : vector<256x128xf32>
    %18 = arith.truncf %17 : vector<256x128xf32> to vector<256x128xbf16>
    %c0_16 = arith.constant 0 : index
    %c0_17 = arith.constant 0 : index
    %19 = vector.load %arg8[%c0_16, %c0_17] : memref<256x128xbf16, #tpu.memory_space<vmem>>, vector<256x128xbf16>
    tpu.vector_store %arg8[%c0_16, %c0_17], %18 {strides = array<i32>} : memref<256x128xbf16, #tpu.memory_space<vmem>>, vector<256x128xbf16>,
    return
  }
  func.func @transform_0(%arg0: i32) -> (i32, i32) {
    %c0_i32 = arith.constant 0 : i32
    %c0_i32_0 = arith.constant 0 : i32
    return %arg0, %c0_i32 : i32, i32
  }
  func.func @transform_1(%arg0: i32) -> (i32, i32) {
    %c0_i32 = arith.constant 0 : i32
    %c0_i32_0 = arith.constant 0 : i32
    return %arg0, %c0_i32 : i32, i32
  }
  func.func @transform_2(%arg0: i32) -> (i32, i32) {
    %c0_i32 = arith.constant 0 : i32
    %c0_i32_0 = arith.constant 0 : i32
    %c0_i32_1 = arith.constant 0 : i32
    return %c0_i32, %c0_i32_0 : i32, i32
  }
  func.func @transform_3(%arg0: i32) -> (i32, i32) {
    %c0_i32 = arith.constant 0 : i32
    %c0_i32_0 = arith.constant 0 : i32
    %c0_i32_1 = arith.constant 0 : i32
    return %c0_i32, %c0_i32_0 : i32, i32
  }
  func.func @transform_4(%arg0: i32) -> (i32, i32) {
    %c0_i32 = arith.constant 0 : i32
    %c0_i32_0 = arith.constant 0 : i32
    %c0_i32_1 = arith.constant 0 : i32
    return %c0_i32, %c0_i32_0 : i32, i32
  }
  func.func @transform_5(%arg0: i32) -> (i32, i32) {
    %c0_i32 = arith.constant 0 : i32
    %c0_i32_0 = arith.constant 0 : i32
    %c0_i32_1 = arith.constant 0 : i32
    return %c0_i32, %c0_i32_0 : i32, i32
  }
  func.func @transform_6(%arg0: i32) -> (i32, i32) {
    %c0_i32 = arith.constant 0 : i32
    %c0_i32_0 = arith.constant 0 : i32
    %c0_i32_1 = arith.constant 0 : i32
    return %c0_i32, %c0_i32_0 : i32, i32
  }
  func.func @transform_7(%arg0: i32) -> (i32, i32) {
    %c0_i32 = arith.constant 0 : i32
    %c0_i32_0 = arith.constant 0 : i32
    return %arg0, %c0_i32 : i32, i32
  }
}

</mosaic_0001>

<bundles_post_ra>
// kernel: edge_classifier_gnn.5
= control target key start
LH: loop header
LB: loop body
LE: loop exit
PB: predicated region body
PF: predicated region fallthrough
CT: control target
= control target key end

     0   :  { %s2099_s3 = inlined_call_operand.vmem [shape: bf16[128,128], index: 3, kind: input, shape index: {}]   ;;  %s2100_s1 = inlined_call_operand.vmem [shape: bf16[256,128], index: 1, kind: input, shape index: {}]   ;;  %s2101_s2 = inlined_call_operand.vmem [shape: bf16[128,128], index: 2, kind: input, shape index: {}]   ;;  %s2102_s0 = inlined_call_operand.vmem [shape: bf16[256,128], index: 0, kind: input, shape index: {}]   ;;  %s2103_s5 = inlined_call_operand.vmem [shape: bf16[128,128], index: 5, kind: input, shape index: {}]   ;;  %s2104_s4 = inlined_call_operand.vmem [shape: f32[1,128], index: 4, kind: input, shape index: {}]   ;;  %s2105_s6 = inlined_call_operand.vmem [shape: f32[1,128], index: 6, kind: input, shape index: {}]   ;;  %s2106_s7 = inlined_call_operand.vmem [shape: bf16[256,128], index: 7, kind: output, shape index: {}]  }
   0x1   :  { %v1665_v0 = vld [vmem:[%s2099_s3 + $0x38] sm:$0xff]   ;;  %v1666_v1 = vld [vmem:[%s2099_s3 + $0x30] sm:$0xff]   ;;  %v1667_v2 = vld [vmem:[%s2099_s3 + $0x28] sm:$0xff]  }
   0x2   :  { %1649 = vmatprep.subr.bf16.mxu1 %v1665_v0  ;;  %1505 = vmatprep.subr.bf16.mxu0 %v1665_v0  ;;  %v1668_v3 = vld [vmem:[%s2099_s3 + $0x20] sm:$0xff]   ;;  %v1669_v5 = vld [vmem:[%s2099_s3 + $0x18] sm:$0xff]   ;;  %v1670_v6 = vld [vmem:[%s2099_s3 + $0x10] sm:$0xff]  }
   0x3   :  { %1657 = vmatpush3.bf16.msra.mxu1 %v1665_v0  ;;  %1506 = vmatpush3.bf16.msra.mxu0 %v1665_v0  ;;  %v1673_v4 = vld [vmem:[%s2100_s1 + $0x40] sm:$0xff]   ;;  %v1671_v7 = vld [vmem:[%s2099_s3 + $0x8] sm:$0xff]   ;;  %v1675_v10 = vld [vmem:[%s2101_s2 + $0x38] sm:$0xff]  }
   0x4   :  { %1650 = vmatprep.subr.bf16.mxu1 %v1666_v1  ;;  %1507 = vmatprep.subr.bf16.mxu0 %v1666_v1  ;;  %v1688_v8 = vld [vmem:[%s2100_s1] sm:$0xff]   ;;  %v1674_v11 = vld [vmem:[%s2100_s1 + $0x48] sm:$0xff]   ;;  %v1676_v12 = vld [vmem:[%s2101_s2 + $0x30] sm:$0xff]  }
   0x5   :  { %1537 = vmatprep.mubr.bf16.mxu1 %v1673_v4  ;;  %v1672_v9 = vld [vmem:[%s2099_s3] sm:$0xff]   ;;  %1521 = vmatprep.mubr.bf16.mxu0 %v1688_v8  ;;  %v1689_v13 = vld [vmem:[%s2100_s1 + $0x8] sm:$0xff]   ;;  %v1677_v14 = vld [vmem:[%s2100_s1 + $0x50] sm:$0xff]  }
   0x6   :  { %v1693_v15 = vld [vmem:[%s2100_s1 + $0x10] sm:$0xff]   ;;  %v1679_v16 = vld [vmem:[%s2101_s2 + $0x28] sm:$0xff]   ;;  %v1678_v17 = vld [vmem:[%s2100_s1 + $0x58] sm:$0xff]  }
   0x7   :  { %1658 = vmatpush3.bf16.msra.mxu1 %v1666_v1  ;;  %1508 = vmatpush3.bf16.msra.mxu0 %v1666_v1  ;;  %v1680_v18 = vld [vmem:[%s2101_s2 + $0x20] sm:$0xff]   ;;  %v1694_v19 = vld [vmem:[%s2100_s1 + $0x18] sm:$0xff]   ;;  %v1682_v23 = vld [vmem:[%s2100_s1 + $0x68] sm:$0xff]  }
   0x8   :  { %1651 = vmatprep.subr.bf16.mxu1 %v1667_v2  ;;  %1509 = vmatprep.subr.bf16.mxu0 %v1667_v2  ;;  %v1681_v20 = vld [vmem:[%s2100_s1 + $0x60] sm:$0xff]   ;;  %v1683_v22 = vld [vmem:[%s2101_s2 + $0x18] sm:$0xff]   ;;  %v1698_v24 = vld [vmem:[%s2100_s1 + $0x28] sm:$0xff]  }
   0x9   :  { %v1697_v21 = vld [vmem:[%s2100_s1 + $0x20] sm:$0xff]   ;;  %v1685_v25 = vld [vmem:[%s2100_s1 + $0x70] sm:$0xff]   ;;  %v1687_v28 = vld [vmem:[%s2101_s2 + $0x8] sm:$0xff]  }
   0xa   :  { %v1684_v26 = vld [vmem:[%s2101_s2 + $0x10] sm:$0xff]   ;;  %v1686_v29 = vld [vmem:[%s2100_s1 + $0x78] sm:$0xff]   ;;  %v1691_v31 = vld [vmem:[%s2102_s0] sm:$0xff]  }
   0xb   :  { %1659 = vmatpush3.bf16.msra.mxu1 %v1667_v2  ;;  %1510 = vmatpush3.bf16.msra.mxu0 %v1667_v2  ;;  %v1701_v27 = vld [vmem:[%s2100_s1 + $0x30] sm:$0xff]   ;;  %v1702_v30 = vld [vmem:[%s2100_s1 + $0x38] sm:$0xff]   ;;  %v1690_v32 = vld [vmem:[%s2101_s2] sm:$0xff]  }
   0xc   :  { %1652 = vmatprep.subr.bf16.mxu1 %v1668_v3  ;;  %1511 = vmatprep.subr.bf16.mxu0 %v1668_v3  ;;  %v1692_v33 = vld [vmem:[%s2102_s0 + $0x8] sm:$0xff]   ;;  %v1695_v34 = vld [vmem:[%s2102_s0 + $0x10] sm:$0xff]   ;;  %v1696_v35 = vld [vmem:[%s2102_s0 + $0x18] sm:$0xff]  }
   0xd   :  { %v1699_v36 = vld [vmem:[%s2102_s0 + $0x20] sm:$0xff]   ;;  %v1700_v37 = vld [vmem:[%s2102_s0 + $0x28] sm:$0xff]   ;;  %v1703_v38 = vld [vmem:[%s2102_s0 + $0x30] sm:$0xff]  }
   0xe   :  { %v1704_v39 = vld [vmem:[%s2102_s0 + $0x38] sm:$0xff]   ;;  %v1705_v40 = vld [vmem:[%s2102_s0 + $0x40] sm:$0xff]   ;;  %v1706_v41 = vld [vmem:[%s2102_s0 + $0x48] sm:$0xff]  }
   0xf   :  { %1660 = vmatpush3.bf16.msra.mxu1 %v1668_v3  ;;  %1512 = vmatpush3.bf16.msra.mxu0 %v1668_v3  ;;  %v1707_v42 = vld [vmem:[%s2102_s0 + $0x50] sm:$0xff]   ;;  %v1708_v43 = vld [vmem:[%s2102_s0 + $0x58] sm:$0xff]   ;;  %v1709_v44 = vld [vmem:[%s2102_s0 + $0x60] sm:$0xff]  }
  0x10   :  { %1653 = vmatprep.subr.bf16.mxu1 %v1669_v5  ;;  %1513 = vmatprep.subr.bf16.mxu0 %v1669_v5  ;;  %v1710_v45 = vld [vmem:[%s2102_s0 + $0x68] sm:$0xff]   ;;  %v1711_v46 = vld [vmem:[%s2102_s0 + $0x70] sm:$0xff]   ;;  %v1713_v47 = vld [vmem:[%s2103_s5 + $0x38] sm:$0xff]  }
  0x11   :  { %v1714_v48 = vld [vmem:[%s2103_s5 + $0x30] sm:$0xff]   ;;  %v1712_v49 = vld [vmem:[%s2102_s0 + $0x78] sm:$0xff]   ;;  %v1715_v50 = vld [vmem:[%s2103_s5 + $0x28] sm:$0xff]  }
  0x12   :  { %v1716_v51 = vld [vmem:[%s2103_s5 + $0x20] sm:$0xff]   ;;  %v1717_v52 = vld [vmem:[%s2103_s5 + $0x18] sm:$0xff]   ;;  %v1718_v53 = vld [vmem:[%s2103_s5 + $0x10] sm:$0xff]  }
  0x13   :  { %1661 = vmatpush3.bf16.msra.mxu1 %v1669_v5  ;;  %1514 = vmatpush3.bf16.msra.mxu0 %v1669_v5  ;;  %v1719_v54 = vld [vmem:[%s2103_s5 + $0x8] sm:$0xff]   ;;  %v1720_v55 = vld [vmem:[%s2103_s5] sm:$0xff]  }
  0x14   :  { %1654 = vmatprep.subr.bf16.mxu1 %v1670_v6  ;;  %1515 = vmatprep.subr.bf16.mxu0 %v1670_v6 }
  0x17   :  { %1662 = vmatpush3.bf16.msra.mxu1 %v1670_v6  ;;  %1516 = vmatpush3.bf16.msra.mxu0 %v1670_v6 }
  0x18   :  { %1655 = vmatprep.subr.bf16.mxu1 %v1671_v7  ;;  %1517 = vmatprep.subr.bf16.mxu0 %v1671_v7 }
  0x1b   :  { %1663 = vmatpush3.bf16.msra.mxu1 %v1671_v7  ;;  %1518 = vmatpush3.bf16.msra.mxu0 %v1671_v7 }
  0x1c   :  { %1656 = vmatprep.subr.bf16.mxu1 %v1672_v9  ;;  %1519 = vmatprep.subr.bf16.mxu0 %v1672_v9 }
  0x1f   :  { %1664 = vmatpush3.bf16.msra.mxu1 %v1672_v9  ;;  %1520 = vmatpush3.bf16.msra.mxu0 %v1672_v9 }
  0x20   :  { %1553 = vmatprep.subr.bf16.mxu1 %v1675_v10  ;;  %1601 = vmatprep.subr.bf16.mxu0 %v1713_v47 }
  0x22   :  { %1538 = vmatmul.mubr.bf16.vlgmr.msra.gmra.mxu1 %v1674_v11  ;;  %1522 = vmatmul.mubr.bf16.vlgmr.msra.gmra.mxu0 %v1689_v13 }
  0x23   :  { %1554 = vmatpush3.bf16.msra.mxu1 %v1675_v10  ;;  %1541 = vmatprep.mubr.bf16.mxu1 %v1677_v14 }
  0x24   :  { %1555 = vmatprep.subr.bf16.mxu1 %v1676_v12  ;;  %1525 = vmatprep.mubr.bf16.mxu0 %v1693_v15 }
  0x25   :  { %1602 = vmatpush3.bf16.msra.mxu0 %v1713_v47 }
  0x26   :  { %1603 = vmatprep.subr.bf16.mxu0 %v1714_v48 }
  0x27   :  { %1556 = vmatpush3.bf16.msra.mxu1 %v1676_v12 }
  0x28   :  { %1557 = vmatprep.subr.bf16.mxu1 %v1679_v16 }
  0x29   :  { %1604 = vmatpush3.bf16.msra.mxu0 %v1714_v48 }
  0x2a   :  { %1542 = vmatmul.mubr.bf16.gmra.mxu1 %v1678_v17  ;;  %1526 = vmatmul.mubr.bf16.gmra.mxu0 %v1694_v19 }
  0x2b   :  { %1558 = vmatpush3.bf16.msra.mxu1 %v1679_v16  ;;  %1545 = vmatprep.mubr.bf16.mxu1 %v1681_v20 }
  0x2c   :  { %1559 = vmatprep.subr.bf16.mxu1 %v1680_v18  ;;  %1529 = vmatprep.mubr.bf16.mxu0 %v1697_v21 }
  0x2d   :  { %1605 = vmatprep.subr.bf16.mxu0 %v1715_v50 }
  0x2e   :  { %1606 = vmatpush3.bf16.msra.mxu0 %v1715_v50 }
  0x2f   :  { %1560 = vmatpush3.bf16.msra.mxu1 %v1680_v18  ;;  %1607 = vmatprep.subr.bf16.mxu0 %v1716_v51 }
  0x30   :  { %1561 = vmatprep.subr.bf16.mxu1 %v1683_v22 }
  0x32   :  { %1546 = vmatmul.mubr.bf16.gmra.mxu1 %v1682_v23  ;;  %1530 = vmatmul.mubr.bf16.gmra.mxu0 %v1698_v24 }
  0x33   :  { %1562 = vmatpush3.bf16.msra.mxu1 %v1683_v22  ;;  %1549 = vmatprep.mubr.bf16.mxu1 %v1685_v25  ;;  %v1964_v22 = vld [vmem:[%s2104_s4] ss:$0 sm:$0xff] }
  0x34   :  { %1563 = vmatprep.subr.bf16.mxu1 %v1684_v26  ;;  %1533 = vmatprep.mubr.bf16.mxu0 %v1701_v27 }
  0x35   :  { %1608 = vmatpush3.bf16.msra.mxu0 %v1716_v51 }
  0x36   :  { %1609 = vmatprep.subr.bf16.mxu0 %v1717_v52 }
  0x37   :  { %1564 = vmatpush3.bf16.msra.mxu1 %v1684_v26 }
  0x38   :  { %1565 = vmatprep.subr.bf16.mxu1 %v1687_v28 }
  0x39   :  { %1610 = vmatpush3.bf16.msra.mxu0 %v1717_v52 }
  0x3a   :  { %1550 = vmatmul.mubr.bf16.gmra.mxu1 %v1686_v29  ;;  %1534 = vmatmul.mubr.bf16.gmra.mxu0 %v1702_v30 }
  0x3b   :  { %1566 = vmatpush3.bf16.msra.mxu1 %v1687_v28  ;;  %1569 = vmatprep.mubr.bf16.mxu1 %v1691_v31 }
  0x3c   :  { %1567 = vmatprep.subr.bf16.mxu1 %v1690_v32  ;;  %1611 = vmatprep.subr.bf16.mxu0 %v1718_v53 }
  0x3d   :  { %1612 = vmatpush3.bf16.msra.mxu0 %v1718_v53 }
  0x3e   :  { %1613 = vmatprep.subr.bf16.mxu0 %v1719_v54 }
  0x3f   :  { %1568 = vmatpush3.bf16.msra.mxu1 %v1690_v32 }
  0x41   :  { %1614 = vmatpush3.bf16.msra.mxu0 %v1719_v54 }
  0x42   :  { %1570 = vmatmul.mubr.bf16.vlgmr.msra.gmra.mxu1 %v1692_v33  ;;  %1615 = vmatprep.subr.bf16.mxu0 %v1720_v55 }
  0x43   :  { %1573 = vmatprep.mubr.bf16.mxu1 %v1695_v34 }
  0x45   :  { %1616 = vmatpush3.bf16.msra.mxu0 %v1720_v55 }
  0x4a   :  { %1574 = vmatmul.mubr.bf16.gmra.mxu1 %v1696_v35 }
  0x4b   :  { %1577 = vmatprep.mubr.bf16.mxu1 %v1699_v36 }
  0x52   :  { %1578 = vmatmul.mubr.bf16.gmra.mxu1 %v1700_v37 }
  0x53   :  { %1581 = vmatprep.mubr.bf16.mxu1 %v1703_v38 }
  0x5a   :  { %1582 = vmatmul.mubr.bf16.gmra.mxu1 %v1704_v39 }
  0x5b   :  { %1585 = vmatprep.mubr.bf16.mxu1 %v1705_v40 }
  0x62   :  { %1586 = vmatmul.mubr.bf16.gmra.mxu1 %v1706_v41 }
  0x63   :  { %1589 = vmatprep.mubr.bf16.mxu1 %v1707_v42 }
  0x6a   :  { %1590 = vmatmul.mubr.bf16.gmra.mxu1 %v1708_v43 }
  0x6b   :  { %1593 = vmatprep.mubr.bf16.mxu1 %v1709_v44 }
  0x72   :  { %1594 = vmatmul.mubr.bf16.gmra.mxu1 %v1710_v45 }
  0x73   :  { %1597 = vmatprep.mubr.bf16.mxu1 %v1711_v46 }
  0x7a   :  { %1598 = vmatmul.mubr.bf16.gmra.mxu1 %v1712_v49 }
  0xe2   :  { %v1929_v56 = vpop.f32.mrf.mxu1  ;;  %v1523_v58 = vpop.f32.mrf.mxu0 }
  0xe4   :  { %v1931_v57 = vpop.f32.mrf.mxu1  ;;  %v301_v61 = vpop.f32.mrf.mxu0 }
  0xe6   :  { %v1933_v59 = vpop.f32.mrf.mxu1  ;;  %v1524_v0 = vpop.f32.mrf.mxu0 }
  0xe8   :  { %v1935_v60 = vpop.f32.mrf.mxu1  ;;  %v304_v3 = vpop.f32.mrf.mxu0 }
  0xea   :  { %v1937_v62 = vpop.f32.mrf.mxu1  ;;  %v1527_v6 = vpop.f32.mrf.mxu0 }
  0xec   :  { %v1939_v63 = vpop.f32.mrf.mxu1  ;;  %v317_v9 = vpop.f32.mrf.mxu0 }
  0xee   :  { %v1941_v1 = vpop.f32.mrf.mxu1  ;;  %v1528_v12 = vpop.f32.mrf.mxu0 }
  0xf0   :  { %v1943_v2 = vpop.f32.mrf.mxu1  ;;  %v320_v15 = vpop.f32.mrf.mxu0 }
  0xf2   :  { %v1945_v4 = vpop.f32.mrf.mxu1  ;;  %v1531_v18 = vpop.f32.mrf.mxu0 }
  0xf4   :  { %v1947_v5 = vpop.f32.mrf.mxu1  ;;  %v333_v25 = vpop.f32.mrf.mxu0 }
  0xf6   :  { %v1949_v7 = vpop.f32.mrf.mxu1  ;;  %v1532_v34 = vpop.f32.mrf.mxu0 }
  0xf8   :  { %v1951_v8 = vpop.f32.mrf.mxu1  ;;  %v336_v45 = vpop.f32.mrf.mxu0 }
  0xfa   :  { %v1953_v10 = vpop.f32.mrf.mxu1  ;;  %v1535_v54 = vpop.f32.mrf.mxu0 }
  0xfc   :  { %v1955_v11 = vpop.f32.mrf.mxu1 }
  0xfe   :  { %v1957_v13 = vpop.f32.mrf.mxu1 }
 0x100   :  { %v1959_v14 = vpop.f32.mrf.mxu1 }
 0x102   :  { %v1571_v16 = vpop.f32.mrf.mxu1 }
 0x103   :  { %v615_v20 = vadd.f32 %v1571_v16, %v1523_v58  ;;  %v349_v16 = vpop.f32.mrf.mxu0 }
 0x104   :  { %v606_v17 = vpop.f32.mrf.mxu1 }
 0x105   :  { %v607_v19 = vadd.f32 %v606_v17, %v301_v61  ;;  %v742_v29 = vadd.f32 %v1964_v22, %v615_v20 }
 0x106   :  { %v1572_v21 = vpop.f32.mrf.mxu1 }
 0x107   :  { %v618_v23 = vadd.f32 %v1572_v21, %v1524_v0  ;;  %v740_v26 = vadd.f32 %v1964_v22, %v607_v19  ;;  %v774_v38 = vmax.f32 %v742_v29, 0.0 }
 0x108   :  { %v609_v24 = vpop.f32.mrf.mxu1 }
 0x109   :  { %v743_v27 = vadd.f32 %v1964_v22, %v618_v23  ;;  %v610_v28 = vadd.f32 %v609_v24, %v304_v3  ;;  %v772_v35 = vmax.f32 %v740_v26, 0.0 }
 0x10a   :  { %v1575_v30 = vpop.f32.mrf.mxu1 }
 0x10b   :  { %v741_v31 = vadd.f32 %v1964_v22, %v610_v28  ;;  %v775_v32 = vmax.f32 %v743_v27, 0.0  ;;  %v631_v39 = vadd.f32 %v1575_v30, %v1527_v6 }
 0x10c   :  { %v622_v33 = vpop.f32.mrf.mxu1 }
 0x10d   :  { %v773_v36 = vmax.f32 %v741_v31, 0.0  ;;  %v623_v37 = vadd.f32 %v622_v33, %v317_v9  ;;  %v805_v43 = vpack.c.bf16 %v775_v32, %v774_v38  ;;  %v746_v49 = vadd.f32 %v1964_v22, %v631_v39 }
 0x10e   :  { %v1576_v40 = vpop.f32.mrf.mxu1 }
 0x10f   :  { %v634_v41 = vadd.f32 %v1576_v40, %v1528_v12  ;;  %v804_v42 = vpack.c.bf16 %v773_v36, %v772_v35  ;;  %v744_v46 = vadd.f32 %v1964_v22, %v623_v37  ;;  %v778_v0 = vmax.f32 %v746_v49, 0.0 }
 0x110   :  { %v625_v44 = vpop.f32.mrf.mxu1 }
 0x111   :  { %v747_v47 = vadd.f32 %v1964_v22, %v634_v41  ;;  %v626_v48 = vadd.f32 %v625_v44, %v320_v15  ;;  %1617 = vmatprep.mubr.bf16.mxu0 %v804_v42  ;;  %v776_v55 = vmax.f32 %v744_v46, 0.0 }
 0x112   :  { %v1579_v50 = vpop.f32.mrf.mxu1  ;;  %1618 = vmatmul.mubr.bf16.vlgmr.msra.gmra.mxu0 %v805_v43 }
 0x113   :  { %v745_v51 = vadd.f32 %v1964_v22, %v626_v48  ;;  %v779_v52 = vmax.f32 %v747_v47, 0.0  ;;  %v647_v3 = vadd.f32 %v1579_v50, %v1531_v18  ;;  %v1536_v18 = vpop.f32.mrf.mxu0 }
 0x114   :  { %v638_v53 = vpop.f32.mrf.mxu1 }
 0x115   :  { %v777_v58 = vmax.f32 %v745_v51, 0.0  ;;  %v639_v61 = vadd.f32 %v638_v53, %v333_v25  ;;  %v807_v17 = vpack.c.bf16 %v779_v52, %v778_v0  ;;  %v750_v23 = vadd.f32 %v1964_v22, %v647_v3  ;;  %v352_v36 = vpop.f32.mrf.mxu0 }
 0x116   :  { %v1580_v6 = vpop.f32.mrf.mxu1 }
 0x117   :  { %v650_v9 = vadd.f32 %v1580_v6, %v1532_v34  ;;  %v806_v12 = vpack.c.bf16 %v777_v58, %v776_v55  ;;  %v748_v19 = vadd.f32 %v1964_v22, %v639_v61  ;;  %v782_v31 = vmax.f32 %v750_v23, 0.0 }
 0x118   :  { %v641_v15 = vpop.f32.mrf.mxu1 }
 0x119   :  { %v751_v20 = vadd.f32 %v1964_v22, %v650_v9  ;;  %v642_v21 = vadd.f32 %v641_v15, %v336_v45  ;;  %1621 = vmatprep.mubr.bf16.mxu0 %v806_v12  ;;  %v780_v28 = vmax.f32 %v748_v19, 0.0 }
 0x11a   :  { %v1583_v24 = vpop.f32.mrf.mxu1  ;;  %1622 = vmatmul.mubr.bf16.gmra.mxu0 %v807_v17 }
 0x11b   :  { %v749_v25 = vadd.f32 %v1964_v22, %v642_v21  ;;  %v783_v26 = vmax.f32 %v751_v20, 0.0  ;;  %v663_v32 = vadd.f32 %v1583_v24, %v1535_v54 }
 0x11c   :  { %v654_v27 = vpop.f32.mrf.mxu1 }
 0x11d   :  { %v781_v29 = vmax.f32 %v749_v25, 0.0  ;;  %v655_v30 = vadd.f32 %v654_v27, %v349_v16  ;;  %v809_v38 = vpack.c.bf16 %v783_v26, %v782_v31  ;;  %v754_v42 = vadd.f32 %v1964_v22, %v663_v32 }
 0x11e   :  { %v1584_v33 = vpop.f32.mrf.mxu1 }
 0x11f   :  { %v666_v34 = vadd.f32 %v1584_v33, %v1536_v18  ;;  %v808_v35 = vpack.c.bf16 %v781_v29, %v780_v28  ;;  %v752_v39 = vadd.f32 %v1964_v22, %v655_v30  ;;  %v786_v51 = vmax.f32 %v754_v42, 0.0 }
 0x120   :  { %v657_v37 = vpop.f32.mrf.mxu1 }
 0x121   :  { %v755_v40 = vadd.f32 %v1964_v22, %v666_v34  ;;  %v658_v41 = vadd.f32 %v657_v37, %v352_v36  ;;  %1625 = vmatprep.mubr.bf16.mxu0 %v808_v35  ;;  %v784_v48 = vmax.f32 %v752_v39, 0.0 }
 0x122   :  { %v1587_v43 = vpop.f32.mrf.mxu1  ;;  %1626 = vmatmul.mubr.bf16.gmra.mxu0 %v809_v38 }
 0x123   :  { %v753_v44 = vadd.f32 %v1964_v22, %v658_v41  ;;  %v679_v45 = vadd.f32 %v1587_v43, %v1929_v56  ;;  %v787_v46 = vmax.f32 %v755_v40, 0.0 }
 0x124   :  { %v670_v47 = vpop.f32.mrf.mxu1 }
 0x125   :  { %v785_v49 = vmax.f32 %v753_v44, 0.0  ;;  %v671_v50 = vadd.f32 %v670_v47, %v1931_v57  ;;  %v758_v53 = vadd.f32 %v1964_v22, %v679_v45  ;;  %v811_v61 = vpack.c.bf16 %v787_v46, %v786_v51 }
 0x126   :  { %v1588_v52 = vpop.f32.mrf.mxu1 }
 0x127   :  { %v682_v54 = vadd.f32 %v1588_v52, %v1933_v59  ;;  %v810_v55 = vpack.c.bf16 %v785_v49, %v784_v48  ;;  %v756_v0 = vadd.f32 %v1964_v22, %v671_v50  ;;  %v790_v9 = vmax.f32 %v758_v53, 0.0 }
 0x128   :  { %v673_v58 = vpop.f32.mrf.mxu1 }
 0x129   :  { %v759_v3 = vadd.f32 %v1964_v22, %v682_v54  ;;  %v674_v56 = vadd.f32 %v673_v58, %v1935_v60  ;;  %1629 = vmatprep.mubr.bf16.mxu0 %v810_v55  ;;  %v788_v59 = vmax.f32 %v756_v0, 0.0 }
 0x12a   :  { %v1591_v6 = vpop.f32.mrf.mxu1  ;;  %1630 = vmatmul.mubr.bf16.gmra.mxu0 %v811_v61 }
 0x12b   :  { %v791_v57 = vmax.f32 %v759_v3, 0.0  ;;  %v757_v12 = vadd.f32 %v1964_v22, %v674_v56  ;;  %v695_v16 = vadd.f32 %v1591_v6, %v1937_v62  ;;  %v2017_v6 = vld [vmem:[%s2105_s6] ss:$0 sm:$0xff] }
 0x12c   :  { %v686_v15 = vpop.f32.mrf.mxu1 }
 0x12d   :  { %v789_v17 = vmax.f32 %v757_v12, 0.0  ;;  %v687_v19 = vadd.f32 %v686_v15, %v1939_v63  ;;  %v813_v20 = vpack.c.bf16 %v791_v57, %v790_v9  ;;  %v762_v23 = vadd.f32 %v1964_v22, %v695_v16 }
 0x12e   :  { %v1592_v21 = vpop.f32.mrf.mxu1 }
 0x12f   :  { %v698_v60 = vadd.f32 %v1592_v21, %v1941_v1  ;;  %v812_v24 = vpack.c.bf16 %v789_v17, %v788_v59  ;;  %v760_v26 = vadd.f32 %v1964_v22, %v687_v19  ;;  %v794_v28 = vmax.f32 %v762_v23, 0.0 }
 0x130   :  { %v689_v25 = vpop.f32.mrf.mxu1 }
 0x131   :  { %v763_v18 = vadd.f32 %v1964_v22, %v698_v60  ;;  %v690_v27 = vadd.f32 %v689_v25, %v1943_v2  ;;  %1633 = vmatprep.mubr.bf16.mxu0 %v812_v24  ;;  %v792_v32 = vmax.f32 %v760_v26, 0.0 }
 0x132   :  { %v1595_v62 = vpop.f32.mrf.mxu1  ;;  %1634 = vmatmul.mubr.bf16.gmra.mxu0 %v813_v20 }
 0x133   :  { %v795_v29 = vmax.f32 %v763_v18, 0.0  ;;  %v761_v63 = vadd.f32 %v1964_v22, %v690_v27  ;;  %v711_v30 = vadd.f32 %v1595_v62, %v1945_v4 }
 0x134   :  { %v702_v31 = vpop.f32.mrf.mxu1 }
 0x135   :  { %v793_v1 = vmax.f32 %v761_v63, 0.0  ;;  %v703_v33 = vadd.f32 %v702_v31, %v1947_v5  ;;  %v815_v34 = vpack.c.bf16 %v795_v29, %v794_v28  ;;  %v766_v36 = vadd.f32 %v1964_v22, %v711_v30 }
 0x136   :  { %v1596_v35 = vpop.f32.mrf.mxu1 }
 0x137   :  { %v714_v2 = vadd.f32 %v1596_v35, %v1949_v7  ;;  %v814_v37 = vpack.c.bf16 %v793_v1, %v792_v32  ;;  %v764_v39 = vadd.f32 %v1964_v22, %v703_v33  ;;  %v798_v42 = vmax.f32 %v766_v36, 0.0 }
 0x138   :  { %v705_v38 = vpop.f32.mrf.mxu1 }
 0x139   :  { %v767_v40 = vadd.f32 %v1964_v22, %v714_v2  ;;  %v706_v41 = vadd.f32 %v705_v38, %v1951_v8  ;;  %1637 = vmatprep.mubr.bf16.mxu0 %v814_v37  ;;  %v796_v46 = vmax.f32 %v764_v39, 0.0 }
 0x13a   :  { %v1599_v4 = vpop.f32.mrf.mxu1  ;;  %1638 = vmatmul.mubr.bf16.gmra.mxu0 %v815_v34 }
 0x13b   :  { %v799_v43 = vmax.f32 %v767_v40, 0.0  ;;  %v765_v5 = vadd.f32 %v1964_v22, %v706_v41  ;;  %v727_v44 = vadd.f32 %v1599_v4, %v1953_v10 }
 0x13c   :  { %v718_v45 = vpop.f32.mrf.mxu1 }
 0x13d   :  { %v797_v7 = vmax.f32 %v765_v5, 0.0  ;;  %v719_v47 = vadd.f32 %v718_v45, %v1955_v11  ;;  %v817_v48 = vpack.c.bf16 %v799_v43, %v798_v42  ;;  %v770_v50 = vadd.f32 %v1964_v22, %v727_v44 }
 0x13e   :  { %v1600_v49 = vpop.f32.mrf.mxu1 }
 0x13f   :  { %v730_v8 = vadd.f32 %v1600_v49, %v1957_v13  ;;  %v816_v51 = vpack.c.bf16 %v797_v7, %v796_v46  ;;  %v768_v53 = vadd.f32 %v1964_v22, %v719_v47  ;;  %v802_v10 = vmax.f32 %v770_v50, 0.0 }
 0x140   :  { %v721_v52 = vpop.f32.mrf.mxu1 }
 0x141   :  { %v771_v54 = vadd.f32 %v1964_v22, %v730_v8  ;;  %v722_v55 = vadd.f32 %v721_v52, %v1959_v14  ;;  %1641 = vmatprep.mubr.bf16.mxu0 %v816_v51  ;;  %v800_v61 = vmax.f32 %v768_v53, 0.0 }
 0x142   :  { %1642 = vmatmul.mubr.bf16.gmra.mxu0 %v817_v48 }
 0x143   :  { %v803_v58 = vmax.f32 %v771_v54, 0.0  ;;  %v769_v11 = vadd.f32 %v1964_v22, %v722_v55 }
 0x145   :  { %v801_v0 = vmax.f32 %v769_v11, 0.0  ;;  %v819_v3 = vpack.c.bf16 %v803_v58, %v802_v10 }
 0x147   :  { %v818_v56 = vpack.c.bf16 %v801_v0, %v800_v61 }
 0x149   :  { %1645 = vmatprep.mubr.bf16.mxu0 %v818_v56 }
 0x14a   :  { %1646 = vmatmul.mubr.bf16.gmra.mxu0 %v819_v3 }
 0x1d2   :  { %v1619_v13 = vpop.f32.mrf.mxu0 }
 0x1d3   :  { %v934_v57 = vadd.f32 %v1619_v13, %v2017_v6 }
 0x1d4   :  { %v925_v9 = vpop.f32.mrf.mxu0 }
 0x1d5   :  { %v926_v22 = vadd.f32 %v2017_v6, %v925_v9 }
 0x1d6   :  { %v1620_v14 = vpop.f32.mrf.mxu0 }
 0x1d7   :  { %v937_v12 = vadd.f32 %v1620_v14, %v2017_v6 }
 0x1d8   :  { %v928_v16 = vpop.f32.mrf.mxu0 }
 0x1d9   :  { %v1346_v15 = vpack.c.bf16 %v937_v12, %v934_v57  ;;  %v929_v59 = vadd.f32 %v2017_v6, %v928_v16 }
 0x1da   :  { %v1623_v17 = vpop.f32.mrf.mxu0 }
 0x1db   :  { %1418 = vst [vmem:[%s2106_s7 + $0x8] sm:$0xff] %v1346_v15   ;;  %v1341_v19 = vpack.c.bf16 %v929_v59, %v926_v22  ;;  %v950_v23 = vadd.f32 %v1623_v17, %v2017_v6 }
 0x1dc   :  { %v941_v20 = vpop.f32.mrf.mxu0 }
 0x1dd   :  { %1342 = vst [vmem:[%s2106_s7] sm:$0xff] %v1341_v19   ;;  %v942_v25 = vadd.f32 %v2017_v6, %v941_v20 }
 0x1de   :  { %v1624_v21 = vpop.f32.mrf.mxu0 }
 0x1df   :  { %v953_v60 = vadd.f32 %v1624_v21, %v2017_v6 }
 0x1e0   :  { %v944_v24 = vpop.f32.mrf.mxu0 }
 0x1e1   :  { %v1356_v26 = vpack.c.bf16 %v953_v60, %v950_v23  ;;  %v945_v18 = vadd.f32 %v2017_v6, %v944_v24 }
 0x1e2   :  { %v1627_v27 = vpop.f32.mrf.mxu0 }
 0x1e3   :  { %1420 = vst [vmem:[%s2106_s7 + $0x18] sm:$0xff] %v1356_v26   ;;  %v1351_v62 = vpack.c.bf16 %v945_v18, %v942_v25  ;;  %v966_v63 = vadd.f32 %v1627_v27, %v2017_v6 }
 0x1e4   :  { %v957_v28 = vpop.f32.mrf.mxu0 }
 0x1e5   :  { %1419 = vst [vmem:[%s2106_s7 + $0x10] sm:$0xff] %v1351_v62   ;;  %v958_v32 = vadd.f32 %v2017_v6, %v957_v28 }
 0x1e6   :  { %v1628_v29 = vpop.f32.mrf.mxu0 }
 0x1e7   :  { %v969_v30 = vadd.f32 %v1628_v29, %v2017_v6 }
 0x1e8   :  { %v960_v31 = vpop.f32.mrf.mxu0 }
 0x1e9   :  { %v1366_v1 = vpack.c.bf16 %v969_v30, %v966_v63  ;;  %v961_v33 = vadd.f32 %v2017_v6, %v960_v31 }
 0x1ea   :  { %v1631_v34 = vpop.f32.mrf.mxu0 }
 0x1eb   :  { %1422 = vst [vmem:[%s2106_s7 + $0x28] sm:$0xff] %v1366_v1   ;;  %v1361_v35 = vpack.c.bf16 %v961_v33, %v958_v32  ;;  %v982_v37 = vadd.f32 %v1631_v34, %v2017_v6 }
 0x1ec   :  { %v973_v36 = vpop.f32.mrf.mxu0 }
 0x1ed   :  { %1421 = vst [vmem:[%s2106_s7 + $0x20] sm:$0xff] %v1361_v35   ;;  %v974_v40 = vadd.f32 %v2017_v6, %v973_v36 }
 0x1ee   :  { %v1632_v2 = vpop.f32.mrf.mxu0 }
 0x1ef   :  { %v985_v38 = vadd.f32 %v1632_v2, %v2017_v6 }
 0x1f0   :  { %v976_v39 = vpop.f32.mrf.mxu0 }
 0x1f1   :  { %v1376_v41 = vpack.c.bf16 %v985_v38, %v982_v37  ;;  %v977_v4 = vadd.f32 %v2017_v6, %v976_v39 }
 0x1f2   :  { %v1635_v42 = vpop.f32.mrf.mxu0 }
 0x1f3   :  { %1424 = vst [vmem:[%s2106_s7 + $0x38] sm:$0xff] %v1376_v41   ;;  %v1371_v43 = vpack.c.bf16 %v977_v4, %v974_v40  ;;  %v998_v45 = vadd.f32 %v1635_v42, %v2017_v6 }
 0x1f4   :  { %v989_v5 = vpop.f32.mrf.mxu0 }
 0x1f5   :  { %1423 = vst [vmem:[%s2106_s7 + $0x30] sm:$0xff] %v1371_v43   ;;  %v990_v47 = vadd.f32 %v2017_v6, %v989_v5 }
 0x1f6   :  { %v1636_v44 = vpop.f32.mrf.mxu0 }
 0x1f7   :  { %v1001_v46 = vadd.f32 %v1636_v44, %v2017_v6 }
 0x1f8   :  { %v992_v7 = vpop.f32.mrf.mxu0 }
 0x1f9   :  { %v1386_v48 = vpack.c.bf16 %v1001_v46, %v998_v45  ;;  %v993_v49 = vadd.f32 %v2017_v6, %v992_v7 }
 0x1fa   :  { %v1639_v50 = vpop.f32.mrf.mxu0 }
 0x1fb   :  { %1426 = vst [vmem:[%s2106_s7 + $0x48] sm:$0xff] %v1386_v48   ;;  %v1381_v8 = vpack.c.bf16 %v993_v49, %v990_v47  ;;  %v1014_v53 = vadd.f32 %v1639_v50, %v2017_v6 }
 0x1fc   :  { %v1005_v51 = vpop.f32.mrf.mxu0 }
 0x1fd   :  { %1425 = vst [vmem:[%s2106_s7 + $0x40] sm:$0xff] %v1381_v8   ;;  %v1006_v10 = vadd.f32 %v2017_v6, %v1005_v51 }
 0x1fe   :  { %v1640_v52 = vpop.f32.mrf.mxu0 }
 0x1ff   :  { %v1017_v54 = vadd.f32 %v1640_v52, %v2017_v6 }
 0x200   :  { %v1008_v55 = vpop.f32.mrf.mxu0 }
 0x201   :  { %v1396_v58 = vpack.c.bf16 %v1017_v54, %v1014_v53  ;;  %v1009_v11 = vadd.f32 %v2017_v6, %v1008_v55 }
 0x202   :  { %v1643_v61 = vpop.f32.mrf.mxu0 }
 0x203   :  { %1428 = vst [vmem:[%s2106_s7 + $0x58] sm:$0xff] %v1396_v58   ;;  %v1391_v0 = vpack.c.bf16 %v1009_v11, %v1006_v10  ;;  %v1030_v13 = vadd.f32 %v1643_v61, %v2017_v6 }
 0x204   :  { %v1021_v3 = vpop.f32.mrf.mxu0 }
 0x205   :  { %1427 = vst [vmem:[%s2106_s7 + $0x50] sm:$0xff] %v1391_v0   ;;  %v1022_v57 = vadd.f32 %v2017_v6, %v1021_v3 }
 0x206   :  { %v1644_v56 = vpop.f32.mrf.mxu0 }
 0x207   :  { %v1033_v9 = vadd.f32 %v1644_v56, %v2017_v6 }
 0x208   :  { %v1024_v14 = vpop.f32.mrf.mxu0 }
 0x209   :  { %v1406_v12 = vpack.c.bf16 %v1033_v9, %v1030_v13  ;;  %v1025_v16 = vadd.f32 %v2017_v6, %v1024_v14 }
 0x20a   :  { %v1647_v22 = vpop.f32.mrf.mxu0 }
 0x20b   :  { %1430 = vst [vmem:[%s2106_s7 + $0x68] sm:$0xff] %v1406_v12   ;;  %v1401_v15 = vpack.c.bf16 %v1025_v16, %v1022_v57  ;;  %v1046_v19 = vadd.f32 %v1647_v22, %v2017_v6 }
 0x20c   :  { %v1037_v59 = vpop.f32.mrf.mxu0 }
 0x20d   :  { %1429 = vst [vmem:[%s2106_s7 + $0x60] sm:$0xff] %v1401_v15   ;;  %v1038_v23 = vadd.f32 %v2017_v6, %v1037_v59 }
 0x20e   :  { %v1648_v17 = vpop.f32.mrf.mxu0 }
 0x20f   :  { %v1049_v20 = vadd.f32 %v1648_v17, %v2017_v6 }
 0x210   :  { %v1040_v21 = vpop.f32.mrf.mxu0 }
 0x211   :  { %v1416_v60 = vpack.c.bf16 %v1049_v20, %v1046_v19  ;;  %v1041_v24 = vadd.f32 %v2017_v6, %v1040_v21 }
 0x213   :  { %1432 = vst [vmem:[%s2106_s7 + $0x78] sm:$0xff] %v1416_v60   ;;  %v1411_v25 = vpack.c.bf16 %v1041_v24, %v1038_v23 }
 0x215   :  { %1431 = vst [vmem:[%s2106_s7 + $0x70] sm:$0xff] %v1411_v25  }

// kernel: edge_classifier_gnn.3
= control target key start
LH: loop header
LB: loop body
LE: loop exit
PB: predicated region body
PF: predicated region fallthrough
CT: control target
= control target key end

     0   :  { %v4967_v0 = vmov 0   ;;  %s6227_s1 = inlined_call_operand.vmem [shape: bf16[512,128], index: 1, kind: input, shape index: {}, may-alias: {1,2}]   ;;  %s6228_s0 = inlined_call_operand.vmem [shape: bf16[512,512], index: 0, kind: input, shape index: {}]   ;;  %s6229_s4 = inlined_call_operand.vmem [shape: bf16[128,128], index: 4, kind: input, shape index: {}]   ;;  %s6230_s3 = inlined_call_operand.vmem [shape: bf16[128,128], index: 3, kind: input, shape index: {}]   ;;  %s6231_s2 = inlined_call_operand.vmem [shape: bf16[512,128], index: 2, kind: input, shape index: {}, may-alias: {1,2}]   ;;  %s6232_s5 = inlined_call_operand.vmem [shape: f32[1,128], index: 5, kind: input, shape index: {}]   ;;  %s6233_s6 = inlined_call_operand.vmem [shape: bf16[512,128], index: 6, kind: output, shape index: {}]  }
   0x1   :  { %1185 = vmatprep.subr.bf16.mxu0 %v4967_v0  ;;  %1474 = vmatprep.subr.bf16.mxu1 %v4967_v0  ;;  %v4566_v1 = vld [vmem:[%s6227_s1 + $0x38] sm:$0xff]   ;;  %v4568_v3 = vld [vmem:[%s6227_s1 + $0x30] sm:$0xff]   ;;  %v4570_v5 = vld [vmem:[%s6227_s1 + $0x28] sm:$0xff]  }
   0x2   :  { %v4567_v2 = vld [vmem:[%s6227_s1 + $0xb8] sm:$0xff]   ;;  %1186 = vmatpush1.bf16.msra.mxu0 %v4566_v1  ;;  %v4569_v4 = vld [vmem:[%s6227_s1 + $0xb0] sm:$0xff]   ;;  %v4571_v6 = vld [vmem:[%s6227_s1 + $0xa8] sm:$0xff]  }
   0x3   :  { %1475 = vmatpush1.bf16.msra.mxu1 %v4567_v2  ;;  %1187 = vmatprep.subr.bf16.mxu0 %v4967_v0  ;;  %v4572_v7 = vld [vmem:[%s6227_s1 + $0x20] sm:$0xff]   ;;  %v4574_v9 = vld [vmem:[%s6227_s1 + $0x18] sm:$0xff]   ;;  %v4576_v11 = vld [vmem:[%s6227_s1 + $0x10] sm:$0xff]  }
   0x4   :  { %1476 = vmatprep.subr.bf16.mxu1 %v4967_v0  ;;  %v4573_v8 = vld [vmem:[%s6227_s1 + $0xa0] sm:$0xff]   ;;  %v4575_v10 = vld [vmem:[%s6227_s1 + $0x98] sm:$0xff]   ;;  %v4577_v12 = vld [vmem:[%s6227_s1 + $0x90] sm:$0xff]  }
   0x5   :  { %v4578_v13 = vld [vmem:[%s6227_s1 + $0x8] sm:$0xff]   ;;  %v4580_v15 = vld [vmem:[%s6227_s1] sm:$0xff]   ;;  %v4582_v17 = vld [vmem:[%s6227_s1 + $0x78] sm:$0xff]  }
   0x6   :  { %1188 = vmatpush1.bf16.msra.mxu0 %v4568_v3  ;;  %v4579_v14 = vld [vmem:[%s6227_s1 + $0x88] sm:$0xff]   ;;  %v4581_v16 = vld [vmem:[%s6227_s1 + $0x80] sm:$0xff]   ;;  %v4583_v18 = vld [vmem:[%s6227_s1 + $0xf8] sm:$0xff]  }
   0x7   :  { %1477 = vmatpush1.bf16.msra.mxu1 %v4569_v4  ;;  %1189 = vmatprep.subr.bf16.mxu0 %v4967_v0  ;;  %v4600_v19 = vld [vmem:[%s6228_s0 + $0x4] ss:$16 sps:$4 sm:$0xff]   ;;  %v4603_v21 = vld [vmem:[%s6228_s0 + $0xc] ss:$16 sps:$4 sm:$0xff]   ;;  %v4598_v37 = vld [vmem:[%s6228_s0] ss:$16 sps:$4 sm:$0xff]  }
   0x8   :  { %1478 = vmatprep.subr.bf16.mxu1 %v4967_v0  ;;  %v4584_v20 = vld [vmem:[%s6227_s1 + $0x70] sm:$0xff]   ;;  %1217 = vmatprep.mubr.bf16.mxu0 %v4600_v19  ;;  %v4586_v23 = vld [vmem:[%s6227_s1 + $0x68] sm:$0xff]   ;;  %v4588_v25 = vld [vmem:[%s6227_s1 + $0x60] sm:$0xff]  }
   0x9   :  { %v4585_v22 = vld [vmem:[%s6227_s1 + $0xf0] sm:$0xff]   ;;  %1506 = vmatprep.mubr.bf16.mxu1 %v4603_v21  ;;  %v4587_v24 = vld [vmem:[%s6227_s1 + $0xe8] sm:$0xff]   ;;  %v4589_v26 = vld [vmem:[%s6227_s1 + $0xe0] sm:$0xff]  }
   0xa   :  { %1190 = vmatpush1.bf16.msra.mxu0 %v4570_v5  ;;  %v4590_v27 = vld [vmem:[%s6227_s1 + $0x58] sm:$0xff]   ;;  %v4592_v29 = vld [vmem:[%s6227_s1 + $0x50] sm:$0xff]   ;;  %v4594_v31 = vld [vmem:[%s6227_s1 + $0x48] sm:$0xff]  }
   0xb   :  { %1479 = vmatpush1.bf16.msra.mxu1 %v4571_v6  ;;  %1191 = vmatprep.subr.bf16.mxu0 %v4967_v0  ;;  %v4591_v28 = vld [vmem:[%s6227_s1 + $0xd8] sm:$0xff]   ;;  %v4593_v30 = vld [vmem:[%s6227_s1 + $0xd0] sm:$0xff]   ;;  %v4595_v32 = vld [vmem:[%s6227_s1 + $0xc8] sm:$0xff]  }
   0xc   :  { %1480 = vmatprep.subr.bf16.mxu1 %v4967_v0  ;;  %v4596_v33 = vld [vmem:[%s6227_s1 + $0x40] sm:$0xff]   ;;  %v4658_v35 = vld [vmem:[%s6229_s4 + $0x38] sm:$0xff]   ;;  %v4684_v45 = vld [vmem:[%s6229_s4 + $0x30] sm:$0xff]  }
   0xd   :  { %v4597_v34 = vld [vmem:[%s6227_s1 + $0xc0] sm:$0xff]   ;;  %v4659_v36 = vld [vmem:[%s6230_s3 + $0x38] sm:$0xff]   ;;  %v4685_v46 = vld [vmem:[%s6230_s3 + $0x30] sm:$0xff]  }
   0xe   :  { %1192 = vmatpush1.bf16.msra.mxu0 %v4572_v7  ;;  %v4601_v38 = vld [vmem:[%s6228_s0 + $0x8] ss:$16 sps:$4 sm:$0xff]   ;;  %v4604_v39 = vld [vmem:[%s6228_s0 + $0x24] ss:$16 sps:$4 sm:$0xff]   ;;  %v4606_v40 = vld [vmem:[%s6228_s0 + $0x2c] ss:$16 sps:$4 sm:$0xff]  }
   0xf   :  { %1481 = vmatpush1.bf16.msra.mxu1 %v4573_v8  ;;  %1193 = vmatprep.subr.bf16.mxu0 %v4967_v0  ;;  %v4608_v41 = vld [vmem:[%s6228_s0 + $0x20] ss:$16 sps:$4 sm:$0xff]   ;;  %v4609_v42 = vld [vmem:[%s6228_s0 + $0x28] ss:$16 sps:$4 sm:$0xff]   ;;  %v4610_v43 = vld [vmem:[%s6228_s0 + $0x44] ss:$16 sps:$4 sm:$0xff]  }
  0x10   :  { %1482 = vmatprep.subr.bf16.mxu1 %v4967_v0  ;;  %v4612_v44 = vld [vmem:[%s6228_s0 + $0x4c] ss:$16 sps:$4 sm:$0xff]   ;;  %v4614_v47 = vld [vmem:[%s6228_s0 + $0x40] ss:$16 sps:$4 sm:$0xff]   ;;  %v4615_v48 = vld [vmem:[%s6228_s0 + $0x48] ss:$16 sps:$4 sm:$0xff]  }
  0x11   :  { %v4616_v49 = vld [vmem:[%s6228_s0 + $0x64] ss:$16 sps:$4 sm:$0xff]   ;;  %v4618_v50 = vld [vmem:[%s6228_s0 + $0x6c] ss:$16 sps:$4 sm:$0xff]   ;;  %v4620_v51 = vld [vmem:[%s6228_s0 + $0x60] ss:$16 sps:$4 sm:$0xff]  }
  0x12   :  { %1194 = vmatpush1.bf16.msra.mxu0 %v4574_v9  ;;  %v4621_v52 = vld [vmem:[%s6228_s0 + $0x68] ss:$16 sps:$4 sm:$0xff]   ;;  %v4622_v55 = vld [vmem:[%s6228_s0 + $0x84] ss:$16 sps:$4 sm:$0xff]   ;;  %v4624_v56 = vld [vmem:[%s6228_s0 + $0x8c] ss:$16 sps:$4 sm:$0xff]  }
  0x13   :  { %1483 = vmatpush1.bf16.msra.mxu1 %v4575_v10  ;;  %1195 = vmatprep.subr.bf16.mxu0 %v4967_v0  ;;  %v4710_v53 = vld [vmem:[%s6229_s4 + $0x28] sm:$0xff]   ;;  %v4626_v57 = vld [vmem:[%s6228_s0 + $0x80] ss:$16 sps:$4 sm:$0xff]   ;;  %v4628_v59 = vld [vmem:[%s6228_s0 + $0xa4] ss:$16 sps:$4 sm:$0xff]  }
  0x14   :  { %1484 = vmatprep.subr.bf16.mxu1 %v4967_v0  ;;  %v4711_v54 = vld [vmem:[%s6230_s3 + $0x28] sm:$0xff]   ;;  %v4632_v61 = vld [vmem:[%s6228_s0 + $0xa0] ss:$16 sps:$4 sm:$0xff]   ;;  %v4634_v63 = vld [vmem:[%s6228_s0 + $0xc4] ss:$16 sps:$4 sm:$0xff]  }
  0x15   :  { %v4627_v58 = vld [vmem:[%s6228_s0 + $0x88] ss:$16 sps:$4 sm:$0xff]   ;;  %v4630_v60 = vld [vmem:[%s6228_s0 + $0xac] ss:$16 sps:$4 sm:$0xff]   ;;  %v4736_v1 = vld [vmem:[%s6229_s4 + $0x20] sm:$0xff]  }
  0x16   :  { %1196 = vmatpush1.bf16.msra.mxu0 %v4576_v11  ;;  %v4633_v62 = vld [vmem:[%s6228_s0 + $0xa8] ss:$16 sps:$4 sm:$0xff]   ;;  %v4737_v2 = vld [vmem:[%s6230_s3 + $0x20] sm:$0xff]   ;;  %v4642_v6 = vld [vmem:[%s6228_s0 + $0xec] ss:$16 sps:$4 sm:$0xff]  }
  0x17   :  { %1485 = vmatpush1.bf16.msra.mxu1 %v4577_v12  ;;  %1197 = vmatprep.subr.bf16.mxu0 %v4967_v0  ;;  %v4638_v3 = vld [vmem:[%s6228_s0 + $0xc0] ss:$16 sps:$4 sm:$0xff]   ;;  %v4639_v4 = vld [vmem:[%s6228_s0 + $0xc8] ss:$16 sps:$4 sm:$0xff]   ;;  %v4640_v5 = vld [vmem:[%s6228_s0 + $0xe4] ss:$16 sps:$4 sm:$0xff]  }
  0x18   :  { %1486 = vmatprep.subr.bf16.mxu1 %v4967_v0  ;;  %v4644_v7 = vld [vmem:[%s6228_s0 + $0xe0] ss:$16 sps:$4 sm:$0xff]   ;;  %v4645_v8 = vld [vmem:[%s6228_s0 + $0xe8] ss:$16 sps:$4 sm:$0xff]   ;;  %v4646_v9 = vld [vmem:[%s6228_s0 + $0x104] ss:$16 sps:$4 sm:$0xff]  }
  0x19   :  { %v4648_v10 = vld [vmem:[%s6228_s0 + $0x10c] ss:$16 sps:$4 sm:$0xff]   ;;  %v4650_v11 = vld [vmem:[%s6228_s0 + $0x100] ss:$16 sps:$4 sm:$0xff]   ;;  %v4651_v12 = vld [vmem:[%s6228_s0 + $0x108] ss:$16 sps:$4 sm:$0xff]  }
  0x1a   :  { %1198 = vmatpush1.bf16.msra.mxu0 %v4578_v13  ;;  %v4652_v13 = vld [vmem:[%s6228_s0 + $0x124] ss:$16 sps:$4 sm:$0xff]   ;;  %v4762_v19 = vld [vmem:[%s6229_s4 + $0x18] sm:$0xff]   ;;  %v4664_v21 = vld [vmem:[%s6228_s0 + $0x140] ss:$16 sps:$4 sm:$0xff]  }
  0x1b   :  { %1487 = vmatpush1.bf16.msra.mxu1 %v4579_v14  ;;  %1199 = vmatprep.subr.bf16.mxu0 %v4967_v0  ;;  %v4654_v14 = vld [vmem:[%s6228_s0 + $0x12c] ss:$16 sps:$4 sm:$0xff]  }
  0x1c   :  { %1488 = vmatprep.subr.bf16.mxu1 %v4967_v0 }
  0x1e   :  { %1200 = vmatpush1.bf16.msra.mxu0 %v4580_v15  ;;  %v4656_v15 = vld [vmem:[%s6228_s0 + $0x120] ss:$16 sps:$4 sm:$0xff]  }
  0x1f   :  { %1489 = vmatpush1.bf16.msra.mxu1 %v4581_v16  ;;  %1201 = vmatprep.subr.bf16.mxu0 %v4967_v0  ;;  %v4657_v16 = vld [vmem:[%s6228_s0 + $0x128] ss:$16 sps:$4 sm:$0xff]  }
  0x20   :  { %1490 = vmatprep.subr.bf16.mxu1 %v4967_v0 }
  0x22   :  { %1202 = vmatpush2.bf16.msra.mxu0 %v4582_v17  ;;  %v4660_v17 = vld [vmem:[%s6228_s0 + $0x144] ss:$16 sps:$4 sm:$0xff]  }
  0x23   :  { %1491 = vmatpush2.bf16.msra.mxu1 %v4583_v18  ;;  %1203 = vmatprep.subr.bf16.mxu0 %v4967_v0  ;;  %v4662_v18 = vld [vmem:[%s6228_s0 + $0x14c] ss:$16 sps:$4 sm:$0xff]  }
  0x24   :  { %1492 = vmatprep.subr.bf16.mxu1 %v4967_v0 }
  0x26   :  { %1204 = vmatpush2.bf16.msra.mxu0 %v4584_v20  ;;  %v4763_v20 = vld [vmem:[%s6230_s3 + $0x18] sm:$0xff]  }
  0x27   :  { %1493 = vmatpush2.bf16.msra.mxu1 %v4585_v22  ;;  %1205 = vmatprep.subr.bf16.mxu0 %v4967_v0  ;;  %v4665_v22 = vld [vmem:[%s6228_s0 + $0x148] ss:$16 sps:$4 sm:$0xff]  }
  0x28   :  { %1494 = vmatprep.subr.bf16.mxu1 %v4967_v0 }
  0x2a   :  { %1206 = vmatpush2.bf16.msra.mxu0 %v4586_v23  ;;  %v4666_v23 = vld [vmem:[%s6228_s0 + $0x164] ss:$16 sps:$4 sm:$0xff]  }
  0x2b   :  { %1495 = vmatpush2.bf16.msra.mxu1 %v4587_v24  ;;  %1207 = vmatprep.subr.bf16.mxu0 %v4967_v0  ;;  %v4668_v24 = vld [vmem:[%s6228_s0 + $0x16c] ss:$16 sps:$4 sm:$0xff]  }
  0x2c   :  { %1496 = vmatprep.subr.bf16.mxu1 %v4967_v0 }
  0x2e   :  { %1208 = vmatpush2.bf16.msra.mxu0 %v4588_v25  ;;  %v4670_v25 = vld [vmem:[%s6228_s0 + $0x160] ss:$16 sps:$4 sm:$0xff]  }
  0x2f   :  { %1497 = vmatpush2.bf16.msra.mxu1 %v4589_v26  ;;  %1209 = vmatprep.subr.bf16.mxu0 %v4967_v0  ;;  %v4671_v26 = vld [vmem:[%s6228_s0 + $0x168] ss:$16 sps:$4 sm:$0xff]  }
  0x30   :  { %1498 = vmatprep.subr.bf16.mxu1 %v4967_v0 }
  0x32   :  { %1210 = vmatpush2.bf16.msra.mxu0 %v4590_v27  ;;  %v4672_v27 = vld [vmem:[%s6228_s0 + $0x184] ss:$16 sps:$4 sm:$0xff]  }
  0x33   :  { %1499 = vmatpush2.bf16.msra.mxu1 %v4591_v28  ;;  %1211 = vmatprep.subr.bf16.mxu0 %v4967_v0  ;;  %v4674_v28 = vld [vmem:[%s6228_s0 + $0x18c] ss:$16 sps:$4 sm:$0xff]  }
  0x34   :  { %1500 = vmatprep.subr.bf16.mxu1 %v4967_v0 }
  0x36   :  { %1212 = vmatpush2.bf16.msra.mxu0 %v4592_v29  ;;  %v4676_v29 = vld [vmem:[%s6228_s0 + $0x180] ss:$16 sps:$4 sm:$0xff]  }
  0x37   :  { %1501 = vmatpush2.bf16.msra.mxu1 %v4593_v30  ;;  %1213 = vmatprep.subr.bf16.mxu0 %v4967_v0  ;;  %v4677_v30 = vld [vmem:[%s6228_s0 + $0x188] ss:$16 sps:$4 sm:$0xff]  }
  0x38   :  { %1502 = vmatprep.subr.bf16.mxu1 %v4967_v0 }
  0x3a   :  { %1214 = vmatpush2.bf16.msra.mxu0 %v4594_v31  ;;  %v4678_v31 = vld [vmem:[%s6228_s0 + $0x1a4] ss:$16 sps:$4 sm:$0xff]  }
  0x3b   :  { %1503 = vmatpush2.bf16.msra.mxu1 %v4595_v32  ;;  %1215 = vmatprep.subr.bf16.mxu0 %v4967_v0  ;;  %v4680_v32 = vld [vmem:[%s6228_s0 + $0x1ac] ss:$16 sps:$4 sm:$0xff]  }
  0x3c   :  { %1504 = vmatprep.subr.bf16.mxu1 %v4967_v0  ;;  %v4636_v0 = vld [vmem:[%s6228_s0 + $0xcc] ss:$16 sps:$4 sm:$0xff]  }
  0x3e   :  { %1216 = vmatpush2.bf16.msra.mxu0 %v4596_v33  ;;  %v4682_v33 = vld [vmem:[%s6228_s0 + $0x1a0] ss:$16 sps:$4 sm:$0xff]  }
  0x3f   :  { %1505 = vmatpush2.bf16.msra.mxu1 %v4597_v34  ;;  %4405 = vmatprep.subr.bf16.mxu0 %v4658_v35  ;;  %v4683_v34 = vld [vmem:[%s6228_s0 + $0x1a8] ss:$16 sps:$4 sm:$0xff]  }
  0x40   :  { %4485 = vmatprep.subr.bf16.mxu1 %v4659_v36 }
  0x41   :  { %1218 = vmatmul.mubr.bf16.vlgmr.msra.gmra.mxu0 %v4598_v37  ;;  %v4788_v37 = vld [vmem:[%s6229_s4 + $0x10] sm:$0xff]  }
  0x42   :  { %1507 = vmatmul.mubr.bf16.vlgmr.msra.gmra.mxu1 %v4601_v38  ;;  %1225 = vmatprep.mubr.bf16.mxu0 %v4604_v39  ;;  %v4789_v38 = vld [vmem:[%s6230_s3 + $0x10] sm:$0xff]  }
  0x43   :  { %1514 = vmatprep.mubr.bf16.mxu1 %v4606_v40  ;;  %4406 = vmatpush3.bf16.msra.mxu0 %v4658_v35  ;;  %v4686_v35 = vld [vmem:[%s6228_s0 + $0x1c4] ss:$16 sps:$4 sm:$0xff]   ;;  %v4690_v39 = vld [vmem:[%s6228_s0 + $0x1c0] ss:$16 sps:$4 sm:$0xff]   ;;  %v4691_v40 = vld [vmem:[%s6228_s0 + $0x1c8] ss:$16 sps:$4 sm:$0xff]  }
  0x44   :  { %4486 = vmatpush3.bf16.msra.mxu1 %v4659_v36  ;;  %4407 = vmatprep.subr.bf16.mxu0 %v4684_v45  ;;  %v4688_v36 = vld [vmem:[%s6228_s0 + $0x1cc] ss:$16 sps:$4 sm:$0xff]  }
  0x45   :  { %4487 = vmatprep.subr.bf16.mxu1 %v4685_v46 }
  0x47   :  { %4408 = vmatpush3.bf16.msra.mxu0 %v4684_v45  ;;  %v4698_v45 = vld [vmem:[%s6228_s0 + $0x204] ss:$16 sps:$4 sm:$0xff]  }
  0x48   :  { %4488 = vmatpush3.bf16.msra.mxu1 %v4685_v46  ;;  %4409 = vmatprep.subr.bf16.mxu0 %v4710_v53  ;;  %v4700_v46 = vld [vmem:[%s6228_s0 + $0x20c] ss:$16 sps:$4 sm:$0xff]  }
  0x49   :  { %1226 = vmatmul.mubr.bf16.gmra.mxu0 %v4608_v41  ;;  %4489 = vmatprep.subr.bf16.mxu1 %v4711_v54  ;;  %v4692_v41 = vld [vmem:[%s6228_s0 + $0x1e4] ss:$16 sps:$4 sm:$0xff]  }
  0x4a   :  { %1515 = vmatmul.mubr.bf16.gmra.mxu1 %v4609_v42  ;;  %1233 = vmatprep.mubr.bf16.mxu0 %v4610_v43  ;;  %v4694_v42 = vld [vmem:[%s6228_s0 + $0x1ec] ss:$16 sps:$4 sm:$0xff]   ;;  %v4696_v43 = vld [vmem:[%s6228_s0 + $0x1e0] ss:$16 sps:$4 sm:$0xff]  }
  0x4b   :  { %1522 = vmatprep.mubr.bf16.mxu1 %v4612_v44  ;;  %4410 = vmatpush3.bf16.msra.mxu0 %v4710_v53  ;;  %v4697_v44 = vld [vmem:[%s6228_s0 + $0x1e8] ss:$16 sps:$4 sm:$0xff]   ;;  %v4704_v53 = vld [vmem:[%s6228_s0 + $0x224] ss:$16 sps:$4 sm:$0xff]  }
  0x4c   :  { %4490 = vmatpush3.bf16.msra.mxu1 %v4711_v54  ;;  %4411 = vmatprep.subr.bf16.mxu0 %v4736_v1  ;;  %v4706_v54 = vld [vmem:[%s6228_s0 + $0x22c] ss:$16 sps:$4 sm:$0xff]  }
  0x4d   :  { %4491 = vmatprep.subr.bf16.mxu1 %v4737_v2 }
  0x4f   :  { %4412 = vmatpush3.bf16.msra.mxu0 %v4736_v1  ;;  %v4724_v1 = vld [vmem:[%s6228_s0 + $0x284] ss:$16 sps:$4 sm:$0xff]  }
  0x50   :  { %4492 = vmatpush3.bf16.msra.mxu1 %v4737_v2  ;;  %4413 = vmatprep.subr.bf16.mxu0 %v4762_v19  ;;  %v4726_v2 = vld [vmem:[%s6228_s0 + $0x28c] ss:$16 sps:$4 sm:$0xff]  }
  0x51   :  { %1234 = vmatmul.mubr.bf16.gmra.mxu0 %v4614_v47  ;;  %4493 = vmatprep.subr.bf16.mxu1 %v4763_v20  ;;  %v4802_v47 = vld [vmem:[%s6229_s4 + $0x8] sm:$0xff]  }
  0x52   :  { %1523 = vmatmul.mubr.bf16.gmra.mxu1 %v4615_v48  ;;  %1241 = vmatprep.mubr.bf16.mxu0 %v4616_v49  ;;  %v4803_v48 = vld [vmem:[%s6230_s3 + $0x8] sm:$0xff]   ;;  %v4804_v49 = vld [vmem:[%s6229_s4] sm:$0xff]  }
  0x53   :  { %1530 = vmatprep.mubr.bf16.mxu1 %v4618_v50  ;;  %4414 = vmatpush3.bf16.msra.mxu0 %v4762_v19  ;;  %v4805_v50 = vld [vmem:[%s6230_s3] sm:$0xff]  }
  0x54   :  { %4494 = vmatpush3.bf16.msra.mxu1 %v4763_v20  ;;  %4415 = vmatprep.subr.bf16.mxu0 %v4788_v37  ;;  %v4754_v19 = vld [vmem:[%s6228_s0 + $0x300] ss:$16 sps:$4 sm:$0xff]   ;;  %v4755_v20 = vld [vmem:[%s6228_s0 + $0x308] ss:$16 sps:$4 sm:$0xff]  }
  0x55   :  { %4495 = vmatprep.subr.bf16.mxu1 %v4789_v38 }
  0x57   :  { %4416 = vmatpush3.bf16.msra.mxu0 %v4788_v37 }
  0x58   :  { %4496 = vmatpush3.bf16.msra.mxu1 %v4789_v38  ;;  %4417 = vmatprep.subr.bf16.mxu0 %v4802_v47 }
  0x59   :  { %1242 = vmatmul.mubr.bf16.gmra.mxu0 %v4620_v51  ;;  %4497 = vmatprep.subr.bf16.mxu1 %v4803_v48  ;;  %v4702_v51 = vld [vmem:[%s6228_s0 + $0x200] ss:$16 sps:$4 sm:$0xff]  }
  0x5a   :  { %1531 = vmatmul.mubr.bf16.gmra.mxu1 %v4621_v52  ;;  %1249 = vmatprep.mubr.bf16.mxu0 %v4622_v55  ;;  %v4703_v52 = vld [vmem:[%s6228_s0 + $0x208] ss:$16 sps:$4 sm:$0xff]   ;;  %v4708_v55 = vld [vmem:[%s6228_s0 + $0x220] ss:$16 sps:$4 sm:$0xff]  }
  0x5b   :  { %1538 = vmatprep.mubr.bf16.mxu1 %v4624_v56  ;;  %4418 = vmatpush3.bf16.msra.mxu0 %v4802_v47  ;;  %v4709_v56 = vld [vmem:[%s6228_s0 + $0x228] ss:$16 sps:$4 sm:$0xff]  }
  0x5c   :  { %4498 = vmatpush3.bf16.msra.mxu1 %v4803_v48  ;;  %4419 = vmatprep.subr.bf16.mxu0 %v4804_v49 }
  0x5d   :  { %4499 = vmatprep.subr.bf16.mxu1 %v4805_v50 }
  0x5f   :  { %4420 = vmatpush3.bf16.msra.mxu0 %v4804_v49 }
  0x60   :  { %4500 = vmatpush3.bf16.msra.mxu1 %v4805_v50 }
  0x61   :  { %1250 = vmatmul.mubr.bf16.gmra.mxu0 %v4626_v57  ;;  %v4712_v57 = vld [vmem:[%s6228_s0 + $0x244] ss:$16 sps:$4 sm:$0xff]  }
  0x62   :  { %1539 = vmatmul.mubr.bf16.gmra.mxu1 %v4627_v58  ;;  %1257 = vmatprep.mubr.bf16.mxu0 %v4628_v59  ;;  %v4714_v58 = vld [vmem:[%s6228_s0 + $0x24c] ss:$16 sps:$4 sm:$0xff]   ;;  %v4716_v59 = vld [vmem:[%s6228_s0 + $0x240] ss:$16 sps:$4 sm:$0xff]  }
  0x63   :  { %1546 = vmatprep.mubr.bf16.mxu1 %v4630_v60  ;;  %v4717_v60 = vld [vmem:[%s6228_s0 + $0x248] ss:$16 sps:$4 sm:$0xff]  }
  0x69   :  { %1258 = vmatmul.mubr.bf16.gmra.mxu0 %v4632_v61  ;;  %v4718_v61 = vld [vmem:[%s6228_s0 + $0x264] ss:$16 sps:$4 sm:$0xff]  }
  0x6a   :  { %1547 = vmatmul.mubr.bf16.gmra.mxu1 %v4633_v62  ;;  %1265 = vmatprep.mubr.bf16.mxu0 %v4634_v63  ;;  %v4720_v62 = vld [vmem:[%s6228_s0 + $0x26c] ss:$16 sps:$4 sm:$0xff]   ;;  %v4722_v63 = vld [vmem:[%s6228_s0 + $0x260] ss:$16 sps:$4 sm:$0xff]  }
  0x6b   :  { %1554 = vmatprep.mubr.bf16.mxu1 %v4636_v0  ;;  %v4723_v0 = vld [vmem:[%s6228_s0 + $0x268] ss:$16 sps:$4 sm:$0xff]  }
  0x71   :  { %1266 = vmatmul.mubr.bf16.gmra.mxu0 %v4638_v3  ;;  %v4728_v3 = vld [vmem:[%s6228_s0 + $0x280] ss:$16 sps:$4 sm:$0xff]  }
  0x72   :  { %1555 = vmatmul.mubr.bf16.gmra.mxu1 %v4639_v4  ;;  %1273 = vmatprep.mubr.bf16.mxu0 %v4640_v5  ;;  %v4729_v4 = vld [vmem:[%s6228_s0 + $0x288] ss:$16 sps:$4 sm:$0xff]   ;;  %v4730_v5 = vld [vmem:[%s6228_s0 + $0x2a4] ss:$16 sps:$4 sm:$0xff]  }
  0x73   :  { %1562 = vmatprep.mubr.bf16.mxu1 %v4642_v6  ;;  %v4732_v6 = vld [vmem:[%s6228_s0 + $0x2ac] ss:$16 sps:$4 sm:$0xff]  }
  0x79   :  { %1274 = vmatmul.mubr.bf16.gmra.mxu0 %v4644_v7  ;;  %v4734_v7 = vld [vmem:[%s6228_s0 + $0x2a0] ss:$16 sps:$4 sm:$0xff]  }
  0x7a   :  { %1563 = vmatmul.mubr.bf16.gmra.mxu1 %v4645_v8  ;;  %1281 = vmatprep.mubr.bf16.mxu0 %v4646_v9  ;;  %v4735_v8 = vld [vmem:[%s6228_s0 + $0x2a8] ss:$16 sps:$4 sm:$0xff]   ;;  %v4738_v9 = vld [vmem:[%s6228_s0 + $0x2c4] ss:$16 sps:$4 sm:$0xff]  }
  0x7b   :  { %1570 = vmatprep.mubr.bf16.mxu1 %v4648_v10  ;;  %v4740_v10 = vld [vmem:[%s6228_s0 + $0x2cc] ss:$16 sps:$4 sm:$0xff]  }
  0x81   :  { %1282 = vmatmul.mubr.bf16.gmra.mxu0 %v4650_v11  ;;  %v4742_v11 = vld [vmem:[%s6228_s0 + $0x2c0] ss:$16 sps:$4 sm:$0xff]  }
  0x82   :  { %1571 = vmatmul.mubr.bf16.gmra.mxu1 %v4651_v12  ;;  %1289 = vmatprep.mubr.bf16.mxu0 %v4652_v13  ;;  %v4743_v12 = vld [vmem:[%s6228_s0 + $0x2c8] ss:$16 sps:$4 sm:$0xff]   ;;  %v4744_v13 = vld [vmem:[%s6228_s0 + $0x2e4] ss:$16 sps:$4 sm:$0xff]  }
  0x83   :  { %1578 = vmatprep.mubr.bf16.mxu1 %v4654_v14  ;;  %v4746_v14 = vld [vmem:[%s6228_s0 + $0x2ec] ss:$16 sps:$4 sm:$0xff]  }
  0x89   :  { %1290 = vmatmul.mubr.bf16.gmra.mxu0 %v4656_v15  ;;  %v4748_v15 = vld [vmem:[%s6228_s0 + $0x2e0] ss:$16 sps:$4 sm:$0xff]  }
  0x8a   :  { %1579 = vmatmul.mubr.bf16.gmra.mxu1 %v4657_v16  ;;  %1297 = vmatprep.mubr.bf16.mxu0 %v4660_v17  ;;  %v4749_v16 = vld [vmem:[%s6228_s0 + $0x2e8] ss:$16 sps:$4 sm:$0xff]   ;;  %v4750_v17 = vld [vmem:[%s6228_s0 + $0x304] ss:$16 sps:$4 sm:$0xff]  }
  0x8b   :  { %1586 = vmatprep.mubr.bf16.mxu1 %v4662_v18  ;;  %v4752_v18 = vld [vmem:[%s6228_s0 + $0x30c] ss:$16 sps:$4 sm:$0xff]  }
  0x91   :  { %1298 = vmatmul.mubr.bf16.gmra.mxu0 %v4664_v21  ;;  %v4756_v21 = vld [vmem:[%s6228_s0 + $0x324] ss:$16 sps:$4 sm:$0xff]  }
  0x92   :  { %1587 = vmatmul.mubr.bf16.gmra.mxu1 %v4665_v22  ;;  %1305 = vmatprep.mubr.bf16.mxu0 %v4666_v23  ;;  %v4758_v22 = vld [vmem:[%s6228_s0 + $0x32c] ss:$16 sps:$4 sm:$0xff]  }
  0x93   :  { %1594 = vmatprep.mubr.bf16.mxu1 %v4668_v24 }
  0x99   :  { %1306 = vmatmul.mubr.bf16.gmra.mxu0 %v4670_v25 }
  0x9a   :  { %1595 = vmatmul.mubr.bf16.gmra.mxu1 %v4671_v26  ;;  %1313 = vmatprep.mubr.bf16.mxu0 %v4672_v27 }
  0x9b   :  { %1602 = vmatprep.mubr.bf16.mxu1 %v4674_v28  ;;  %v4760_v28 = vld [vmem:[%s6228_s0 + $0x320] ss:$16 sps:$4 sm:$0xff]  }
  0xa1   :  { %1314 = vmatmul.mubr.bf16.gmra.mxu0 %v4676_v29 }
  0xa2   :  { %1603 = vmatmul.mubr.bf16.gmra.mxu1 %v4677_v30  ;;  %1321 = vmatprep.mubr.bf16.mxu0 %v4678_v31  ;;  %v4761_v30 = vld [vmem:[%s6228_s0 + $0x328] ss:$16 sps:$4 sm:$0xff]   ;;  %v4764_v31 = vld [vmem:[%s6228_s0 + $0x344] ss:$16 sps:$4 sm:$0xff]  }
  0xa3   :  { %1610 = vmatprep.mubr.bf16.mxu1 %v4680_v32 }
  0xa9   :  { %1322 = vmatmul.mubr.bf16.gmra.mxu0 %v4682_v33  ;;  %v4766_v33 = vld [vmem:[%s6228_s0 + $0x34c] ss:$16 sps:$4 sm:$0xff]  }
  0xaa   :  { %1611 = vmatmul.mubr.bf16.gmra.mxu1 %v4683_v34  ;;  %1329 = vmatprep.mubr.bf16.mxu0 %v4686_v35 }
  0xab   :  { %1618 = vmatprep.mubr.bf16.mxu1 %v4688_v36 }
  0xb1   :  { %1330 = vmatmul.mubr.bf16.gmra.mxu0 %v4690_v39 }
  0xb2   :  { %1619 = vmatmul.mubr.bf16.gmra.mxu1 %v4691_v40  ;;  %1337 = vmatprep.mubr.bf16.mxu0 %v4692_v41  ;;  %v4768_v40 = vld [vmem:[%s6228_s0 + $0x340] ss:$16 sps:$4 sm:$0xff]  }
  0xb3   :  { %1626 = vmatprep.mubr.bf16.mxu1 %v4694_v42  ;;  %v4769_v42 = vld [vmem:[%s6228_s0 + $0x348] ss:$16 sps:$4 sm:$0xff]  }
  0xb9   :  { %1338 = vmatmul.mubr.bf16.gmra.mxu0 %v4696_v43  ;;  %v4770_v43 = vld [vmem:[%s6228_s0 + $0x364] ss:$16 sps:$4 sm:$0xff]  }
  0xba   :  { %1627 = vmatmul.mubr.bf16.gmra.mxu1 %v4697_v44  ;;  %1345 = vmatprep.mubr.bf16.mxu0 %v4698_v45  ;;  %v4772_v45 = vld [vmem:[%s6228_s0 + $0x36c] ss:$16 sps:$4 sm:$0xff]  }
  0xbb   :  { %1634 = vmatprep.mubr.bf16.mxu1 %v4700_v46 }
  0xc1   :  { %1346 = vmatmul.mubr.bf16.gmra.mxu0 %v4702_v51 }
  0xc2   :  { %1635 = vmatmul.mubr.bf16.gmra.mxu1 %v4703_v52  ;;  %1353 = vmatprep.mubr.bf16.mxu0 %v4704_v53  ;;  %v4774_v52 = vld [vmem:[%s6228_s0 + $0x360] ss:$16 sps:$4 sm:$0xff]  }
  0xc3   :  { %1642 = vmatprep.mubr.bf16.mxu1 %v4706_v54  ;;  %v4775_v54 = vld [vmem:[%s6228_s0 + $0x368] ss:$16 sps:$4 sm:$0xff]  }
  0xc9   :  { %1354 = vmatmul.mubr.bf16.gmra.mxu0 %v4708_v55  ;;  %v4778_v55 = vld [vmem:[%s6228_s0 + $0x384] ss:$16 sps:$4 sm:$0xff]  }
  0xca   :  { %1643 = vmatmul.mubr.bf16.gmra.mxu1 %v4709_v56  ;;  %1361 = vmatprep.mubr.bf16.mxu0 %v4712_v57  ;;  %v4781_v57 = vld [vmem:[%s6228_s0 + $0x38c] ss:$16 sps:$4 sm:$0xff]  }
  0xcb   :  { %1650 = vmatprep.mubr.bf16.mxu1 %v4714_v58 }
  0xd1   :  { %1362 = vmatmul.mubr.bf16.gmra.mxu0 %v4716_v59 }
  0xd2   :  { %1651 = vmatmul.mubr.bf16.gmra.mxu1 %v4717_v60  ;;  %1369 = vmatprep.mubr.bf16.mxu0 %v4718_v61 }
  0xd3   :  { %1658 = vmatprep.mubr.bf16.mxu1 %v4720_v62 }
  0xd9   :  { %1370 = vmatmul.mubr.bf16.gmra.mxu0 %v4722_v63 }
  0xda   :  { %1659 = vmatmul.mubr.bf16.gmra.mxu1 %v4723_v0  ;;  %1377 = vmatprep.mubr.bf16.mxu0 %v4724_v1  ;;  %v4776_v0 = vld [vmem:[%s6228_s0 + $0x380] ss:$16 sps:$4 sm:$0xff]  }
  0xdb   :  { %1666 = vmatprep.mubr.bf16.mxu1 %v4726_v2  ;;  %v4779_v2 = vld [vmem:[%s6228_s0 + $0x388] ss:$16 sps:$4 sm:$0xff]  }
  0xe1   :  { %1378 = vmatmul.mubr.bf16.gmra.mxu0 %v4728_v3  ;;  %v4784_v3 = vld [vmem:[%s6228_s0 + $0x3a4] ss:$16 sps:$4 sm:$0xff]  }
  0xe2   :  { %1667 = vmatmul.mubr.bf16.gmra.mxu1 %v4729_v4  ;;  %1385 = vmatprep.mubr.bf16.mxu0 %v4730_v5  ;;  %v4787_v5 = vld [vmem:[%s6228_s0 + $0x3ac] ss:$16 sps:$4 sm:$0xff]  }
  0xe3   :  { %1674 = vmatprep.mubr.bf16.mxu1 %v4732_v6 }
  0xe9   :  { %1386 = vmatmul.mubr.bf16.gmra.mxu0 %v4734_v7 }
  0xea   :  { %1675 = vmatmul.mubr.bf16.gmra.mxu1 %v4735_v8  ;;  %1393 = vmatprep.mubr.bf16.mxu0 %v4738_v9 }
  0xeb   :  { %1682 = vmatprep.mubr.bf16.mxu1 %v4740_v10 }
  0xf1   :  { %1394 = vmatmul.mubr.bf16.gmra.mxu0 %v4742_v11 }
  0xf2   :  { %1683 = vmatmul.mubr.bf16.gmra.mxu1 %v4743_v12  ;;  %1401 = vmatprep.mubr.bf16.mxu0 %v4744_v13  ;;  %v4782_v12 = vld [vmem:[%s6228_s0 + $0x3a0] ss:$16 sps:$4 sm:$0xff]  }
  0xf3   :  { %1690 = vmatprep.mubr.bf16.mxu1 %v4746_v14  ;;  %v4785_v14 = vld [vmem:[%s6228_s0 + $0x3a8] ss:$16 sps:$4 sm:$0xff]  }
  0xf9   :  { %1402 = vmatmul.mubr.bf16.gmra.mxu0 %v4748_v15  ;;  %v4792_v15 = vld [vmem:[%s6228_s0 + $0x3c4] ss:$16 sps:$4 sm:$0xff]  }
  0xfa   :  { %1691 = vmatmul.mubr.bf16.gmra.mxu1 %v4749_v16  ;;  %1409 = vmatprep.mubr.bf16.mxu0 %v4750_v17  ;;  %v4795_v17 = vld [vmem:[%s6228_s0 + $0x3cc] ss:$16 sps:$4 sm:$0xff]  }
  0xfb   :  { %1698 = vmatprep.mubr.bf16.mxu1 %v4752_v18 }
 0x101   :  { %v5485_v23 = vpop.f32.mrf.mxu0  ;;  %1410 = vmatmul.mubr.bf16.gmra.mxu0 %v4754_v19 }
 0x102   :  { %v5487_v24 = vpop.f32.mrf.mxu1  ;;  %1699 = vmatmul.mubr.bf16.gmra.mxu1 %v4755_v20  ;;  %1417 = vmatprep.mubr.bf16.mxu0 %v4756_v21 }
 0x103   :  { %v1221_v25 = vpop.f32.mrf.mxu0  ;;  %1706 = vmatprep.mubr.bf16.mxu1 %v4758_v22 }
 0x104   :  { %v1510_v26 = vpop.f32.mrf.mxu1 }
 0x105   :  { %v5489_v27 = vpop.f32.mrf.mxu0  ;;  %v4790_v26 = vld [vmem:[%s6228_s0 + $0x3c0] ss:$16 sps:$4 sm:$0xff]  }
 0x106   :  { %v5494_v29 = vpop.f32.mrf.mxu1 }
 0x107   :  { %v1224_v32 = vpop.f32.mrf.mxu0 }
 0x108   :  { %v1513_v34 = vpop.f32.mrf.mxu1 }
 0x109   :  { %v5505_v35 = vpop.f32.mrf.mxu0  ;;  %1418 = vmatmul.mubr.bf16.gmra.mxu0 %v4760_v28 }
 0x10a   :  { %v5507_v36 = vpop.f32.mrf.mxu1  ;;  %1707 = vmatmul.mubr.bf16.gmra.mxu1 %v4761_v30  ;;  %1425 = vmatprep.mubr.bf16.mxu0 %v4764_v31  ;;  %v4793_v30 = vld [vmem:[%s6228_s0 + $0x3c8] ss:$16 sps:$4 sm:$0xff]   ;;  %v4798_v31 = vld [vmem:[%s6228_s0 + $0x3e4] ss:$16 sps:$4 sm:$0xff]  }
 0x10b   :  { %v1229_v37 = vpop.f32.mrf.mxu0  ;;  %1714 = vmatprep.mubr.bf16.mxu1 %v4766_v33  ;;  %v4801_v33 = vld [vmem:[%s6228_s0 + $0x3ec] ss:$16 sps:$4 sm:$0xff]  }
 0x10c   :  { %v1518_v38 = vpop.f32.mrf.mxu1 }
 0x10d   :  { %v5509_v39 = vpop.f32.mrf.mxu0 }
 0x10e   :  { %v5514_v41 = vpop.f32.mrf.mxu1 }
 0x10f   :  { %v1232_v44 = vpop.f32.mrf.mxu0 }
 0x110   :  { %v1521_v46 = vpop.f32.mrf.mxu1 }
 0x111   :  { %v5525_v47 = vpop.f32.mrf.mxu0  ;;  %1426 = vmatmul.mubr.bf16.gmra.mxu0 %v4768_v40 }
 0x112   :  { %v5527_v48 = vpop.f32.mrf.mxu1  ;;  %1715 = vmatmul.mubr.bf16.gmra.mxu1 %v4769_v42  ;;  %1433 = vmatprep.mubr.bf16.mxu0 %v4770_v43  ;;  %v1512_v43 = vadd.f32 %v5494_v29, %v5489_v27 }
 0x113   :  { %v1237_v49 = vpop.f32.mrf.mxu0  ;;  %1722 = vmatprep.mubr.bf16.mxu1 %v4772_v45  ;;  %v4796_v45 = vld [vmem:[%s6228_s0 + $0x3e0] ss:$16 sps:$4 sm:$0xff]  }
 0x114   :  { %v1526_v50 = vpop.f32.mrf.mxu1  ;;  %v4799_v49 = vld [vmem:[%s6228_s0 + $0x3e8] ss:$16 sps:$4 sm:$0xff]  }
 0x115   :  { %v5529_v51 = vpop.f32.mrf.mxu0  ;;  %v4806_v50 = vld [vmem:[%s6231_s2] sm:$0xff]  }
 0x116   :  { %v5534_v53 = vpop.f32.mrf.mxu1 }
 0x117   :  { %v1240_v56 = vpop.f32.mrf.mxu0 }
 0x118   :  { %v1529_v58 = vpop.f32.mrf.mxu1 }
 0x119   :  { %v5545_v59 = vpop.f32.mrf.mxu0  ;;  %1434 = vmatmul.mubr.bf16.gmra.mxu0 %v4774_v52  ;;  %v1509_v52 = vadd.f32 %v5487_v24, %v5485_v23  ;;  %v1520_v58 = vadd.f32 %v5514_v41, %v5509_v39  ;;  %v4807_v24 = vld [vmem:[%s6231_s2 + $0x8] sm:$0xff]   ;;  %v1525_v39 = vadd.f32 %v5527_v48, %v5525_v47  ;;  %v4809_v47 = vld [vmem:[%s6231_s2 + $0x18] sm:$0xff]  }
 0x11a   :  { %v5547_v60 = vpop.f32.mrf.mxu1  ;;  %1723 = vmatmul.mubr.bf16.gmra.mxu1 %v4775_v54  ;;  %1441 = vmatprep.mubr.bf16.mxu0 %v4778_v55 }
 0x11b   :  { %v1245_v61 = vpop.f32.mrf.mxu0  ;;  %1730 = vmatprep.mubr.bf16.mxu1 %v4781_v57  ;;  %v1958_v27 = vpack.c.bf16 %v1512_v43, %v1509_v52  ;;  %v1533_v48 = vadd.f32 %v5547_v60, %v5545_v59 }
 0x11c   :  { %v1534_v62 = vpop.f32.mrf.mxu1 }
 0x11d   :  { %v5549_v63 = vpop.f32.mrf.mxu0  ;;  %v1528_v62 = vadd.f32 %v5534_v53, %v5529_v51 }
 0x11e   :  { %v5554_v1 = vpop.f32.mrf.mxu1 }
 0x11f   :  { %v1248_v4 = vpop.f32.mrf.mxu0  ;;  %v1960_v51 = vpack.c.bf16 %v1528_v62, %v1525_v39 }
 0x120   :  { %v1537_v6 = vpop.f32.mrf.mxu1 }
 0x121   :  { %v5565_v7 = vpop.f32.mrf.mxu0  ;;  %1442 = vmatmul.mubr.bf16.gmra.mxu0 %v4776_v0  ;;  %v1517_v0 = vadd.f32 %v5507_v36, %v5505_v35  ;;  %v1536_v35 = vadd.f32 %v5554_v1, %v5549_v63 }
 0x122   :  { %v5567_v8 = vpop.f32.mrf.mxu1  ;;  %1731 = vmatmul.mubr.bf16.gmra.mxu1 %v4779_v2  ;;  %1449 = vmatprep.mubr.bf16.mxu0 %v4784_v3  ;;  %v4808_v3 = vld [vmem:[%s6231_s2 + $0x10] sm:$0xff]  }
 0x123   :  { %v1253_v9 = vpop.f32.mrf.mxu0  ;;  %1738 = vmatprep.mubr.bf16.mxu1 %v4787_v5  ;;  %v1959_v4 = vpack.c.bf16 %v1520_v58, %v1517_v0  ;;  %v1541_v63 = vadd.f32 %v5567_v8, %v5565_v7  ;;  %v4811_v7 = vld [vmem:[%s6231_s2 + $0x28] sm:$0xff]  }
 0x124   :  { %v1542_v10 = vpop.f32.mrf.mxu1 }
 0x125   :  { %v5569_v11 = vpop.f32.mrf.mxu0 }
 0x126   :  { %v5574_v13 = vpop.f32.mrf.mxu1 }
 0x127   :  { %v1256_v16 = vpop.f32.mrf.mxu0  ;;  %v1544_v10 = vadd.f32 %v5574_v13, %v5569_v11 }
 0x128   :  { %v1545_v18 = vpop.f32.mrf.mxu1  ;;  %v1961_v16 = vpack.c.bf16 %v1536_v35, %v1533_v48 }
 0x129   :  { %v5585_v19 = vpop.f32.mrf.mxu0  ;;  %1450 = vmatmul.mubr.bf16.gmra.mxu0 %v4782_v12  ;;  %v1962_v11 = vpack.c.bf16 %v1544_v10, %v1541_v63 }
 0x12a   :  { %v5587_v20 = vpop.f32.mrf.mxu1  ;;  %1739 = vmatmul.mubr.bf16.gmra.mxu1 %v4785_v14  ;;  %1457 = vmatprep.mubr.bf16.mxu0 %v4792_v15  ;;  %v4810_v15 = vld [vmem:[%s6231_s2 + $0x20] sm:$0xff]  }
 0x12b   :  { %v1261_v21 = vpop.f32.mrf.mxu0  ;;  %1746 = vmatprep.mubr.bf16.mxu1 %v4795_v17  ;;  %v1549_v8 = vadd.f32 %v5587_v20, %v5585_v19 }
 0x12c   :  { %v1550_v22 = vpop.f32.mrf.mxu1 }
 0x12d   :  { %v5589_v25 = vpop.f32.mrf.mxu0 }
 0x12e   :  { %v5594_v28 = vpop.f32.mrf.mxu1 }
 0x12f   :  { %v1264_v32 = vpop.f32.mrf.mxu0  ;;  %v1552_v59 = vadd.f32 %v5594_v28, %v5589_v25 }
 0x130   :  { %v1553_v34 = vpop.f32.mrf.mxu1 }
 0x131   :  { %v5605_v37 = vpop.f32.mrf.mxu0  ;;  %1458 = vmatmul.mubr.bf16.gmra.mxu0 %v4790_v26  ;;  %v1963_v25 = vpack.c.bf16 %v1552_v59, %v1549_v8 }
 0x132   :  { %v5607_v38 = vpop.f32.mrf.mxu1  ;;  %1747 = vmatmul.mubr.bf16.gmra.mxu1 %v4793_v30  ;;  %1465 = vmatprep.mubr.bf16.mxu0 %v4798_v31  ;;  %v4812_v31 = vld [vmem:[%s6231_s2 + $0x30] sm:$0xff]  }
 0x133   :  { %v1269_v40 = vpop.f32.mrf.mxu0  ;;  %1754 = vmatprep.mubr.bf16.mxu1 %v4801_v33  ;;  %v1557_v32 = vadd.f32 %v5607_v38, %v5605_v37 }
 0x134   :  { %v1558_v42 = vpop.f32.mrf.mxu1 }
 0x135   :  { %v1270_v44 = vpop.f32.mrf.mxu0 }
 0x136   :  { %v1559_v46 = vpop.f32.mrf.mxu1 }
 0x137   :  { %v1272_v54 = vpop.f32.mrf.mxu0  ;;  %v1560_v22 = vadd.f32 %v1559_v46, %v1270_v44  ;;  %v4813_v46 = vld [vmem:[%s6231_s2 + $0x38] sm:$0xff]  }
 0x138   :  { %v1561_v55 = vpop.f32.mrf.mxu1 }
 0x139   :  { %v5622_v29 = vpop.f32.mrf.mxu0  ;;  %1466 = vmatmul.mubr.bf16.gmra.mxu0 %v4796_v45  ;;  %v1964_v34 = vpack.c.bf16 %v1560_v22, %v1557_v32  ;;  %v4819_v22 = vld [vmem:[%s6231_s2 + $0x68] sm:$0xff]  }
 0x13a   :  { %v5624_v56 = vpop.f32.mrf.mxu1  ;;  %1755 = vmatmul.mubr.bf16.gmra.mxu1 %v4799_v49  ;;  %4421 = vmatprep.mubr.bf16.mxu0 %v4806_v50  ;;  %v4814_v49 = vld [vmem:[%s6231_s2 + $0x40] sm:$0xff]  }
 0x13b   :  { %4501 = vmatprep.mubr.bf16.mxu1 %v1958_v27  ;;  %v1277_v57 = vpop.f32.mrf.mxu0  ;;  %v1565_v37 = vadd.f32 %v5624_v56, %v5622_v29 }
 0x13c   :  { %v1566_v61 = vpop.f32.mrf.mxu1 }
 0x13d   :  { %v1278_v23 = vpop.f32.mrf.mxu0 }
 0x13e   :  { %v1567_v2 = vpop.f32.mrf.mxu1 }
 0x13f   :  { %v1280_v41 = vpop.f32.mrf.mxu0  ;;  %v1568_v19 = vadd.f32 %v1567_v2, %v1278_v23 }
 0x140   :  { %v1569_v5 = vpop.f32.mrf.mxu1 }
 0x141   :  { %v1283_v53 = vpop.f32.mrf.mxu0  ;;  %4422 = vmatmul.mubr.bf16.vlgmr.msra.gmra.mxu0 %v4807_v24  ;;  %v1965_v54 = vpack.c.bf16 %v1568_v19, %v1565_v37  ;;  %v4815_v24 = vld [vmem:[%s6231_s2 + $0x48] sm:$0xff]  }
 0x142   :  { %v1572_v6 = vpop.f32.mrf.mxu1  ;;  %4502 = vmatmul.mubr.bf16.vlgmr.msra.gmra.mxu1 %v1959_v4  ;;  %4425 = vmatprep.mubr.bf16.mxu0 %v4808_v3  ;;  %v4816_v3 = vld [vmem:[%s6231_s2 + $0x50] sm:$0xff]  }
 0x143   :  { %4505 = vmatprep.mubr.bf16.mxu1 %v1960_v51  ;;  %v1285_v9 = vpop.f32.mrf.mxu0  ;;  %v1573_v50 = vadd.f32 %v1572_v6, %v1283_v53 }
 0x144   :  { %v1574_v36 = vpop.f32.mrf.mxu1 }
 0x145   :  { %v1286_v12 = vpop.f32.mrf.mxu0 }
 0x146   :  { %v1575_v14 = vpop.f32.mrf.mxu1 }
 0x147   :  { %v1288_v1 = vpop.f32.mrf.mxu0  ;;  %v1576_v44 = vadd.f32 %v1575_v14, %v1286_v12  ;;  %v4817_v12 = vld [vmem:[%s6231_s2 + $0x58] sm:$0xff]   ;;  %v4818_v14 = vld [vmem:[%s6231_s2 + $0x60] sm:$0xff]  }
 0x148   :  { %v1577_v17 = vpop.f32.mrf.mxu1 }
 0x149   :  { %v1291_v13 = vpop.f32.mrf.mxu0  ;;  %4426 = vmatmul.mubr.bf16.gmra.mxu0 %v4809_v47  ;;  %v1966_v27 = vpack.c.bf16 %v1576_v44, %v1573_v50 }
 0x14a   :  { %v1580_v18 = vpop.f32.mrf.mxu1  ;;  %4506 = vmatmul.mubr.bf16.gmra.mxu1 %v1961_v16  ;;  %4429 = vmatprep.mubr.bf16.mxu0 %v4810_v15 }
 0x14b   :  { %4509 = vmatprep.mubr.bf16.mxu1 %v1962_v11  ;;  %v1293_v21 = vpop.f32.mrf.mxu0  ;;  %v1581_v0 = vadd.f32 %v1580_v18, %v1291_v13 }
 0x14c   :  { %v1582_v60 = vpop.f32.mrf.mxu1 }
 0x14d   :  { %v1294_v26 = vpop.f32.mrf.mxu0 }
 0x14e   :  { %v1583_v30 = vpop.f32.mrf.mxu1 }
 0x14f   :  { %v1296_v33 = vpop.f32.mrf.mxu0  ;;  %v1584_v62 = vadd.f32 %v1583_v30, %v1294_v26 }
 0x150   :  { %v1585_v28 = vpop.f32.mrf.mxu1 }
 0x151   :  { %v1299_v40 = vpop.f32.mrf.mxu0  ;;  %4430 = vmatmul.mubr.bf16.gmra.mxu0 %v4811_v7  ;;  %v1967_v4 = vpack.c.bf16 %v1584_v62, %v1581_v0  ;;  %v4820_v7 = vld [vmem:[%s6231_s2 + $0x70] sm:$0xff]  }
 0x152   :  { %v1588_v42 = vpop.f32.mrf.mxu1  ;;  %4510 = vmatmul.mubr.bf16.gmra.mxu1 %v1963_v25  ;;  %4433 = vmatprep.mubr.bf16.mxu0 %v4812_v31 }
 0x153   :  { %4513 = vmatprep.mubr.bf16.mxu1 %v1964_v34  ;;  %v1301_v43 = vpop.f32.mrf.mxu0  ;;  %v1589_v39 = vadd.f32 %v1588_v42, %v1299_v40 }
 0x154   :  { %v1590_v20 = vpop.f32.mrf.mxu1  ;;  %v4821_v43 = vld [vmem:[%s6231_s2 + $0x78] sm:$0xff]  }
 0x155   :  { %v1302_v45 = vpop.f32.mrf.mxu0  ;;  %v4822_v20 = vld [vmem:[%s6231_s2 + $0x80] sm:$0xff]  }
 0x156   :  { %v1591_v38 = vpop.f32.mrf.mxu1 }
 0x157   :  { %v1304_v52 = vpop.f32.mrf.mxu0  ;;  %v1592_v29 = vadd.f32 %v1591_v38, %v1302_v45 }
 0x158   :  { %v1593_v55 = vpop.f32.mrf.mxu1 }
 0x159   :  { %v1307_v57 = vpop.f32.mrf.mxu0  ;;  %4434 = vmatmul.mubr.bf16.gmra.mxu0 %v4813_v46  ;;  %v1968_v51 = vpack.c.bf16 %v1592_v29, %v1589_v39 }
 0x15a   :  { %v1596_v58 = vpop.f32.mrf.mxu1  ;;  %4514 = vmatmul.mubr.bf16.gmra.mxu1 %v1965_v54  ;;  %4437 = vmatprep.mubr.bf16.mxu0 %v4814_v49 }
 0x15b   :  { %4517 = vmatprep.mubr.bf16.mxu1 %v1966_v27  ;;  %v1309_v61 = vpop.f32.mrf.mxu0  ;;  %v1597_v47 = vadd.f32 %v1596_v58, %v1307_v57  ;;  %v4823_v27 = vld [vmem:[%s6231_s2 + $0x88] sm:$0xff]   ;;  %v4824_v58 = vld [vmem:[%s6231_s2 + $0x90] sm:$0xff]  }
 0x15c   :  { %v1598_v23 = vpop.f32.mrf.mxu1 }
 0x15d   :  { %v1310_v56 = vpop.f32.mrf.mxu0 }
 0x15e   :  { %v1599_v2 = vpop.f32.mrf.mxu1 }
 0x15f   :  { %v1312_v41 = vpop.f32.mrf.mxu0  ;;  %v1600_v35 = vadd.f32 %v1599_v2, %v1310_v56 }
 0x160   :  { %v1601_v5 = vpop.f32.mrf.mxu1  ;;  %v4825_v41 = vld [vmem:[%s6231_s2 + $0x98] sm:$0xff]  }
 0x161   :  { %v1315_v53 = vpop.f32.mrf.mxu0  ;;  %4438 = vmatmul.mubr.bf16.gmra.mxu0 %v4815_v24  ;;  %v1969_v16 = vpack.c.bf16 %v1600_v35, %v1597_v47  ;;  %v4826_v5 = vld [vmem:[%s6231_s2 + $0xa0] sm:$0xff]  }
 0x162   :  { %v1604_v6 = vpop.f32.mrf.mxu1  ;;  %4518 = vmatmul.mubr.bf16.gmra.mxu1 %v1967_v4  ;;  %4441 = vmatprep.mubr.bf16.mxu0 %v4816_v3 }
 0x163   :  { %4521 = vmatprep.mubr.bf16.mxu1 %v1968_v51  ;;  %v1317_v9 = vpop.f32.mrf.mxu0  ;;  %v1605_v15 = vadd.f32 %v1604_v6, %v1315_v53 }
 0x164   :  { %v1606_v36 = vpop.f32.mrf.mxu1 }
 0x165   :  { %v1318_v10 = vpop.f32.mrf.mxu0 }
 0x166   :  { %v1607_v48 = vpop.f32.mrf.mxu1 }
 0x167   :  { %v1608_v63 = vadd.f32 %v1607_v48, %v1318_v10  ;;  %v1320_v1 = vpop.f32.mrf.mxu0 }
 0x168   :  { %v1609_v17 = vpop.f32.mrf.mxu1 }
 0x169   :  { %v1970_v11 = vpack.c.bf16 %v1608_v63, %v1605_v15  ;;  %v1323_v13 = vpop.f32.mrf.mxu0  ;;  %4442 = vmatmul.mubr.bf16.gmra.mxu0 %v4817_v12  ;;  %v4828_v63 = vld [vmem:[%s6231_s2 + $0xb0] sm:$0xff]  }
 0x16a   :  { %v1612_v18 = vpop.f32.mrf.mxu1  ;;  %4522 = vmatmul.mubr.bf16.gmra.mxu1 %v1969_v16  ;;  %4445 = vmatprep.mubr.bf16.mxu0 %v4818_v14  ;;  %v4827_v14 = vld [vmem:[%s6231_s2 + $0xa8] sm:$0xff]  }
 0x16b   :  { %4525 = vmatprep.mubr.bf16.mxu1 %v1970_v11  ;;  %v1325_v21 = vpop.f32.mrf.mxu0  ;;  %v1613_v8 = vadd.f32 %v1612_v18, %v1323_v13 }
 0x16c   :  { %v1614_v59 = vpop.f32.mrf.mxu1 }
 0x16d   :  { %v1326_v60 = vpop.f32.mrf.mxu0 }
 0x16e   :  { %v1615_v26 = vpop.f32.mrf.mxu1 }
 0x16f   :  { %v1616_v30 = vadd.f32 %v1615_v26, %v1326_v60  ;;  %v1328_v31 = vpop.f32.mrf.mxu0  ;;  %v4829_v26 = vld [vmem:[%s6231_s2 + $0xb8] sm:$0xff]  }
 0x170   :  { %v1617_v32 = vpop.f32.mrf.mxu1 }
 0x171   :  { %v1971_v33 = vpack.c.bf16 %v1616_v30, %v1613_v8  ;;  %v1331_v25 = vpop.f32.mrf.mxu0  ;;  %4446 = vmatmul.mubr.bf16.gmra.mxu0 %v4819_v22  ;;  %v4830_v8 = vld [vmem:[%s6231_s2 + $0xc0] sm:$0xff]  }
 0x172   :  { %v1620_v28 = vpop.f32.mrf.mxu1  ;;  %4449 = vmatprep.mubr.bf16.mxu0 %v4820_v7 }
 0x173   :  { %4526 = vmatmul.mubr.bf16.gmra.mxu1 %v1971_v33  ;;  %v1333_v34 = vpop.f32.mrf.mxu0  ;;  %v1621_v44 = vadd.f32 %v1620_v28, %v1331_v25 }
 0x174   :  { %v1622_v40 = vpop.f32.mrf.mxu1 }
 0x175   :  { %v1334_v42 = vpop.f32.mrf.mxu0 }
 0x176   :  { %v1623_v19 = vpop.f32.mrf.mxu1 }
 0x177   :  { %v1624_v45 = vadd.f32 %v1623_v19, %v1334_v42  ;;  %v1336_v46 = vpop.f32.mrf.mxu0  ;;  %v4831_v19 = vld [vmem:[%s6231_s2 + $0xc8] sm:$0xff]  }
 0x178   :  { %v1625_v37 = vpop.f32.mrf.mxu1 }
 0x179   :  { %v1972_v38 = vpack.c.bf16 %v1624_v45, %v1621_v44  ;;  %v1339_v49 = vpop.f32.mrf.mxu0  ;;  %4450 = vmatmul.mubr.bf16.gmra.mxu0 %v4821_v43  ;;  %v4832_v44 = vld [vmem:[%s6231_s2 + $0xd0] sm:$0xff]  }
 0x17a   :  { %v1628_v50 = vpop.f32.mrf.mxu1  ;;  %4453 = vmatprep.mubr.bf16.mxu0 %v4822_v20 }
 0x17b   :  { %4529 = vmatprep.mubr.bf16.mxu1 %v1972_v38  ;;  %v1341_v52 = vpop.f32.mrf.mxu0  ;;  %v1629_v61 = vadd.f32 %v1628_v50, %v1339_v49 }
 0x17c   :  { %v1630_v54 = vpop.f32.mrf.mxu1 }
 0x17d   :  { %v1342_v55 = vpop.f32.mrf.mxu0 }
 0x17e   :  { %v1631_v57 = vpop.f32.mrf.mxu1 }
 0x17f   :  { %v1632_v62 = vadd.f32 %v1631_v57, %v1342_v55  ;;  %v1344_v23 = vpop.f32.mrf.mxu0  ;;  %v4833_v57 = vld [vmem:[%s6231_s2 + $0xd8] sm:$0xff]  }
 0x180   :  { %v1633_v29 = vpop.f32.mrf.mxu1 }
 0x181   :  { %v1973_v56 = vpack.c.bf16 %v1632_v62, %v1629_v61  ;;  %v1347_v24 = vpop.f32.mrf.mxu0  ;;  %4454 = vmatmul.mubr.bf16.gmra.mxu0 %v4823_v27  ;;  %v4834_v61 = vld [vmem:[%s6231_s2 + $0xe0] sm:$0xff]  }
 0x182   :  { %v1636_v0 = vpop.f32.mrf.mxu1  ;;  %4457 = vmatprep.mubr.bf16.mxu0 %v4824_v58 }
 0x183   :  { %4530 = vmatmul.mubr.bf16.gmra.mxu1 %v1973_v56  ;;  %v1349_v2 = vpop.f32.mrf.mxu0  ;;  %v1637_v51 = vadd.f32 %v1636_v0, %v1347_v24 }
 0x184   :  { %v1638_v3 = vpop.f32.mrf.mxu1 }
 0x185   :  { %v1350_v39 = vpop.f32.mrf.mxu0 }
 0x186   :  { %v1639_v4 = vpop.f32.mrf.mxu1 }
 0x187   :  { %v1640_v53 = vadd.f32 %v1639_v4, %v1350_v39  ;;  %v1352_v6 = vpop.f32.mrf.mxu0  ;;  %v4835_v4 = vld [vmem:[%s6231_s2 + $0xe8] sm:$0xff]  }
 0x188   :  { %v1641_v9 = vpop.f32.mrf.mxu1 }
 0x189   :  { %v1974_v35 = vpack.c.bf16 %v1640_v53, %v1637_v51  ;;  %v1355_v36 = vpop.f32.mrf.mxu0  ;;  %4458 = vmatmul.mubr.bf16.gmra.mxu0 %v4825_v41  ;;  %v4836_v51 = vld [vmem:[%s6231_s2 + $0xf0] sm:$0xff]  }
 0x18a   :  { %v1644_v10 = vpop.f32.mrf.mxu1  ;;  %4461 = vmatprep.mubr.bf16.mxu0 %v4826_v5 }
 0x18b   :  { %4533 = vmatprep.mubr.bf16.mxu1 %v1974_v35  ;;  %v1357_v12 = vpop.f32.mrf.mxu0  ;;  %v1645_v1 = vadd.f32 %v1644_v10, %v1355_v36 }
 0x18c   :  { %v1646_v47 = vpop.f32.mrf.mxu1 }
 0x18d   :  { %v1358_v48 = vpop.f32.mrf.mxu0 }
 0x18e   :  { %v1647_v15 = vpop.f32.mrf.mxu1 }
 0x18f   :  { %v1648_v16 = vadd.f32 %v1647_v15, %v1358_v48  ;;  %v1360_v17 = vpop.f32.mrf.mxu0  ;;  %v4837_v15 = vld [vmem:[%s6231_s2 + $0xf8] sm:$0xff]  }
 0x190   :  { %v1649_v11 = vpop.f32.mrf.mxu1 }
 0x191   :  { %v1975_v13 = vpack.c.bf16 %v1648_v16, %v1645_v1  ;;  %v1363_v18 = vpop.f32.mrf.mxu0  ;;  %4462 = vmatmul.mubr.bf16.gmra.mxu0 %v4827_v14 }
 0x192   :  { %v1652_v21 = vpop.f32.mrf.mxu1  ;;  %4465 = vmatprep.mubr.bf16.mxu0 %v4828_v63 }
 0x193   :  { %4534 = vmatmul.mubr.bf16.gmra.mxu1 %v1975_v13  ;;  %v1365_v59 = vpop.f32.mrf.mxu0  ;;  %v1653_v30 = vadd.f32 %v1652_v21, %v1363_v18 }
 0x194   :  { %v1654_v60 = vpop.f32.mrf.mxu1 }
 0x195   :  { %v1366_v22 = vpop.f32.mrf.mxu0 }
 0x196   :  { %v1655_v7 = vpop.f32.mrf.mxu1 }
 0x197   :  { %v1656_v31 = vadd.f32 %v1655_v7, %v1366_v22  ;;  %v1368_v32 = vpop.f32.mrf.mxu0 }
 0x198   :  { %v1657_v33 = vpop.f32.mrf.mxu1 }
 0x199   :  { %v1976_v25 = vpack.c.bf16 %v1656_v31, %v1653_v30  ;;  %v1371_v28 = vpop.f32.mrf.mxu0  ;;  %4466 = vmatmul.mubr.bf16.gmra.mxu0 %v4829_v26 }
 0x19a   :  { %v1660_v34 = vpop.f32.mrf.mxu1  ;;  %4469 = vmatprep.mubr.bf16.mxu0 %v4830_v8 }
 0x19b   :  { %4537 = vmatprep.mubr.bf16.mxu1 %v1976_v25  ;;  %v1373_v40 = vpop.f32.mrf.mxu0  ;;  %v1661_v45 = vadd.f32 %v1660_v34, %v1371_v28 }
 0x19c   :  { %v1662_v42 = vpop.f32.mrf.mxu1 }
 0x19d   :  { %v1374_v43 = vpop.f32.mrf.mxu0 }
 0x19e   :  { %v1663_v20 = vpop.f32.mrf.mxu1 }
 0x19f   :  { %v1664_v46 = vadd.f32 %v1663_v20, %v1374_v43  ;;  %v1376_v37 = vpop.f32.mrf.mxu0 }
 0x1a0   :  { %v1665_v38 = vpop.f32.mrf.mxu1 }
 0x1a1   :  { %v1977_v49 = vpack.c.bf16 %v1664_v46, %v1661_v45  ;;  %v1379_v50 = vpop.f32.mrf.mxu0  ;;  %4470 = vmatmul.mubr.bf16.gmra.mxu0 %v4831_v19 }
 0x1a2   :  { %v1668_v52 = vpop.f32.mrf.mxu1  ;;  %4473 = vmatprep.mubr.bf16.mxu0 %v4832_v44 }
 0x1a3   :  { %4538 = vmatmul.mubr.bf16.gmra.mxu1 %v1977_v49  ;;  %v1381_v54 = vpop.f32.mrf.mxu0  ;;  %v1669_v62 = vadd.f32 %v1668_v52, %v1379_v50 }
 0x1a4   :  { %v1670_v55 = vpop.f32.mrf.mxu1 }
 0x1a5   :  { %v1382_v27 = vpop.f32.mrf.mxu0 }
 0x1a6   :  { %v1671_v58 = vpop.f32.mrf.mxu1 }
 0x1a7   :  { %v1672_v23 = vadd.f32 %v1671_v58, %v1382_v27  ;;  %v1384_v29 = vpop.f32.mrf.mxu0 }
 0x1a8   :  { %v1673_v56 = vpop.f32.mrf.mxu1 }
 0x1a9   :  { %v1978_v24 = vpack.c.bf16 %v1672_v23, %v1669_v62  ;;  %v1387_v0 = vpop.f32.mrf.mxu0  ;;  %4474 = vmatmul.mubr.bf16.gmra.mxu0 %v4833_v57 }
 0x1aa   :  { %v1676_v2 = vpop.f32.mrf.mxu1  ;;  %4477 = vmatprep.mubr.bf16.mxu0 %v4834_v61 }
 0x1ab   :  { %4541 = vmatprep.mubr.bf16.mxu1 %v1978_v24  ;;  %v1389_v3 = vpop.f32.mrf.mxu0  ;;  %v1677_v53 = vadd.f32 %v1676_v2, %v1387_v0 }
 0x1ac   :  { %v1678_v39 = vpop.f32.mrf.mxu1 }
 0x1ad   :  { %v1390_v41 = vpop.f32.mrf.mxu0 }
 0x1ae   :  { %v1679_v5 = vpop.f32.mrf.mxu1 }
 0x1af   :  { %v1680_v6 = vadd.f32 %v1679_v5, %v1390_v41  ;;  %v1392_v9 = vpop.f32.mrf.mxu0 }
 0x1b0   :  { %v1681_v35 = vpop.f32.mrf.mxu1 }
 0x1b1   :  { %v1979_v36 = vpack.c.bf16 %v1680_v6, %v1677_v53  ;;  %v1395_v10 = vpop.f32.mrf.mxu0  ;;  %4478 = vmatmul.mubr.bf16.gmra.mxu0 %v4835_v4 }
 0x1b2   :  { %v1684_v12 = vpop.f32.mrf.mxu1  ;;  %4481 = vmatprep.mubr.bf16.mxu0 %v4836_v51 }
 0x1b3   :  { %4542 = vmatmul.mubr.bf16.gmra.mxu1 %v1979_v36  ;;  %v1397_v47 = vpop.f32.mrf.mxu0  ;;  %v1685_v1 = vadd.f32 %v1684_v12, %v1395_v10 }
 0x1b4   :  { %v1686_v48 = vpop.f32.mrf.mxu1 }
 0x1b5   :  { %v1398_v14 = vpop.f32.mrf.mxu0 }
 0x1b6   :  { %v1687_v63 = vpop.f32.mrf.mxu1 }
 0x1b7   :  { %v1688_v16 = vadd.f32 %v1687_v63, %v1398_v14  ;;  %v1400_v17 = vpop.f32.mrf.mxu0 }
 0x1b8   :  { %v1689_v11 = vpop.f32.mrf.mxu1 }
 0x1b9   :  { %v1980_v13 = vpack.c.bf16 %v1688_v16, %v1685_v1  ;;  %v1403_v18 = vpop.f32.mrf.mxu0  ;;  %4482 = vmatmul.mubr.bf16.gmra.mxu0 %v4837_v15 }
 0x1ba   :  { %v1692_v21 = vpop.f32.mrf.mxu1 }
 0x1bb   :  { %4545 = vmatprep.mubr.bf16.mxu1 %v1980_v13  ;;  %v1405_v59 = vpop.f32.mrf.mxu0  ;;  %v1693_v7 = vadd.f32 %v1692_v21, %v1403_v18 }
 0x1bc   :  { %v1694_v60 = vpop.f32.mrf.mxu1 }
 0x1bd   :  { %v1406_v22 = vpop.f32.mrf.mxu0 }
 0x1be   :  { %v1695_v26 = vpop.f32.mrf.mxu1 }
 0x1bf   :  { %v1696_v8 = vadd.f32 %v1695_v26, %v1406_v22  ;;  %v1408_v30 = vpop.f32.mrf.mxu0 }
 0x1c0   :  { %v1697_v31 = vpop.f32.mrf.mxu1 }
 0x1c1   :  { %v1981_v32 = vpack.c.bf16 %v1696_v8, %v1693_v7  ;;  %v1411_v33 = vpop.f32.mrf.mxu0 }
 0x1c2   :  { %v1700_v25 = vpop.f32.mrf.mxu1 }
 0x1c3   :  { %4546 = vmatmul.mubr.bf16.gmra.mxu1 %v1981_v32  ;;  %v1413_v28 = vpop.f32.mrf.mxu0  ;;  %v1701_v43 = vadd.f32 %v1700_v25, %v1411_v33 }
 0x1c4   :  { %v1702_v34 = vpop.f32.mrf.mxu1 }
 0x1c5   :  { %v1414_v40 = vpop.f32.mrf.mxu0 }
 0x1c6   :  { %v1703_v42 = vpop.f32.mrf.mxu1 }
 0x1c7   :  { %v1704_v19 = vadd.f32 %v1703_v42, %v1414_v40  ;;  %v1416_v20 = vpop.f32.mrf.mxu0 }
 0x1c8   :  { %v1705_v44 = vpop.f32.mrf.mxu1 }
 0x1c9   :  { %v1982_v45 = vpack.c.bf16 %v1704_v19, %v1701_v43  ;;  %v1419_v46 = vpop.f32.mrf.mxu0 }
 0x1ca   :  { %v1708_v37 = vpop.f32.mrf.mxu1 }
 0x1cb   :  { %4549 = vmatprep.mubr.bf16.mxu1 %v1982_v45  ;;  %v1421_v38 = vpop.f32.mrf.mxu0  ;;  %v1709_v54 = vadd.f32 %v1708_v37, %v1419_v46 }
 0x1cc   :  { %v1710_v49 = vpop.f32.mrf.mxu1 }
 0x1cd   :  { %v1422_v50 = vpop.f32.mrf.mxu0 }
 0x1ce   :  { %v1711_v52 = vpop.f32.mrf.mxu1 }
 0x1cf   :  { %v1712_v55 = vadd.f32 %v1711_v52, %v1422_v50  ;;  %v1424_v27 = vpop.f32.mrf.mxu0 }
 0x1d0   :  { %v1713_v57 = vpop.f32.mrf.mxu1 }
 0x1d1   :  { %v1983_v58 = vpack.c.bf16 %v1712_v55, %v1709_v54  ;;  %v1427_v61 = vpop.f32.mrf.mxu0 }
 0x1d2   :  { %v1716_v62 = vpop.f32.mrf.mxu1 }
 0x1d3   :  { %4550 = vmatmul.mubr.bf16.gmra.mxu1 %v1983_v58  ;;  %v1429_v23 = vpop.f32.mrf.mxu0  ;;  %v1717_v0 = vadd.f32 %v1716_v62, %v1427_v61 }
 0x1d4   :  { %v1718_v29 = vpop.f32.mrf.mxu1 }
 0x1d5   :  { %v1430_v56 = vpop.f32.mrf.mxu0 }
 0x1d6   :  { %v1719_v24 = vpop.f32.mrf.mxu1 }
 0x1d7   :  { %v1720_v2 = vadd.f32 %v1719_v24, %v1430_v56  ;;  %v1432_v3 = vpop.f32.mrf.mxu0  ;;  %v5746_v56 = vld [vmem:[%s6232_s5] ss:$0 sm:$0xff] }
 0x1d8   :  { %v1721_v39 = vpop.f32.mrf.mxu1 }
 0x1d9   :  { %v1984_v41 = vpack.c.bf16 %v1720_v2, %v1717_v0  ;;  %v1435_v4 = vpop.f32.mrf.mxu0 }
 0x1da   :  { %v1724_v5 = vpop.f32.mrf.mxu1 }
 0x1db   :  { %4553 = vmatprep.mubr.bf16.mxu1 %v1984_v41  ;;  %v1437_v51 = vpop.f32.mrf.mxu0  ;;  %v1725_v35 = vadd.f32 %v1724_v5, %v1435_v4 }
 0x1dc   :  { %v1726_v53 = vpop.f32.mrf.mxu1 }
 0x1dd   :  { %v1438_v6 = vpop.f32.mrf.mxu0 }
 0x1de   :  { %v1727_v9 = vpop.f32.mrf.mxu1 }
 0x1df   :  { %v1728_v36 = vadd.f32 %v1727_v9, %v1438_v6  ;;  %v1440_v10 = vpop.f32.mrf.mxu0 }
 0x1e0   :  { %v1729_v12 = vpop.f32.mrf.mxu1 }
 0x1e1   :  { %v1985_v47 = vpack.c.bf16 %v1728_v36, %v1725_v35  ;;  %v1443_v48 = vpop.f32.mrf.mxu0 }
 0x1e2   :  { %v1732_v14 = vpop.f32.mrf.mxu1 }
 0x1e3   :  { %4554 = vmatmul.mubr.bf16.gmra.mxu1 %v1985_v47  ;;  %v1445_v15 = vpop.f32.mrf.mxu0  ;;  %v1733_v17 = vadd.f32 %v1732_v14, %v1443_v48 }
 0x1e4   :  { %v1734_v63 = vpop.f32.mrf.mxu1 }
 0x1e5   :  { %v1446_v1 = vpop.f32.mrf.mxu0 }
 0x1e6   :  { %v1735_v16 = vpop.f32.mrf.mxu1 }
 0x1e7   :  { %v1736_v11 = vadd.f32 %v1735_v16, %v1446_v1  ;;  %v1448_v13 = vpop.f32.mrf.mxu0 }
 0x1e8   :  { %v1737_v18 = vpop.f32.mrf.mxu1 }
 0x1e9   :  { %v1986_v21 = vpack.c.bf16 %v1736_v11, %v1733_v17  ;;  %v1451_v59 = vpop.f32.mrf.mxu0 }
 0x1ea   :  { %v1740_v60 = vpop.f32.mrf.mxu1 }
 0x1eb   :  { %4557 = vmatprep.mubr.bf16.mxu1 %v1986_v21  ;;  %v1453_v22 = vpop.f32.mrf.mxu0  ;;  %v1741_v30 = vadd.f32 %v1740_v60, %v1451_v59 }
 0x1ec   :  { %v1742_v26 = vpop.f32.mrf.mxu1 }
 0x1ed   :  { %v1454_v7 = vpop.f32.mrf.mxu0 }
 0x1ee   :  { %v1743_v8 = vpop.f32.mrf.mxu1 }
 0x1ef   :  { %v1744_v31 = vadd.f32 %v1743_v8, %v1454_v7  ;;  %v1456_v32 = vpop.f32.mrf.mxu0 }
 0x1f0   :  { %v1745_v33 = vpop.f32.mrf.mxu1 }
 0x1f1   :  { %v1987_v25 = vpack.c.bf16 %v1744_v31, %v1741_v30  ;;  %v1459_v28 = vpop.f32.mrf.mxu0 }
 0x1f2   :  { %v1748_v34 = vpop.f32.mrf.mxu1 }
 0x1f3   :  { %4558 = vmatmul.mubr.bf16.gmra.mxu1 %v1987_v25  ;;  %v1461_v40 = vpop.f32.mrf.mxu0  ;;  %v1749_v20 = vadd.f32 %v1748_v34, %v1459_v28 }
 0x1f4   :  { %v1750_v42 = vpop.f32.mrf.mxu1 }
 0x1f5   :  { %v1462_v43 = vpop.f32.mrf.mxu0 }
 0x1f6   :  { %v1751_v19 = vpop.f32.mrf.mxu1 }
 0x1f7   :  { %v1752_v44 = vadd.f32 %v1751_v19, %v1462_v43  ;;  %v1464_v45 = vpop.f32.mrf.mxu0 }
 0x1f8   :  { %v1753_v46 = vpop.f32.mrf.mxu1 }
 0x1f9   :  { %v1988_v37 = vpack.c.bf16 %v1752_v44, %v1749_v20  ;;  %v1467_v38 = vpop.f32.mrf.mxu0 }
 0x1fa   :  { %v1756_v49 = vpop.f32.mrf.mxu1 }
 0x1fb   :  { %4561 = vmatprep.mubr.bf16.mxu1 %v1988_v37  ;;  %v1469_v50 = vpop.f32.mrf.mxu0  ;;  %v1757_v27 = vadd.f32 %v1756_v49, %v1467_v38 }
 0x1fc   :  { %v1758_v52 = vpop.f32.mrf.mxu1 }
 0x1fd   :  { %v1470_v54 = vpop.f32.mrf.mxu0 }
 0x1fe   :  { %v1759_v55 = vpop.f32.mrf.mxu1 }
 0x1ff   :  { %v1760_v57 = vadd.f32 %v1759_v55, %v1470_v54  ;;  %v1472_v58 = vpop.f32.mrf.mxu0 }
 0x200   :  { %v1761_v61 = vpop.f32.mrf.mxu1 }
 0x201   :  { %v1989_v62 = vpack.c.bf16 %v1760_v57, %v1757_v27  ;;  %v4423_v23 = vpop.f32.mrf.mxu0 }
 0x202   :  { %v4503_v29 = vpop.f32.mrf.mxu1 }
 0x203   :  { %v2706_v24 = vadd.f32 %v4503_v29, %v4423_v23  ;;  %4562 = vmatmul.mubr.bf16.gmra.mxu1 %v1989_v62  ;;  %v2360_v0 = vpop.f32.mrf.mxu0 }
 0x204   :  { %v2697_v2 = vpop.f32.mrf.mxu1 }
 0x205   :  { %v2698_v3 = vadd.f32 %v2697_v2, %v2360_v0  ;;  %v4424_v39 = vpop.f32.mrf.mxu0  ;;  %v5749_v41 = vadd.f32 %v5746_v56, %v2706_v24 }
 0x206   :  { %v4504_v4 = vpop.f32.mrf.mxu1 }
 0x207   :  { %v2709_v5 = vadd.f32 %v4504_v4, %v4424_v39  ;;  %v2363_v51 = vpop.f32.mrf.mxu0  ;;  %v3025_v53 = vmul.f32 %v5749_v41, %v5749_v41  ;;  %v5754_v6 = vadd.f32 %v5746_v56, %v2698_v3 }
 0x208   :  { %v2700_v9 = vpop.f32.mrf.mxu1 }
 0x209   :  { %v5757_v35 = vadd.f32 %v5746_v56, %v2709_v5  ;;  %v2701_v36 = vadd.f32 %v2700_v9, %v2363_v51  ;;  %3091 = vadd.xlane.f32.xlu1 %v3025_v53  ;;  %v4427_v10 = vpop.f32.mrf.mxu0  ;;  %v3023_v12 = vmul.f32 %v5754_v6, %v5754_v6 }
 0x20a   :  { %v4507_v47 = vpop.f32.mrf.mxu1 }
 0x20b   :  { %v5762_v48 = vadd.f32 %v5746_v56, %v2701_v36  ;;  %v2722_v14 = vadd.f32 %v4507_v47, %v4427_v10  ;;  %3087 = vadd.xlane.f32.xlu0 %v3023_v12  ;;  %v2376_v15 = vpop.f32.mrf.mxu0  ;;  %v3026_v63 = vmul.f32 %v5757_v35, %v5757_v35 }
 0x20c   :  { %v2713_v1 = vpop.f32.mrf.mxu1 }
 0x20d   :  { %v5767_v16 = vadd.f32 %v5746_v56, %v2722_v14  ;;  %v2714_v17 = vadd.f32 %v2713_v1, %v2376_v15  ;;  %3093 = vadd.xlane.f32.xlu1 %v3026_v63  ;;  %v4428_v11 = vpop.f32.mrf.mxu0  ;;  %v3024_v13 = vmul.f32 %v5762_v48, %v5762_v48 }
 0x20e   :  { %v4508_v18 = vpop.f32.mrf.mxu1 }
 0x20f   :  { %v2725_v21 = vadd.f32 %v4508_v18, %v4428_v11  ;;  %3089 = vadd.xlane.f32.xlu0 %v3024_v13  ;;  %v2379_v59 = vpop.f32.mrf.mxu0  ;;  %v5772_v22 = vadd.f32 %v5746_v56, %v2714_v17  ;;  %v3029_v30 = vmul.f32 %v5767_v16, %v5767_v16 }
 0x210   :  { %v2716_v60 = vpop.f32.mrf.mxu1 }
 0x211   :  { %v5775_v26 = vadd.f32 %v5746_v56, %v2725_v21  ;;  %v2717_v7 = vadd.f32 %v2716_v60, %v2379_v59  ;;  %v4431_v8 = vpop.f32.mrf.mxu0  ;;  %v3027_v19 = vmul.f32 %v5772_v22, %v5772_v22 }
 0x212   :  { %v4511_v31 = vpop.f32.mrf.mxu1 }
 0x213   :  { %v5780_v32 = vadd.f32 %v5746_v56, %v2717_v7  ;;  %v2738_v33 = vadd.f32 %v4511_v31, %v4431_v8  ;;  %3099 = vadd.xlane.f32.xlu0 %v3029_v30  ;;  %v2392_v25 = vpop.f32.mrf.mxu0  ;;  %v3030_v28 = vmul.f32 %v5775_v26, %v5775_v26 }
 0x214   :  { %v2729_v34 = vpop.f32.mrf.mxu1 }
 0x215   :  { %v5785_v40 = vadd.f32 %v5746_v56, %v2738_v33  ;;  %v2730_v42 = vadd.f32 %v2729_v34, %v2392_v25  ;;  %3101 = vadd.xlane.f32.xlu1 %v3030_v28  ;;  %v4432_v43 = vpop.f32.mrf.mxu0  ;;  %v3028_v46 = vmul.f32 %v5780_v32, %v5780_v32 }
 0x216   :  { %v4512_v20 = vpop.f32.mrf.mxu1 }
 0x217   :  { %v2741_v44 = vadd.f32 %v4512_v20, %v4432_v43  ;;  %3095 = vadd.xlane.f32.xlu0 %v3027_v19  ;;  %v2395_v45 = vpop.f32.mrf.mxu0  ;;  %v5792_v38 = vadd.f32 %v5746_v56, %v2730_v42  ;;  %v3033_v54 = vmul.f32 %v5785_v40, %v5785_v40 }
 0x218   :  { %v2732_v37 = vpop.f32.mrf.mxu1 }
 0x219   :  { %v5795_v49 = vadd.f32 %v5746_v56, %v2741_v44  ;;  %v2733_v50 = vadd.f32 %v2732_v37, %v2395_v45  ;;  %3097 = vadd.xlane.f32.xlu1 %v3028_v46  ;;  %v4435_v52 = vpop.f32.mrf.mxu0  ;;  %v3031_v0 = vmul.f32 %v5792_v38, %v5792_v38 }
 0x21a   :  { %v4515_v55 = vpop.f32.mrf.mxu1 }
 0x21b   :  { %v5800_v27 = vadd.f32 %v5746_v56, %v2733_v50  ;;  %v2754_v57 = vadd.f32 %v4515_v55, %v4435_v52  ;;  %3107 = vadd.xlane.f32.xlu0 %v3033_v54  ;;  %v2408_v58 = vpop.f32.mrf.mxu0  ;;  %v3034_v61 = vmul.f32 %v5795_v49, %v5795_v49 }
 0x21c   :  { %v2745_v62 = vpop.f32.mrf.mxu1 }
 0x21d   :  { %v5805_v23 = vadd.f32 %v5746_v56, %v2754_v57  ;;  %v2746_v29 = vadd.f32 %v2745_v62, %v2408_v58  ;;  %3109 = vadd.xlane.f32.xlu1 %v3034_v61  ;;  %v4436_v24 = vpop.f32.mrf.mxu0  ;;  %v3032_v4 = vmul.f32 %v5800_v27, %v5800_v27 }
 0x21e   :  { %v4516_v2 = vpop.f32.mrf.mxu1 }
 0x21f   :  { %v2757_v3 = vadd.f32 %v4516_v2, %v4436_v24  ;;  %3103 = vadd.xlane.f32.xlu0 %v3031_v0  ;;  %v2411_v39 = vpop.f32.mrf.mxu0  ;;  %v5812_v51 = vadd.f32 %v5746_v56, %v2746_v29  ;;  %v3037_v10 = vmul.f32 %v5805_v23, %v5805_v23 }
 0x220   :  { %v2748_v5 = vpop.f32.mrf.mxu1 }
 0x221   :  { %v5815_v53 = vadd.f32 %v5746_v56, %v2757_v3  ;;  %v2749_v9 = vadd.f32 %v2748_v5, %v2411_v39  ;;  %3105 = vadd.xlane.f32.xlu1 %v3032_v4  ;;  %v4439_v36 = vpop.f32.mrf.mxu0  ;;  %v3035_v18 = vmul.f32 %v5812_v51, %v5812_v51 }
 0x222   :  { %v4519_v12 = vpop.f32.mrf.mxu1 }
 0x223   :  { %v5820_v47 = vadd.f32 %v5746_v56, %v2749_v9  ;;  %v2770_v14 = vadd.f32 %v4519_v12, %v4439_v36  ;;  %3115 = vadd.xlane.f32.xlu0 %v3037_v10  ;;  %v2424_v15 = vpop.f32.mrf.mxu0  ;;  %v3038_v63 = vmul.f32 %v5815_v53, %v5815_v53 }
 0x224   :  { %v2761_v1 = vpop.f32.mrf.mxu1 }
 0x225   :  { %v5825_v17 = vadd.f32 %v5746_v56, %v2770_v14  ;;  %v2762_v11 = vadd.f32 %v2761_v1, %v2424_v15  ;;  %3117 = vadd.xlane.f32.xlu1 %v3038_v63  ;;  %v4440_v13 = vpop.f32.mrf.mxu0  ;;  %v3036_v7 = vmul.f32 %v5820_v47, %v5820_v47 }
 0x226   :  { %v4520_v21 = vpop.f32.mrf.mxu1 }
 0x227   :  { %v2773_v59 = vadd.f32 %v4520_v21, %v4440_v13  ;;  %3111 = vadd.xlane.f32.xlu0 %v3035_v18  ;;  %v2427_v60 = vpop.f32.mrf.mxu0  ;;  %v5832_v30 = vadd.f32 %v5746_v56, %v2762_v11  ;;  %v3041_v28 = vmul.f32 %v5825_v17, %v5825_v17 }
 0x228   :  { %v2764_v8 = vpop.f32.mrf.mxu1 }
 0x229   :  { %v5835_v31 = vadd.f32 %v5746_v56, %v2773_v59  ;;  %v2765_v33 = vadd.f32 %v2764_v8, %v2427_v60  ;;  %3113 = vadd.xlane.f32.xlu1 %v3036_v7  ;;  %v4443_v25 = vpop.f32.mrf.mxu0  ;;  %v3039_v50 = vmul.f32 %v5832_v30, %v5832_v30 }
 0x22a   :  { %v4523_v34 = vpop.f32.mrf.mxu1 }
 0x22b   :  { %v5840_v42 = vadd.f32 %v5746_v56, %v2765_v33  ;;  %v2786_v43 = vadd.f32 %v4523_v34, %v4443_v25  ;;  %3123 = vadd.xlane.f32.xlu0 %v3041_v28  ;;  %v2440_v19 = vpop.f32.mrf.mxu0  ;;  %v3042_v20 = vmul.f32 %v5835_v31, %v5835_v31 }
 0x22c   :  { %v2777_v44 = vpop.f32.mrf.mxu1 }
 0x22d   :  { %v5845_v45 = vadd.f32 %v5746_v56, %v2786_v43  ;;  %v2778_v46 = vadd.f32 %v2777_v44, %v2440_v19  ;;  %3125 = vadd.xlane.f32.xlu1 %v3042_v20  ;;  %v4444_v37 = vpop.f32.mrf.mxu0  ;;  %v3040_v57 = vmul.f32 %v5840_v42, %v5840_v42 }
 0x22e   :  { %v4524_v52 = vpop.f32.mrf.mxu1 }
 0x22f   :  { %v2789_v54 = vadd.f32 %v4524_v52, %v4444_v37  ;;  %3119 = vadd.xlane.f32.xlu0 %v3039_v50  ;;  %v2443_v55 = vpop.f32.mrf.mxu0  ;;  %v5852_v61 = vadd.f32 %v5746_v56, %v2778_v46  ;;  %v3045_v24 = vmul.f32 %v5845_v45, %v5845_v45 }
 0x230   :  { %v2780_v58 = vpop.f32.mrf.mxu1 }
 0x231   :  { %v5855_v62 = vadd.f32 %v5746_v56, %v2789_v54  ;;  %v2781_v29 = vadd.f32 %v2780_v58, %v2443_v55  ;;  %3121 = vadd.xlane.f32.xlu1 %v3040_v57  ;;  %v4447_v0 = vpop.f32.mrf.mxu0  ;;  %v3043_v36 = vmul.f32 %v5852_v61, %v5852_v61 }
 0x233   :  { %v5860_v2 = vadd.f32 %v5746_v56, %v2781_v29  ;;  %v4527_v3 = vpop.f32.mrf.mxu1  ;;  %3131 = vadd.xlane.f32.xlu0 %v3045_v24  ;;  %v3046_v39 = vmul.f32 %v5855_v62, %v5855_v62  ;;  %v2456_v4 = vpop.f32.mrf.mxu0 }
 0x234   :  { %v2802_v5 = vadd.f32 %v4527_v3, %v4447_v0 }
 0x235   :  { %v2793_v9 = vpop.f32.mrf.mxu1  ;;  %3133 = vadd.xlane.f32.xlu1 %v3046_v39  ;;  %v4448_v10 = vpop.f32.mrf.mxu0  ;;  %v3044_v63 = vmul.f32 %v5860_v2, %v5860_v2 }
 0x236   :  { %v5867_v12 = vadd.f32 %v5746_v56, %v2802_v5  ;;  %v2794_v14 = vadd.f32 %v2793_v9, %v2456_v4 }
 0x237   :  { %v4528_v15 = vpop.f32.mrf.mxu1  ;;  %3127 = vadd.xlane.f32.xlu0 %v3043_v36  ;;  %v2459_v1 = vpop.f32.mrf.mxu0 }
 0x238   :  { %v2805_v11 = vadd.f32 %v4528_v15, %v4448_v10  ;;  %v3049_v13 = vmul.f32 %v5867_v12, %v5867_v12  ;;  %v5874_v18 = vadd.f32 %v5746_v56, %v2794_v14 }
 0x239   :  { %v2796_v21 = vpop.f32.mrf.mxu1  ;;  %3129 = vadd.xlane.f32.xlu1 %v3044_v63  ;;  %v4451_v7 = vpop.f32.mrf.mxu0 }
 0x23a   :  { %v5877_v59 = vadd.f32 %v5746_v56, %v2805_v11  ;;  %v2797_v60 = vadd.f32 %v2796_v21, %v2459_v1  ;;  %v3047_v25 = vmul.f32 %v5874_v18, %v5874_v18 }
 0x23b   :  { %3139 = vadd.xlane.f32.xlu0 %v3049_v13  ;;  %v2472_v28 = vpop.f32.mrf.mxu0 }
 0x23c   :  { %v5880_v8 = vadd.f32 %v5746_v56, %v2797_v60  ;;  %v3050_v33 = vmul.f32 %v5877_v59, %v5877_v59 }
 0x23d   :  { %v4452_v19 = vpop.f32.mrf.mxu0 }
 0x23e   :  { %3141 = vadd.xlane.f32.xlu1 %v3050_v33  ;;  %v3048_v34 = vmul.f32 %v5880_v8, %v5880_v8 }
 0x23f   :  { %3135 = vadd.xlane.f32.xlu0 %v3047_v25  ;;  %v2475_v52 = vpop.f32.mrf.mxu0 }
 0x241   :  { %v4455_v0 = vpop.f32.mrf.mxu0 }
 0x242   :  { %3137 = vadd.xlane.f32.xlu1 %v3048_v34 }
 0x243   :  { %v4531_v43 = vpop.f32.mrf.mxu1  ;;  %v2488_v5 = vpop.f32.mrf.mxu0 }
 0x244   :  { %v2818_v20 = vadd.f32 %v4531_v43, %v4451_v7 }
 0x245   :  { %v2809_v44 = vpop.f32.mrf.mxu1  ;;  %v4456_v10 = vpop.f32.mrf.mxu0 }
 0x246   :  { %v5889_v46 = vadd.f32 %v5746_v56, %v2818_v20  ;;  %v2810_v37 = vadd.f32 %v2809_v44, %v2472_v28 }
 0x247   :  { %v4532_v50 = vpop.f32.mrf.mxu1  ;;  %v2491_v13 = vpop.f32.mrf.mxu0 }
 0x248   :  { %v5892_v54 = vadd.f32 %v5746_v56, %v2810_v37  ;;  %v2821_v55 = vadd.f32 %v4532_v50, %v4452_v19  ;;  %v3053_v57 = vmul.f32 %v5889_v46, %v5889_v46 }
 0x249   :  { %v2812_v58 = vpop.f32.mrf.mxu1  ;;  %v4459_v34 = vpop.f32.mrf.mxu0 }
 0x24a   :  { %v5897_v29 = vadd.f32 %v5746_v56, %v2821_v55  ;;  %v2813_v24 = vadd.f32 %v2812_v58, %v2475_v52  ;;  %3147 = vadd.xlane.f32.xlu0 %v3053_v57  ;;  %v3051_v39 = vmul.f32 %v5892_v54, %v5892_v54 }
 0x24b   :  { %v2504_v44 = vpop.f32.mrf.mxu0 }
 0x24c   :  { %v5900_v3 = vadd.f32 %v5746_v56, %v2813_v24  ;;  %v3054_v4 = vmul.f32 %v5897_v29, %v5897_v29 }
 0x24d   :  { %v4460_v52 = vpop.f32.mrf.mxu0 }
 0x24e   :  { %3143 = vadd.xlane.f32.xlu0 %v3051_v39  ;;  %3149 = vadd.xlane.f32.xlu1 %v3054_v4  ;;  %v3052_v9 = vmul.f32 %v5900_v3, %v5900_v3 }
 0x24f   :  { %v2507_v39 = vpop.f32.mrf.mxu0 }
 0x252   :  { %3145 = vadd.xlane.f32.xlu1 %v3052_v9 }
 0x253   :  { %v4535_v36 = vpop.f32.mrf.mxu1 }
 0x254   :  { %v2834_v14 = vadd.f32 %v4535_v36, %v4455_v0 }
 0x255   :  { %v2825_v15 = vpop.f32.mrf.mxu1 }
 0x256   :  { %v5909_v63 = vadd.f32 %v5746_v56, %v2834_v14  ;;  %v2826_v1 = vadd.f32 %v2825_v15, %v2488_v5  ;;  %v4463_v15 = vpop.f32.mrf.mxu0 }
 0x257   :  { %v4536_v11 = vpop.f32.mrf.mxu1 }
 0x258   :  { %v5912_v21 = vadd.f32 %v5746_v56, %v2826_v1  ;;  %v2837_v60 = vadd.f32 %v4536_v11, %v4456_v10  ;;  %v3057_v7 = vmul.f32 %v5909_v63, %v5909_v63 }
 0x259   :  { %v2828_v33 = vpop.f32.mrf.mxu1 }
 0x25a   :  { %v5917_v25 = vadd.f32 %v5746_v56, %v2837_v60  ;;  %v2829_v28 = vadd.f32 %v2828_v33, %v2491_v13  ;;  %3155 = vadd.xlane.f32.xlu0 %v3057_v7  ;;  %v3055_v19 = vmul.f32 %v5912_v21, %v5912_v21  ;;  %v2520_v60 = vpop.f32.mrf.mxu0 }
 0x25c   :  { %v5920_v43 = vadd.f32 %v5746_v56, %v2829_v28  ;;  %v3058_v20 = vmul.f32 %v5917_v25, %v5917_v25  ;;  %v4464_v28 = vpop.f32.mrf.mxu0 }
 0x25e   :  { %3151 = vadd.xlane.f32.xlu0 %v3055_v19  ;;  %3157 = vadd.xlane.f32.xlu1 %v3058_v20  ;;  %v3056_v37 = vmul.f32 %v5920_v43, %v5920_v43 }
 0x262   :  { %3153 = vadd.xlane.f32.xlu1 %v3056_v37 }
 0x263   :  { %v4539_v50 = vpop.f32.mrf.mxu1 }
 0x264   :  { %v2850_v55 = vadd.f32 %v4539_v50, %v4459_v34  ;;  %v2523_v50 = vpop.f32.mrf.mxu0 }
 0x265   :  { %v2841_v57 = vpop.f32.mrf.mxu1 }
 0x266   :  { %v5929_v58 = vadd.f32 %v5746_v56, %v2850_v55  ;;  %v2842_v24 = vadd.f32 %v2841_v57, %v2504_v44 }
 0x267   :  { %v4540_v0 = vpop.f32.mrf.mxu1 }
 0x268   :  { %v5932_v4 = vadd.f32 %v5746_v56, %v2842_v24  ;;  %v2853_v5 = vadd.f32 %v4540_v0, %v4460_v52  ;;  %v3061_v9 = vmul.f32 %v5929_v58, %v5929_v58 }
 0x269   :  { %v2844_v36 = vpop.f32.mrf.mxu1 }
 0x26a   :  { %v5937_v10 = vadd.f32 %v5746_v56, %v2853_v5  ;;  %v2845_v14 = vadd.f32 %v2844_v36, %v2507_v39  ;;  %3163 = vadd.xlane.f32.xlu0 %v3061_v9  ;;  %v3059_v11 = vmul.f32 %v5932_v4, %v5932_v4  ;;  %v4467_v5 = vpop.f32.mrf.mxu0 }
 0x26c   :  { %v5940_v1 = vadd.f32 %v5746_v56, %v2845_v14  ;;  %v3062_v13 = vmul.f32 %v5937_v10, %v5937_v10 }
 0x26e   :  { %3159 = vadd.xlane.f32.xlu0 %v3059_v11  ;;  %3165 = vadd.xlane.f32.xlu1 %v3062_v13  ;;  %v3060_v7 = vmul.f32 %v5940_v1, %v5940_v1 }
 0x272   :  { %3161 = vadd.xlane.f32.xlu1 %v3060_v7 }
 0x273   :  { %v4543_v33 = vpop.f32.mrf.mxu1 }
 0x274   :  { %v2866_v34 = vadd.f32 %v4543_v33, %v4463_v15  ;;  %v2536_v15 = vpop.f32.mrf.mxu0 }
 0x275   :  { %v2857_v19 = vpop.f32.mrf.mxu1 }
 0x276   :  { %v5949_v20 = vadd.f32 %v5746_v56, %v2866_v34  ;;  %v2858_v44 = vadd.f32 %v2857_v19, %v2520_v60  ;;  %v4468_v60 = vpop.f32.mrf.mxu0 }
 0x277   :  { %v4544_v37 = vpop.f32.mrf.mxu1 }
 0x278   :  { %v5952_v52 = vadd.f32 %v5746_v56, %v2858_v44  ;;  %v2869_v55 = vadd.f32 %v4544_v37, %v4464_v28  ;;  %v3065_v57 = vmul.f32 %v5949_v20, %v5949_v20  ;;  %v2539_v44 = vpop.f32.mrf.mxu0 }
 0x279   :  { %v2860_v24 = vpop.f32.mrf.mxu1 }
 0x27a   :  { %6244 = vst [vmem:[#allocation3_spill] sm:$0xff] %v5952_v52  ;;  %v5957_v0 = vadd.f32 %v5746_v56, %v2869_v55  ;;  %v2861_v39 = vadd.f32 %v2860_v24, %v2523_v50  ;;  %3171 = vadd.xlane.f32.xlu0 %v3065_v57  ;;  %v3063_v36 = vmul.f32 %v5952_v52, %v5952_v52 }
 0x27c   :  { %v5960_v9 = vadd.f32 %v5746_v56, %v2861_v39  ;;  %v3066_v14 = vmul.f32 %v5957_v0, %v5957_v0 }
 0x27e   :  { %6245 = vst [vmem:[#allocation4_spill] sm:$0xff] %v5960_v9  ;;  %3167 = vadd.xlane.f32.xlu0 %v3063_v36  ;;  %3173 = vadd.xlane.f32.xlu1 %v3066_v14  ;;  %v3064_v11 = vmul.f32 %v5960_v9, %v5960_v9 }
 0x282   :  { %3169 = vadd.xlane.f32.xlu1 %v3064_v11 }
 0x283   :  { %v4547_v13 = vpop.f32.mrf.mxu1 }
 0x284   :  { %v2882_v7 = vadd.f32 %v4547_v13, %v4467_v5  ;;  %v4471_v5 = vpop.f32.mrf.mxu0 }
 0x285   :  { %v2873_v33 = vpop.f32.mrf.mxu1 }
 0x286   :  { %v5969_v28 = vadd.f32 %v5746_v56, %v2882_v7  ;;  %v2874_v34 = vadd.f32 %v2873_v33, %v2536_v15  ;;  %v2552_v11 = vpop.f32.mrf.mxu0 }
 0x287   :  { %v4548_v19 = vpop.f32.mrf.mxu1 }
 0x288   :  { %6246 = vst [vmem:[#allocation5_spill] sm:$0xff] %v5969_v28  ;;  %v5972_v37 = vadd.f32 %v5746_v56, %v2874_v34  ;;  %v2885_v50 = vadd.f32 %v4548_v19, %v4468_v60  ;;  %v3069_v55 = vmul.f32 %v5969_v28, %v5969_v28  ;;  %v4472_v34 = vpop.f32.mrf.mxu0 }
 0x289   :  { %v2876_v57 = vpop.f32.mrf.mxu1 }
 0x28a   :  { %6247 = vst [vmem:[#allocation6_spill] sm:$0xff] %v5972_v37  ;;  %v5977_v24 = vadd.f32 %v5746_v56, %v2885_v50  ;;  %v2877_v39 = vadd.f32 %v2876_v57, %v2539_v44  ;;  %3179 = vadd.xlane.f32.xlu0 %v3069_v55  ;;  %v3067_v14 = vmul.f32 %v5972_v37, %v5972_v37 }
 0x28c   :  { %6248 = vst [vmem:[#allocation7_spill] sm:$0xff] %v5977_v24  ;;  %v5980_v36 = vadd.f32 %v5746_v56, %v2877_v39  ;;  %v3070_v15 = vmul.f32 %v5977_v24, %v5977_v24  ;;  %v2555_v24 = vpop.f32.mrf.mxu0 }
 0x28e   :  { %6249 = vst [vmem:[#allocation8_spill] sm:$0xff] %v5980_v36  ;;  %3175 = vadd.xlane.f32.xlu0 %v3067_v14  ;;  %3181 = vadd.xlane.f32.xlu1 %v3070_v15  ;;  %v3068_v13 = vmul.f32 %v5980_v36, %v5980_v36 }
 0x292   :  { %v3092_v60 = vpop.xlane.xlu1 %3091  ;;  %3177 = vadd.xlane.f32.xlu1 %v3068_v13 }
 0x293   :  { %v3217_v7 = vmax.f32 %v3092_v60, 1e-24  ;;  %v4551_v33 = vpop.f32.mrf.mxu1 }
 0x294   :  { %v2898_v19 = vadd.f32 %v4551_v33, %v4471_v5  ;;  %v3088_v44 = vpop.xlane.xlu0 %3087 }
 0x295   :  { %4838 = vrsqrt.f32 %v3217_v7  ;;  %v3215_v50 = vmax.f32 %v3088_v44, 1e-24  ;;  %v2889_v55 = vpop.f32.mrf.mxu1  ;;  %v4475_v44 = vpop.f32.mrf.mxu0 }
 0x296   :  { %v5989_v57 = vadd.f32 %v5746_v56, %v2898_v19  ;;  %v2890_v39 = vadd.f32 %v2889_v55, %v2552_v11  ;;  %v3094_v14 = vpop.xlane.xlu1 %3093 }
 0x297   :  { %4840 = vrsqrt.f32 %v3215_v50  ;;  %v3218_v15 = vmax.f32 %v3094_v14, 1e-24  ;;  %v4552_v37 = vpop.f32.mrf.mxu1 }
 0x298   :  { %6250 = vst [vmem:[#allocation9_spill] sm:$0xff] %v5989_v57  ;;  %v5992_v36 = vadd.f32 %v5746_v56, %v2890_v39  ;;  %v2901_v13 = vadd.f32 %v4552_v37, %v4472_v34  ;;  %v3090_v60 = vpop.xlane.xlu0 %3089  ;;  %v3073_v5 = vmul.f32 %v5989_v57, %v5989_v57 }
 0x299   :  { %4842 = vrsqrt.f32 %v3218_v15  ;;  %v3216_v7 = vmax.f32 %v3090_v60, 1e-24  ;;  %v2892_v33 = vpop.f32.mrf.mxu1 }
 0x29a   :  { %6251 = vst [vmem:[#allocation10_spill] sm:$0xff] %v5992_v36  ;;  %v5997_v19 = vadd.f32 %v5746_v56, %v2901_v13  ;;  %v2893_v11 = vadd.f32 %v2892_v33, %v2555_v24  ;;  %3187 = vadd.xlane.f32.xlu0 %v3073_v5  ;;  %v3071_v37 = vmul.f32 %v5992_v36, %v5992_v36  ;;  %v2568_v24 = vpop.f32.mrf.mxu0 }
 0x29b   :  { %4844 = vrsqrt.f32 %v3216_v7 }
 0x29c   :  { %6252 = vst [vmem:[#allocation11_spill] sm:$0xff] %v5997_v19  ;;  %v6000_v50 = vadd.f32 %v5746_v56, %v2893_v11  ;;  %v3100_v55 = vpop.xlane.xlu0 %3099  ;;  %v3074_v34 = vmul.f32 %v5997_v19, %v5997_v19  ;;  %v4476_v19 = vpop.f32.mrf.mxu0 }
 0x29d   :  { %v3221_v39 = vmax.f32 %v3100_v55, 1e-24 }
 0x29e   :  { %6253 = vst [vmem:[#allocation12_spill] sm:$0xff] %v6000_v50  ;;  %v3102_v14 = vpop.xlane.xlu1 %3101  ;;  %3183 = vadd.xlane.f32.xlu0 %v3071_v37  ;;  %3189 = vadd.xlane.f32.xlu1 %v3074_v34  ;;  %v3072_v60 = vmul.f32 %v6000_v50, %v6000_v50  ;;  %v2571_v52 = vpop.f32.mrf.mxu0 }
 0x29f   :  { %4846 = vrsqrt.f32 %v3221_v39  ;;  %v3222_v15 = vmax.f32 %v3102_v14, 1e-24 }
 0x2a0   :  { %v3096_v13 = vpop.xlane.xlu0 %3095 }
 0x2a1   :  { %4848 = vrsqrt.f32 %v3222_v15  ;;  %v3219_v5 = vmax.f32 %v3096_v13, 1e-24 }
 0x2a2   :  { %v4839_v7 = vpop.eup %4838  ;;  %v3098_v33 = vpop.xlane.xlu1 %3097  ;;  %3185 = vadd.xlane.f32.xlu1 %v3072_v60 }
 0x2a3   :  { %4850 = vrsqrt.f32 %v3219_v5  ;;  %v3220_v11 = vmax.f32 %v3098_v33, 1e-24  ;;  %v4555_v36 = vpop.f32.mrf.mxu1  ;;  %v3345_v37 = vmul.f32 %v4839_v7, %v5749_v41 }
 0x2a4   :  { %v4841_v55 = vpop.eup %4840  ;;  %v2914_v34 = vadd.f32 %v4555_v36, %v4475_v44  ;;  %v3108_v39 = vpop.xlane.xlu0 %3107 }
 0x2a5   :  { %4852 = vrsqrt.f32 %v3220_v11  ;;  %v3225_v14 = vmax.f32 %v3108_v39, 1e-24  ;;  %v2905_v57 = vpop.f32.mrf.mxu1  ;;  %v3343_v50 = vmul.f32 %v4841_v55, %v5754_v6  ;;  %v3409_v36 = vmax.f32 %v3345_v37, 0.0 }
 0x2a6   :  { %v4843_v28 = vpop.eup %4842  ;;  %v6011_v15 = vadd.f32 %v5746_v56, %v2914_v34  ;;  %v2906_v13 = vadd.f32 %v2905_v57, %v2568_v24  ;;  %v3110_v60 = vpop.xlane.xlu1 %3109 }
 0x2a7   :  { %v3346_v5 = vmul.f32 %v4843_v28, %v5757_v35  ;;  %4854 = vrsqrt.f32 %v3225_v14  ;;  %v3226_v33 = vmax.f32 %v3110_v60, 1e-24  ;;  %v4556_v9 = vpop.f32.mrf.mxu1  ;;  %v3407_v28 = vmax.f32 %v3343_v50, 0.0 }
 0x2a8   :  { %v4845_v41 = vpop.eup %4844  ;;  %v6015_v44 = vadd.f32 %v5746_v56, %v2906_v13  ;;  %v2917_v7 = vadd.f32 %v4556_v9, %v4476_v19  ;;  %v3104_v11 = vpop.xlane.xlu0 %3103  ;;  %v3077_v6 = vmul.f32 %v6011_v15, %v6011_v15 }
 0x2a9   :  { %v3410_v55 = vmax.f32 %v3346_v5, 0.0  ;;  %v3344_v57 = vmul.f32 %v4845_v41, %v5762_v48  ;;  %4856 = vrsqrt.f32 %v3226_v33  ;;  %v3223_v24 = vmax.f32 %v3104_v11, 1e-24  ;;  %v2908_v35 = vpop.f32.mrf.mxu1  ;;  %v4479_v19 = vpop.f32.mrf.mxu0 }
 0x2aa   :  { %v6021_v34 = vadd.f32 %v5746_v56, %v2917_v7  ;;  %v2909_v39 = vadd.f32 %v2908_v35, %v2571_v52  ;;  %v3106_v37 = vpop.xlane.xlu1 %3105  ;;  %3195 = vadd.xlane.f32.xlu0 %v3077_v6  ;;  %v3075_v33 = vmul.f32 %v6015_v44, %v6015_v44 }
 0x2ab   :  { %v4142_v14 = vpack.c.bf16 %v3410_v55, %v3409_v36  ;;  %v3408_v13 = vmax.f32 %v3344_v57, 0.0  ;;  %4858 = vrsqrt.f32 %v3223_v24  ;;  %v3224_v9 = vmax.f32 %v3106_v37, 1e-24  ;;  %v2584_v57 = vpop.f32.mrf.mxu0 }
 0x2ac   :  { %v4847_v60 = vpop.eup %4846  ;;  %v6024_v5 = vadd.f32 %v5746_v56, %v2909_v39  ;;  %v3116_v48 = vpop.xlane.xlu0 %3115  ;;  %v3078_v50 = vmul.f32 %v6021_v34, %v6021_v34 }
 0x2ad   :  { %4294 = vst [vmem:[%s6233_s6 + $0x8] sm:$0xff] %v4142_v14   ;;  %v4137_v52 = vpack.c.bf16 %v3408_v13, %v3407_v28  ;;  %v3349_v41 = vmul.f32 %v4847_v60, %v5767_v16  ;;  %4860 = vrsqrt.f32 %v3224_v9  ;;  %v3229_v36 = vmax.f32 %v3116_v48, 1e-24 }
 0x2ae   :  { %v4849_v7 = vpop.eup %4848  ;;  %v3118_v11 = vpop.xlane.xlu1 %3117  ;;  %3191 = vadd.xlane.f32.xlu0 %v3075_v33  ;;  %3197 = vadd.xlane.f32.xlu1 %v3078_v50  ;;  %v3076_v16 = vmul.f32 %v6024_v5, %v6024_v5 }
 0x2af   :  { %4138 = vst [vmem:[%s6233_s6] sm:$0xff] %v4137_v52   ;;  %v3350_v6 = vmul.f32 %v4849_v7, %v5775_v26  ;;  %4862 = vrsqrt.f32 %v3229_v36  ;;  %v3230_v55 = vmax.f32 %v3118_v11, 1e-24  ;;  %v3413_v35 = vmax.f32 %v3349_v41, 0.0  ;;  %v4480_v33 = vpop.f32.mrf.mxu0 }
 0x2b0   :  { %v4851_v24 = vpop.eup %4850  ;;  %v3112_v28 = vpop.xlane.xlu0 %3111 }
 0x2b1   :  { %v3414_v39 = vmax.f32 %v3350_v6, 0.0  ;;  %v3347_v37 = vmul.f32 %v4851_v24, %v5772_v22  ;;  %4864 = vrsqrt.f32 %v3230_v55  ;;  %v3227_v14 = vmax.f32 %v3112_v28, 1e-24 }
 0x2b2   :  { %v4853_v13 = vpop.eup %4852  ;;  %v3114_v9 = vpop.xlane.xlu1 %3113  ;;  %3193 = vadd.xlane.f32.xlu1 %v3076_v16 }
 0x2b3   :  { %v4152_v60 = vpack.c.bf16 %v3414_v39, %v3413_v35  ;;  %v3348_v26 = vmul.f32 %v4853_v13, %v5780_v32  ;;  %4866 = vrsqrt.f32 %v3227_v14  ;;  %v4559_v48 = vpop.f32.mrf.mxu1  ;;  %v3228_v52 = vmax.f32 %v3114_v9, 1e-24  ;;  %v2587_v14 = vpop.f32.mrf.mxu0 }
 0x2b4   :  { %v4855_v50 = vpop.eup %4854  ;;  %v2930_v41 = vadd.f32 %v4559_v48, %v4479_v19  ;;  %v3124_v36 = vpop.xlane.xlu0 %3123  ;;  %v3411_v22 = vmax.f32 %v3347_v37, 0.0 }
 0x2b5   :  { %4296 = vst [vmem:[%s6233_s6 + $0x18] sm:$0xff] %v4152_v60   ;;  %v3412_v7 = vmax.f32 %v3348_v26, 0.0  ;;  %v3353_v11 = vmul.f32 %v4855_v50, %v5785_v40  ;;  %v3233_v6 = vmax.f32 %v3124_v36, 1e-24  ;;  %v2921_v55 = vpop.f32.mrf.mxu1  ;;  %4868 = vrsqrt.f32 %v3228_v52 }
 0x2b6   :  { %v4857_v24 = vpop.eup %4856  ;;  %v6047_v32 = vadd.f32 %v5746_v56, %v2930_v41  ;;  %v2922_v35 = vadd.f32 %v2921_v55, %v2584_v57  ;;  %v3126_v28 = vpop.xlane.xlu1 %3125 }
 0x2b7   :  { %v4147_v16 = vpack.c.bf16 %v3412_v7, %v3411_v22  ;;  %v3354_v19 = vmul.f32 %v4857_v24, %v5795_v49  ;;  %4870 = vrsqrt.f32 %v3233_v6  ;;  %v4560_v39 = vpop.f32.mrf.mxu1  ;;  %v3234_v40 = vmax.f32 %v3126_v28, 1e-24 }
 0x2b8   :  { %v4859_v13 = vpop.eup %4858  ;;  %v6051_v37 = vadd.f32 %v5746_v56, %v2922_v35  ;;  %v2933_v9 = vadd.f32 %v4560_v39, %v4480_v33  ;;  %v3120_v60 = vpop.xlane.xlu0 %3119  ;;  %v3081_v26 = vmul.f32 %v6047_v32, %v6047_v32  ;;  %v3417_v57 = vmax.f32 %v3353_v11, 0.0 }
 0x2b9   :  { %4295 = vst [vmem:[%s6233_s6 + $0x10] sm:$0xff] %v4147_v16   ;;  %v3418_v48 = vmax.f32 %v3354_v19, 0.0  ;;  %v3351_v49 = vmul.f32 %v4859_v13, %v5792_v38  ;;  %v3231_v50 = vmax.f32 %v3120_v60, 1e-24  ;;  %v2924_v52 = vpop.f32.mrf.mxu1  ;;  %4872 = vrsqrt.f32 %v3234_v40 }
 0x2ba   :  { %v4861_v41 = vpop.eup %4860  ;;  %v6060_v36 = vadd.f32 %v5746_v56, %v2933_v9  ;;  %v2925_v33 = vadd.f32 %v2924_v52, %v2587_v14  ;;  %v3122_v22 = vpop.xlane.xlu1 %3121  ;;  %3203 = vadd.xlane.f32.xlu0 %v3081_v26  ;;  %v3079_v35 = vmul.f32 %v6051_v37, %v6051_v37 }
 0x2bb   :  { %v4162_v7 = vpack.c.bf16 %v3418_v48, %v3417_v57  ;;  %v3352_v6 = vmul.f32 %v4861_v41, %v5800_v27  ;;  %4874 = vrsqrt.f32 %v3231_v50  ;;  %v3232_v24 = vmax.f32 %v3122_v22, 1e-24  ;;  %v4483_v14 = vpop.f32.mrf.mxu0 }
 0x2bc   :  { %v4863_v55 = vpop.eup %4862  ;;  %v6064_v11 = vadd.f32 %v5746_v56, %v2925_v33  ;;  %v3132_v38 = vpop.xlane.xlu0 %3131  ;;  %v3082_v28 = vmul.f32 %v6060_v36, %v6060_v36  ;;  %v3415_v16 = vmax.f32 %v3351_v49, 0.0 }
 0x2bd   :  { %4298 = vst [vmem:[%s6233_s6 + $0x28] sm:$0xff] %v4162_v7   ;;  %v3416_v19 = vmax.f32 %v3352_v6, 0.0  ;;  %v3357_v27 = vmul.f32 %v4863_v55, %v5805_v23  ;;  %v3237_v39 = vmax.f32 %v3132_v38, 1e-24  ;;  %4876 = vrsqrt.f32 %v3232_v24  ;;  %v2600_v50 = vpop.f32.mrf.mxu0 }
 0x2be   :  { %v4865_v56 = vpop.eup %4864  ;;  %v3134_v13 = vpop.xlane.xlu1 %3133  ;;  %3199 = vadd.xlane.f32.xlu0 %v3079_v35  ;;  %3205 = vadd.xlane.f32.xlu1 %v3082_v28  ;;  %v3080_v48 = vmul.f32 %v6064_v11, %v6064_v11 }
 0x2bf   :  { %v4157_v40 = vpack.c.bf16 %v3416_v19, %v3415_v16  ;;  %v3358_v9 = vmul.f32 %v4865_v56, %v5815_v53  ;;  %4878 = vrsqrt.f32 %v3237_v39  ;;  %v3238_v26 = vmax.f32 %v3134_v13, 1e-24 }
 0x2c0   :  { %v4867_v60 = vpop.eup %4866  ;;  %v3128_v57 = vpop.xlane.xlu0 %3127  ;;  %v3421_v23 = vmax.f32 %v3357_v27, 0.0 }
 0x2c1   :  { %4297 = vst [vmem:[%s6233_s6 + $0x20] sm:$0xff] %v4157_v40   ;;  %v3422_v49 = vmax.f32 %v3358_v9, 0.0  ;;  %v3235_v52 = vmax.f32 %v3128_v57, 1e-24  ;;  %v3355_v41 = vmul.f32 %v4867_v60, %v5812_v51  ;;  %4880 = vrsqrt.f32 %v3238_v26  ;;  %v4484_v51 = vpop.f32.mrf.mxu0  ;;  %v4966_v26 = vld [vmem:[%s6232_s5] ss:$0 sm:$0xff] }
 0x2c2   :  { %v3130_v33 = vpop.xlane.xlu1 %3129  ;;  %3201 = vadd.xlane.f32.xlu1 %v3080_v48  ;;  %v4869_v53 = vpop.eup %4868 }
 0x2c3   :  { %v4172_v22 = vpack.c.bf16 %v3422_v49, %v3421_v23  ;;  %4882 = vrsqrt.f32 %v3235_v52  ;;  %v3236_v7 = vmax.f32 %v3130_v33, 1e-24  ;;  %v4563_v6 = vpop.f32.mrf.mxu1  ;;  %v3356_v24 = vmul.f32 %v4869_v53, %v5820_v47  ;;  %v2603_v49 = vpop.f32.mrf.mxu0 }
 0x2c4   :  { %v4871_v55 = vpop.eup %4870  ;;  %v2946_v38 = vadd.f32 %v4563_v6, %v4483_v14  ;;  %v3140_v35 = vpop.xlane.xlu0 %3139  ;;  %v3419_v27 = vmax.f32 %v3355_v41, 0.0 }
 0x2c5   :  { %4300 = vst [vmem:[%s6233_s6 + $0x38] sm:$0xff] %v4172_v22   ;;  %v3361_v28 = vmul.f32 %v4871_v55, %v5825_v17  ;;  %4884 = vrsqrt.f32 %v3236_v7  ;;  %v3241_v16 = vmax.f32 %v3140_v35, 1e-24  ;;  %v2937_v19 = vpop.f32.mrf.mxu1  ;;  %v3420_v39 = vmax.f32 %v3356_v24, 0.0 }
 0x2c6   :  { %v2938_v56 = vadd.f32 %v2937_v19, %v2600_v50  ;;  %v4873_v13 = vpop.eup %4872  ;;  %v6090_v17 = vadd.f32 %v4966_v26, %v2946_v38 }
 0x2c7   :  { %4886 = vrsqrt.f32 %v3241_v16  ;;  %v4564_v40 = vpop.f32.mrf.mxu1  ;;  %v3142_v9 = vpop.xlane.xlu1 %3141  ;;  %v4167_v14 = vpack.c.bf16 %v3420_v39, %v3419_v27  ;;  %v3362_v60 = vmul.f32 %v4873_v13, %v5835_v31  ;;  %v3425_v23 = vmax.f32 %v3361_v28, 0.0 }
 0x2c8   :  { %v4875_v47 = vpop.eup %4874  ;;  %v6092_v57 = vadd.f32 %v4966_v26, %v2938_v56  ;;  %v3136_v48 = vpop.xlane.xlu0 %3135  ;;  %v2949_v50 = vadd.f32 %v4564_v40, %v4484_v51  ;;  %v3242_v52 = vmax.f32 %v3142_v9, 1e-24 }
 0x2c9   :  { %v3239_v41 = vmax.f32 %v3136_v48, 1e-24  ;;  %v2940_v33 = vpop.f32.mrf.mxu1  ;;  %4299 = vst [vmem:[%s6233_s6 + $0x30] sm:$0xff] %v4167_v14   ;;  %v3426_v31 = vmax.f32 %v3362_v60, 0.0  ;;  %v3359_v53 = vmul.f32 %v4875_v47, %v5832_v30  ;;  %v3085_v30 = vmul.f32 %v6090_v17, %v6090_v17 }
 0x2ca   :  { %v2941_v22 = vadd.f32 %v2940_v33, %v2603_v49  ;;  %v3083_v7 = vmul.f32 %v6092_v57, %v6092_v57  ;;  %v4877_v6 = vpop.eup %4876  ;;  %4888 = vrsqrt.f32 %v3242_v52  ;;  %v6103_v51 = vadd.f32 %v4966_v26, %v2949_v50 }
 0x2cb   :  { %v3138_v55 = vpop.xlane.xlu1 %3137  ;;  %v4182_v38 = vpack.c.bf16 %v3426_v31, %v3425_v23  ;;  %v3360_v35 = vmul.f32 %v4877_v6, %v5840_v42  ;;  %4890 = vrsqrt.f32 %v3239_v41  ;;  %v3423_v19 = vmax.f32 %v3359_v53, 0.0 }
 0x2cc   :  { %v4879_v24 = vpop.eup %4878  ;;  %v6101_v28 = vadd.f32 %v4966_v26, %v2941_v22  ;;  %3207 = vadd.xlane.f32.xlu0 %v3083_v7  ;;  %v3240_v16 = vmax.f32 %v3138_v55, 1e-24  ;;  %v3086_v26 = vmul.f32 %v6103_v51, %v6103_v51 }
 0x2cd   :  { %4302 = vst [vmem:[%s6233_s6 + $0x48] sm:$0xff] %v4182_v38   ;;  %v3424_v27 = vmax.f32 %v3360_v35, 0.0  ;;  %v3365_v39 = vmul.f32 %v4879_v24, %v5845_v45 }
 0x2ce   :  { %v3084_v42 = vmul.f32 %v6101_v28, %v6101_v28  ;;  %v4881_v56 = vpop.eup %4880  ;;  %4892 = vrsqrt.f32 %v3240_v16 }
 0x2cf   :  { %v4177_v40 = vpack.c.bf16 %v3424_v27, %v3423_v19  ;;  %v3366_v9 = vmul.f32 %v4881_v56, %v5855_v62  ;;  %v3429_v60 = vmax.f32 %v3365_v39, 0.0 }
 0x2d0   :  { %v4883_v13 = vpop.eup %4882  ;;  %3211 = vadd.xlane.f32.xlu0 %v3085_v30  ;;  %3209 = vadd.xlane.f32.xlu1 %v3084_v42 }
 0x2d1   :  { %v3363_v47 = vmul.f32 %v4883_v13, %v5852_v61  ;;  %4301 = vst [vmem:[%s6233_s6 + $0x40] sm:$0xff] %v4177_v40   ;;  %v3430_v45 = vmax.f32 %v3366_v9, 0.0 }
 0x2d2   :  { %v4885_v14 = vpop.eup %4884 }
 0x2d3   :  { %v3364_v48 = vmul.f32 %v4885_v14, %v5860_v2  ;;  %v3148_v23 = vpop.xlane.xlu0 %3147  ;;  %v4192_v50 = vpack.c.bf16 %v3430_v45, %v3429_v60  ;;  %v3427_v52 = vmax.f32 %v3363_v47, 0.0 }
 0x2d4   :  { %v4887_v49 = vpop.eup %4886  ;;  %v3245_v62 = vmax.f32 %v3148_v23, 1e-24  ;;  %3213 = vadd.xlane.f32.xlu1 %v3086_v26 }
 0x2d5   :  { %v3428_v41 = vmax.f32 %v3364_v48, 0.0  ;;  %4304 = vst [vmem:[%s6233_s6 + $0x58] sm:$0xff] %v4192_v50   ;;  %v3369_v33 = vmul.f32 %v4887_v49, %v5867_v12 }
 0x2d6   :  { %4894 = vrsqrt.f32 %v3245_v62 }
 0x2d7   :  { %v4187_v61 = vpack.c.bf16 %v3428_v41, %v3427_v52  ;;  %v3144_v31 = vpop.xlane.xlu0 %3143  ;;  %v3150_v53 = vpop.xlane.xlu1 %3149  ;;  %v3433_v24 = vmax.f32 %v3369_v33, 0.0 }
 0x2d8   :  { %v4889_v22 = vpop.eup %4888  ;;  %v3243_v7 = vmax.f32 %v3144_v31, 1e-24  ;;  %v3246_v2 = vmax.f32 %v3150_v53, 1e-24 }
 0x2d9   :  { %v4891_v6 = vpop.eup %4890  ;;  %4303 = vst [vmem:[%s6233_s6 + $0x50] sm:$0xff] %v4187_v61   ;;  %v3370_v55 = vmul.f32 %v4889_v22, %v5877_v59 }
 0x2da   :  { %4896 = vrsqrt.f32 %v3243_v7  ;;  %v3367_v35 = vmul.f32 %v4891_v6, %v5874_v18 }
 0x2db   :  { %v3434_v38 = vmax.f32 %v3370_v55, 0.0  ;;  %4898 = vrsqrt.f32 %v3246_v2  ;;  %v3146_v12 = vpop.xlane.xlu1 %3145  ;;  %v4893_v16 = vpop.eup %4892 }
 0x2dc   :  { %v3244_v30 = vmax.f32 %v3146_v12, 1e-24  ;;  %v3368_v27 = vmul.f32 %v4893_v16, %v5880_v8  ;;  %v3431_v39 = vmax.f32 %v3367_v35, 0.0 }
 0x2dd   :  { %v4202_v19 = vpack.c.bf16 %v3434_v38, %v3433_v24 }
 0x2de   :  { %4900 = vrsqrt.f32 %v3244_v30  ;;  %v3432_v42 = vmax.f32 %v3368_v27, 0.0 }
 0x2df   :  { %4306 = vst [vmem:[%s6233_s6 + $0x68] sm:$0xff] %v4202_v19  }
 0x2e0   :  { %v4197_v59 = vpack.c.bf16 %v3432_v42, %v3431_v39 }
 0x2e2   :  { %4305 = vst [vmem:[%s6233_s6 + $0x60] sm:$0xff] %v4197_v59  }
 0x2e3   :  { %v3156_v18 = vpop.xlane.xlu0 %3155  ;;  %v4895_v56 = vpop.eup %4894 }
 0x2e4   :  { %v3249_v13 = vmax.f32 %v3156_v18, 1e-24  ;;  %v3373_v9 = vmul.f32 %v4895_v56, %v5889_v46 }
 0x2e6   :  { %4902 = vrsqrt.f32 %v3249_v13  ;;  %v3437_v49 = vmax.f32 %v3373_v9, 0.0 }
 0x2e7   :  { %v4897_v40 = vpop.eup %4896  ;;  %v3152_v8 = vpop.xlane.xlu0 %3151 }
 0x2e8   :  { %v3158_v47 = vpop.xlane.xlu1 %3157  ;;  %v4899_v14 = vpop.eup %4898  ;;  %v3247_v60 = vmax.f32 %v3152_v8, 1e-24  ;;  %v3371_v48 = vmul.f32 %v4897_v40, %v5892_v54 }
 0x2e9   :  { %v3250_v45 = vmax.f32 %v3158_v47, 1e-24  ;;  %v3374_v26 = vmul.f32 %v4899_v14, %v5897_v29 }
 0x2ea   :  { %4904 = vrsqrt.f32 %v3247_v60  ;;  %v3435_v61 = vmax.f32 %v3371_v48, 0.0 }
 0x2eb   :  { %v4901_v23 = vpop.eup %4900  ;;  %v3438_v50 = vmax.f32 %v3374_v26, 0.0  ;;  %4906 = vrsqrt.f32 %v3250_v45 }
 0x2ec   :  { %v3154_v62 = vpop.xlane.xlu1 %3153  ;;  %v3372_v52 = vmul.f32 %v4901_v23, %v5900_v3 }
 0x2ed   :  { %v3248_v41 = vmax.f32 %v3154_v62, 1e-24  ;;  %v4212_v46 = vpack.c.bf16 %v3438_v50, %v3437_v49 }
 0x2ee   :  { %v3436_v33 = vmax.f32 %v3372_v52, 0.0 }
 0x2ef   :  { %4908 = vrsqrt.f32 %v3248_v41  ;;  %4308 = vst [vmem:[%s6233_s6 + $0x78] sm:$0xff] %v4212_v46  }
 0x2f0   :  { %v4207_v29 = vpack.c.bf16 %v3436_v33, %v3435_v61 }
 0x2f2   :  { %4307 = vst [vmem:[%s6233_s6 + $0x70] sm:$0xff] %v4207_v29  }
 0x2f3   :  { %v3164_v54 = vpop.xlane.xlu0 %3163  ;;  %v4903_v31 = vpop.eup %4902 }
 0x2f4   :  { %v3253_v53 = vmax.f32 %v3164_v54, 1e-24  ;;  %v3377_v3 = vmul.f32 %v4903_v31, %v5909_v63 }
 0x2f6   :  { %4910 = vrsqrt.f32 %v3253_v53  ;;  %v3441_v16 = vmax.f32 %v3377_v3, 0.0 }
 0x2f7   :  { %v4905_v22 = vpop.eup %4904  ;;  %v3160_v7 = vpop.xlane.xlu0 %3159 }
 0x2f8   :  { %v3166_v2 = vpop.xlane.xlu1 %3165  ;;  %v4907_v6 = vpop.eup %4906  ;;  %v3251_v55 = vmax.f32 %v3160_v7, 1e-24  ;;  %v3375_v35 = vmul.f32 %v4905_v22, %v5912_v21  ;;  %v6254_v7 = vld [vmem:[#allocation3_spill] sm:$0xff] }
 0x2f9   :  { %v3254_v24 = vmax.f32 %v3166_v2, 1e-24  ;;  %v3378_v38 = vmul.f32 %v4907_v6, %v5917_v25 }
 0x2fa   :  { %4912 = vrsqrt.f32 %v3251_v55  ;;  %v3439_v42 = vmax.f32 %v3375_v35, 0.0  ;;  %v6255_v35 = vld [vmem:[#allocation4_spill] sm:$0xff] }
 0x2fb   :  { %v3442_v30 = vmax.f32 %v3378_v38, 0.0  ;;  %4914 = vrsqrt.f32 %v3254_v24 }
 0x2fc   :  { %v4909_v12 = vpop.eup %4908  ;;  %v3162_v19 = vpop.xlane.xlu1 %3161 }
 0x2fd   :  { %v3376_v27 = vmul.f32 %v4909_v12, %v5920_v43  ;;  %v3252_v39 = vmax.f32 %v3162_v19, 1e-24  ;;  %v4222_v63 = vpack.c.bf16 %v3442_v30, %v3441_v16 }
 0x2ff   :  { %v3440_v59 = vmax.f32 %v3376_v27, 0.0  ;;  %4916 = vrsqrt.f32 %v3252_v39  ;;  %4310 = vst [vmem:[%s6233_s6 + $0x88] sm:$0xff] %v4222_v63  }
 0x301   :  { %v4217_v25 = vpack.c.bf16 %v3440_v59, %v3439_v42  ;;  %v6256_v59 = vld [vmem:[#allocation5_spill] sm:$0xff] }
 0x303   :  { %4309 = vst [vmem:[%s6233_s6 + $0x80] sm:$0xff] %v4217_v25   ;;  %v3172_v21 = vpop.xlane.xlu0 %3171  ;;  %v4911_v18 = vpop.eup %4910 }
 0x304   :  { %v3257_v56 = vmax.f32 %v3172_v21, 1e-24  ;;  %v3381_v43 = vmul.f32 %v4911_v18, %v5929_v58 }
 0x306   :  { %4918 = vrsqrt.f32 %v3257_v56  ;;  %v3445_v48 = vmax.f32 %v3381_v43, 0.0 }
 0x307   :  { %v4913_v13 = vpop.eup %4912  ;;  %v3168_v40 = vpop.xlane.xlu0 %3167 }
 0x308   :  { %v3174_v9 = vpop.xlane.xlu1 %3173  ;;  %v4915_v8 = vpop.eup %4914  ;;  %v3255_v47 = vmax.f32 %v3168_v40, 1e-24  ;;  %v3379_v45 = vmul.f32 %v4913_v13, %v5932_v4  ;;  %v6257_v40 = vld [vmem:[#allocation7_spill] sm:$0xff] }
 0x309   :  { %v3258_v14 = vmax.f32 %v3174_v9, 1e-24  ;;  %v3382_v60 = vmul.f32 %v4915_v8, %v5937_v10  ;;  %v6258_v8 = vld [vmem:[#allocation6_spill] sm:$0xff] }
 0x30a   :  { %4920 = vrsqrt.f32 %v3255_v47  ;;  %v3443_v52 = vmax.f32 %v3379_v45, 0.0 }
 0x30b   :  { %v3446_v23 = vmax.f32 %v3382_v60, 0.0  ;;  %4922 = vrsqrt.f32 %v3258_v14 }
 0x30c   :  { %v4917_v26 = vpop.eup %4916  ;;  %v3170_v49 = vpop.xlane.xlu1 %3169 }
 0x30d   :  { %v3380_v50 = vmul.f32 %v4917_v26, %v5940_v1  ;;  %v3256_v62 = vmax.f32 %v3170_v49, 1e-24  ;;  %v4232_v58 = vpack.c.bf16 %v3446_v23, %v3445_v48  ;;  %v6259_v48 = vld [vmem:[#allocation8_spill] sm:$0xff] }
 0x30f   :  { %v3444_v41 = vmax.f32 %v3380_v50, 0.0  ;;  %4924 = vrsqrt.f32 %v3256_v62  ;;  %4312 = vst [vmem:[%s6233_s6 + $0x98] sm:$0xff] %v4232_v58  }
 0x311   :  { %v4227_v10 = vpack.c.bf16 %v3444_v41, %v3443_v52 }
 0x313   :  { %4311 = vst [vmem:[%s6233_s6 + $0x90] sm:$0xff] %v4227_v10   ;;  %v3180_v4 = vpop.xlane.xlu0 %3179  ;;  %v4919_v46 = vpop.eup %4918 }
 0x314   :  { %v3261_v61 = vmax.f32 %v3180_v4, 1e-24  ;;  %v3385_v1 = vmul.f32 %v4919_v46, %v5949_v20 }
 0x316   :  { %4926 = vrsqrt.f32 %v3261_v61  ;;  %v3449_v55 = vmax.f32 %v3385_v1, 0.0  ;;  %v6260_v61 = vld [vmem:[#allocation9_spill] sm:$0xff] }
 0x317   :  { %v4921_v33 = vpop.eup %4920  ;;  %v3176_v29 = vpop.xlane.xlu0 %3175 }
 0x318   :  { %v3182_v54 = vpop.xlane.xlu1 %3181  ;;  %v4923_v31 = vpop.eup %4922  ;;  %v3259_v53 = vmax.f32 %v3176_v29, 1e-24  ;;  %v3383_v2 = vmul.f32 %v4921_v33, %v6254_v7  ;;  %v6262_v7 = vld [vmem:[#allocation10_spill] sm:$0xff] }
 0x319   :  { %v3262_v22 = vmax.f32 %v3182_v54, 1e-24  ;;  %v3386_v3 = vmul.f32 %v4923_v31, %v5957_v0 }
 0x31a   :  { %4928 = vrsqrt.f32 %v3259_v53  ;;  %v3447_v30 = vmax.f32 %v3383_v2, 0.0 }
 0x31b   :  { %v3450_v24 = vmax.f32 %v3386_v3, 0.0  ;;  %4930 = vrsqrt.f32 %v3262_v22  ;;  %v6261_v22 = vld [vmem:[#allocation11_spill] sm:$0xff] }
 0x31c   :  { %v4925_v6 = vpop.eup %4924  ;;  %v3178_v38 = vpop.xlane.xlu1 %3177 }
 0x31d   :  { %v3384_v12 = vmul.f32 %v4925_v6, %v6255_v35  ;;  %v3260_v16 = vmax.f32 %v3178_v38, 1e-24  ;;  %v4242_v20 = vpack.c.bf16 %v3450_v24, %v3449_v55  ;;  %v6263_v35 = vld [vmem:[#allocation12_spill] sm:$0xff] }
 0x31f   :  { %v3448_v19 = vmax.f32 %v3384_v12, 0.0  ;;  %4932 = vrsqrt.f32 %v3260_v16  ;;  %4314 = vst [vmem:[%s6233_s6 + $0xa8] sm:$0xff] %v4242_v20  }
 0x321   :  { %v4237_v0 = vpack.c.bf16 %v3448_v19, %v3447_v30 }
 0x323   :  { %4313 = vst [vmem:[%s6233_s6 + $0xa0] sm:$0xff] %v4237_v0   ;;  %v3188_v27 = vpop.xlane.xlu0 %3187  ;;  %v4927_v39 = vpop.eup %4926 }
 0x324   :  { %v3265_v63 = vmax.f32 %v3188_v27, 1e-24  ;;  %v3389_v25 = vmul.f32 %v4927_v39, %v6256_v59 }
 0x326   :  { %4934 = vrsqrt.f32 %v3265_v63  ;;  %v3453_v60 = vmax.f32 %v3389_v25, 0.0 }
 0x327   :  { %v4929_v42 = vpop.eup %4928  ;;  %v3184_v21 = vpop.xlane.xlu0 %3183 }
 0x328   :  { %v3190_v18 = vpop.xlane.xlu1 %3189  ;;  %v4931_v56 = vpop.eup %4930  ;;  %v3263_v13 = vmax.f32 %v3184_v21, 1e-24  ;;  %v3387_v47 = vmul.f32 %v4929_v42, %v6258_v8 }
 0x329   :  { %v3266_v43 = vmax.f32 %v3190_v18, 1e-24  ;;  %v3390_v9 = vmul.f32 %v4931_v56, %v6257_v40 }
 0x32a   :  { %4936 = vrsqrt.f32 %v3263_v13  ;;  %v3451_v62 = vmax.f32 %v3387_v47, 0.0 }
 0x32b   :  { %v3454_v45 = vmax.f32 %v3390_v9, 0.0  ;;  %4938 = vrsqrt.f32 %v3266_v43 }
 0x32c   :  { %v4933_v14 = vpop.eup %4932  ;;  %v3186_v26 = vpop.xlane.xlu1 %3185 }
 0x32d   :  { %v3388_v23 = vmul.f32 %v4933_v14, %v6259_v48  ;;  %v3264_v49 = vmax.f32 %v3186_v26, 1e-24  ;;  %v4252_v50 = vpack.c.bf16 %v3454_v45, %v3453_v60 }
 0x32f   :  { %v3452_v58 = vmax.f32 %v3388_v23, 0.0  ;;  %4940 = vrsqrt.f32 %v3264_v49  ;;  %4316 = vst [vmem:[%s6233_s6 + $0xb8] sm:$0xff] %v4252_v50  }
 0x331   :  { %v4247_v52 = vpack.c.bf16 %v3452_v58, %v3451_v62 }
 0x333   :  { %4315 = vst [vmem:[%s6233_s6 + $0xb0] sm:$0xff] %v4247_v52   ;;  %v3196_v41 = vpop.xlane.xlu0 %3195  ;;  %v4935_v10 = vpop.eup %4934 }
 0x334   :  { %v3269_v4 = vmax.f32 %v3196_v41, 1e-24  ;;  %v3393_v33 = vmul.f32 %v4935_v10, %v6260_v61 }
 0x336   :  { %4942 = vrsqrt.f32 %v3269_v4  ;;  %v3457_v55 = vmax.f32 %v3393_v33, 0.0 }
 0x337   :  { %v4937_v46 = vpop.eup %4936  ;;  %v3192_v1 = vpop.xlane.xlu0 %3191 }
 0x338   :  { %v3198_v29 = vpop.xlane.xlu1 %3197  ;;  %v4939_v54 = vpop.eup %4938  ;;  %v3267_v31 = vmax.f32 %v3192_v1, 1e-24  ;;  %v3391_v2 = vmul.f32 %v4937_v46, %v6262_v7 }
 0x339   :  { %v3270_v53 = vmax.f32 %v3198_v29, 1e-24  ;;  %v3394_v3 = vmul.f32 %v4939_v54, %v6261_v22 }
 0x33a   :  { %4944 = vrsqrt.f32 %v3267_v31  ;;  %v3455_v30 = vmax.f32 %v3391_v2, 0.0 }
 0x33b   :  { %v3458_v24 = vmax.f32 %v3394_v3, 0.0  ;;  %4946 = vrsqrt.f32 %v3270_v53 }
 0x33c   :  { %v4941_v6 = vpop.eup %4940  ;;  %v3194_v38 = vpop.xlane.xlu1 %3193 }
 0x33d   :  { %v3392_v12 = vmul.f32 %v4941_v6, %v6263_v35  ;;  %v3268_v16 = vmax.f32 %v3194_v38, 1e-24  ;;  %v4262_v20 = vpack.c.bf16 %v3458_v24, %v3457_v55 }
 0x33f   :  { %v3456_v19 = vmax.f32 %v3392_v12, 0.0  ;;  %4948 = vrsqrt.f32 %v3268_v16  ;;  %4318 = vst [vmem:[%s6233_s6 + $0xc8] sm:$0xff] %v4262_v20  }
 0x341   :  { %v4257_v0 = vpack.c.bf16 %v3456_v19, %v3455_v30 }
 0x343   :  { %4317 = vst [vmem:[%s6233_s6 + $0xc0] sm:$0xff] %v4257_v0   ;;  %v3204_v27 = vpop.xlane.xlu0 %3203  ;;  %v4943_v39 = vpop.eup %4942 }
 0x344   :  { %v3273_v63 = vmax.f32 %v3204_v27, 1e-24  ;;  %v3397_v59 = vmul.f32 %v4943_v39, %v6011_v15 }
 0x346   :  { %4950 = vrsqrt.f32 %v3273_v63  ;;  %v3461_v8 = vmax.f32 %v3397_v59, 0.0 }
 0x347   :  { %v4945_v42 = vpop.eup %4944  ;;  %v3200_v25 = vpop.xlane.xlu0 %3199 }
 0x348   :  { %v3206_v21 = vpop.xlane.xlu1 %3205  ;;  %v4947_v18 = vpop.eup %4946  ;;  %v3271_v56 = vmax.f32 %v3200_v25, 1e-24  ;;  %v3395_v40 = vmul.f32 %v4945_v42, %v6015_v44 }
 0x349   :  { %v3274_v13 = vmax.f32 %v3206_v21, 1e-24  ;;  %v3398_v43 = vmul.f32 %v4947_v18, %v6021_v34 }
 0x34a   :  { %4952 = vrsqrt.f32 %v3271_v56  ;;  %v3459_v26 = vmax.f32 %v3395_v40, 0.0 }
 0x34b   :  { %v3462_v47 = vmax.f32 %v3398_v43, 0.0  ;;  %4954 = vrsqrt.f32 %v3274_v13 }
 0x34c   :  { %v4949_v9 = vpop.eup %4948  ;;  %v3202_v14 = vpop.xlane.xlu1 %3201 }
 0x34d   :  { %v3396_v60 = vmul.f32 %v4949_v9, %v6024_v5  ;;  %v3272_v45 = vmax.f32 %v3202_v14, 1e-24  ;;  %v4272_v15 = vpack.c.bf16 %v3462_v47, %v3461_v8 }
 0x34f   :  { %v3460_v48 = vmax.f32 %v3396_v60, 0.0  ;;  %4956 = vrsqrt.f32 %v3272_v45  ;;  %4320 = vst [vmem:[%s6233_s6 + $0xd8] sm:$0xff] %v4272_v15  }
 0x351   :  { %v4267_v34 = vpack.c.bf16 %v3460_v48, %v3459_v26 }
 0x353   :  { %4319 = vst [vmem:[%s6233_s6 + $0xd0] sm:$0xff] %v4267_v34   ;;  %v4951_v44 = vpop.eup %4950 }
 0x354   :  { %v3401_v5 = vmul.f32 %v4951_v44, %v6047_v32 }
 0x355   :  { %v3208_v23 = vpop.xlane.xlu0 %3207 }
 0x356   :  { %v3275_v49 = vmax.f32 %v3208_v23, 1e-24  ;;  %v3465_v33 = vmax.f32 %v3401_v5, 0.0 }
 0x357   :  { %v4953_v50 = vpop.eup %4952 }
 0x358   :  { %v4955_v62 = vpop.eup %4954  ;;  %4958 = vrsqrt.f32 %v3275_v49  ;;  %v3399_v10 = vmul.f32 %v4953_v50, %v6051_v37 }
 0x359   :  { %v3402_v58 = vmul.f32 %v4955_v62, %v6060_v36  ;;  %v3212_v52 = vpop.xlane.xlu0 %3211  ;;  %v3210_v41 = vpop.xlane.xlu1 %3209 }
 0x35a   :  { %v3277_v4 = vmax.f32 %v3212_v52, 1e-24  ;;  %v3276_v46 = vmax.f32 %v3210_v41, 1e-24  ;;  %v3463_v32 = vmax.f32 %v3399_v10, 0.0 }
 0x35b   :  { %v3466_v1 = vmax.f32 %v3402_v58, 0.0 }
 0x35c   :  { %v4957_v61 = vpop.eup %4956  ;;  %4960 = vrsqrt.f32 %v3277_v4 }
 0x35d   :  { %v3400_v29 = vmul.f32 %v4957_v61, %v6064_v11  ;;  %v4282_v54 = vpack.c.bf16 %v3466_v1, %v3465_v33  ;;  %4962 = vrsqrt.f32 %v3276_v46  ;;  %v3214_v31 = vpop.xlane.xlu1 %3213 }
 0x35e   :  { %v3278_v22 = vmax.f32 %v3214_v31, 1e-24 }
 0x35f   :  { %v3464_v53 = vmax.f32 %v3400_v29, 0.0  ;;  %4322 = vst [vmem:[%s6233_s6 + $0xe8] sm:$0xff] %v4282_v54  }
 0x360   :  { %4964 = vrsqrt.f32 %v3278_v22 }
 0x361   :  { %v4277_v36 = vpack.c.bf16 %v3464_v53, %v3463_v32 }
 0x363   :  { %4321 = vst [vmem:[%s6233_s6 + $0xe0] sm:$0xff] %v4277_v36  }
 0x365   :  { %v4959_v37 = vpop.eup %4958 }
 0x366   :  { %v3403_v11 = vmul.f32 %v4959_v37, %v6092_v57 }
 0x368   :  { %v3467_v24 = vmax.f32 %v3403_v11, 0.0 }
 0x369   :  { %v4961_v3 = vpop.eup %4960 }
 0x36a   :  { %v4963_v7 = vpop.eup %4962  ;;  %v3405_v6 = vmul.f32 %v4961_v3, %v6090_v17 }
 0x36b   :  { %v3404_v2 = vmul.f32 %v4963_v7, %v6101_v28 }
 0x36c   :  { %v3469_v16 = vmax.f32 %v3405_v6, 0.0 }
 0x36d   :  { %v4965_v55 = vpop.eup %4964  ;;  %v3468_v38 = vmax.f32 %v3404_v2, 0.0 }
 0x36e   :  { %v3406_v35 = vmul.f32 %v4965_v55, %v6103_v51 }
 0x36f   :  { %v4287_v12 = vpack.c.bf16 %v3468_v38, %v3467_v24 }
 0x370   :  { %v3470_v20 = vmax.f32 %v3406_v35, 0.0 }
 0x371   :  { %4323 = vst [vmem:[%s6233_s6 + $0xf0] sm:$0xff] %v4287_v12  }
 0x372   :  { %v4292_v30 = vpack.c.bf16 %v3470_v20, %v3469_v16 }
 0x374   :  { %4324 = vst [vmem:[%s6233_s6 + $0xf8] sm:$0xff] %v4292_v30  }

</bundles_post_ra>
